<compile_context>
chip_gen: v6e
topology: v6e:2x2x1
jax: 0.10.0
libtpu: 0.0.40
codegen_flags: <defaults>
</compile_context>

<pallas_src>
import functools

import jax
import jax.numpy as jnp
import numpy as np
from jax import lax
from jax.experimental import pallas as pl
from jax.experimental.pallas import tpu as pltpu


# ----------------------------------------------------------------------------
# Kernel
# ----------------------------------------------------------------------------
def _lstm_chunk_kernel(tlen_ref,
                       x_ref, wih0_ref, whh0_ref, b0_ref,
                       wih1_ref, whh1_ref, b1_ref,
                       wout_ref, bout_ref, h0_ref, c0_ref,
                       logits_ref, hN_ref, cN_ref,
                       gates_ref, y_ref, *, unroll):
    """One time chunk of the 2-layer LSTM + output Linear.

    Shapes (Bp % 8 == 0, Hp % 128 == 0; I and O are the true, unpadded dims):
      tlen_ref   : (1,) int32 SMEM      true sequence length (scalar prefetch)
      x_ref      : (Tc, Bp, I)          input chunk (time-major), mm dtype
      wih0/wih1  : (I, 4Hp)/(Hp, 4Hp)   input->gates, gate order [i, f, o, g]
      whh0/whh1  : (Hp, 4Hp)            hidden->gates
      b0/b1      : (1, 4Hp) f32         bias_ih + bias_hh (pre-summed)
      wout/bout  : (Hp, O) / (1, O)
      h0/c0      : (2, Bp, Hp) f32      initial states (used on chunk 0 only)
      logits_ref : (Tc, Bp, O) f32      output chunk
      hN/cN      : (2, Bp, Hp) f32      VMEM-resident running state (final out)
      gates_ref  : (Tc*Bp, 4Hp) f32     scratch: hoisted input projections
      y_ref      : (Tc*Bp, Hp) f32      scratch: per-layer hidden outputs
    """
    Tc, Bp, I = x_ref.shape
    Hp = whh0_ref.shape[0]
    O = wout_ref.shape[1]
    mm_dtype = whh0_ref.dtype

    # Chunk 0: seed the running state from the provided initial state.
    @pl.when(pl.program_id(0) == 0)
    def _init():
        hN_ref[...] = h0_ref[...]
        cN_ref[...] = c0_ref[...]

    tlen = tlen_ref[0]
    t_start = pl.program_id(0) * Tc

    def make_step(whh_ref):
        # One recurrent LSTM cell step; gate slices sit on 128-lane boundaries.
        def step(t, carry):
            h, c = carry
            r = pl.multiple_of(t * Bp, Bp)
            g = gates_ref[pl.ds(r, Bp), :] + jnp.dot(
                h.astype(mm_dtype), whh_ref[...],
                preferred_element_type=jnp.float32)
            # sigmoid(x) = 0.5*(1+tanh(x/2)): one EUP push covering [i, f, o].
            sg = 0.5 * (1.0 + jnp.tanh(0.5 * g[:, 0:3 * Hp]))
            i_g = sg[:, 0 * Hp:1 * Hp]
            f_g = sg[:, 1 * Hp:2 * Hp]
            o_g = sg[:, 2 * Hp:3 * Hp]
            g_g = jnp.tanh(g[:, 3 * Hp:4 * Hp])
            c_new = f_g * c + i_g * g_g
            h_new = o_g * jnp.tanh(c_new)
            # Mask padded (beyond true length) timesteps so state stays exact.
            valid = (t_start + t) < tlen
            h = jnp.where(valid, h_new, h)
            c = jnp.where(valid, c_new, c)
            y_ref[pl.ds(r, Bp), :] = h
            return h, c
        return step

    # ---- layer 0: hoisted input projection, then the recurrence ----
    xc = x_ref[...].reshape(Tc * Bp, I)
    gates_ref[...] = (jnp.dot(xc.astype(mm_dtype), wih0_ref[...],
                              preferred_element_type=jnp.float32)
                      + b0_ref[...])
    h0f, c0f = lax.fori_loop(0, Tc, make_step(whh0_ref),
                             (hN_ref[0], cN_ref[0]), unroll=unroll)

    # ---- layer 1: hoisted projection of layer-0 outputs, then recurrence ----
    gates_ref[...] = (jnp.dot(y_ref[...].astype(mm_dtype), wih1_ref[...],
                              preferred_element_type=jnp.float32)
                      + b1_ref[...])
    h1f, c1f = lax.fori_loop(0, Tc, make_step(whh1_ref),
                             (hN_ref[1], cN_ref[1]), unroll=unroll)

    # State stores (full-tile, 8x128 dense).
    hN_ref[0] = h0f
    hN_ref[1] = h1f
    cN_ref[0] = c0f
    cN_ref[1] = c1f

    # ---- fused output Linear: one (Tc*Bp, Hp) x (Hp, O) matmul + store ----
    logits = (jnp.dot(y_ref[...].astype(mm_dtype), wout_ref[...],
                      preferred_element_type=jnp.float32) + bout_ref[...])
    logits_ref[...] = logits.reshape(Tc, Bp, O)


# ----------------------------------------------------------------------------
# Wrapper (layout prep + pallas_call)
# ----------------------------------------------------------------------------
_GATE_PERM = np.array([0, 1, 3, 2])   # torch [i,f,g,o] -> kernel [i,f,o,g]


def _round_up(n, m):
    return ((n + m - 1) // m) * m


def _prep_gate_weight(w, H, Hp, in_size, in_pad, dtype):
    """(4H, in) torch layout -> (in_pad, 4*Hp) kernel layout, per-gate padded."""
    w4 = w.astype(jnp.float32).reshape(4, H, in_size)
    w4 = jnp.take(w4, _GATE_PERM, axis=0)
    w4 = jnp.pad(w4, ((0, 0), (0, Hp - H), (0, in_pad - in_size)))
    return jnp.transpose(w4, (2, 0, 1)).reshape(in_pad, 4 * Hp).astype(dtype)


def _prep_gate_bias(b, H, Hp):
    b4 = b.astype(jnp.float32).reshape(4, H)
    b4 = jnp.take(b4, _GATE_PERM, axis=0)
    b4 = jnp.pad(b4, ((0, 0), (0, Hp - H)))
    return b4.reshape(1, 4 * Hp)


def _const_spec(shape):
    """Constant-index-map block; single-buffered when the JAX supports it."""
    index_map = lambda *_: (0,) * len(shape)
    try:
        return pl.BlockSpec(shape, index_map, pipeline_mode=pl.Buffered(1))
    except (AttributeError, TypeError):   # graceful fallback on older JAX
        return pl.BlockSpec(shape, index_map)


def char_lstm_loop_forward(x, params, h=None, c=None, *,
                           time_chunk=32, matmul_dtype=jnp.float32, unroll=8):
    """Equivalent of CharLSTMLoop.forward(x, h, c). x: (B, T, I), batch_first."""
    B, T, I = x.shape
    H = params["whh0"].shape[1]
    O = params["wout"].shape[0]
    mm_dtype = jnp.dtype(matmul_dtype)

    if h is None or c is None:
        h = jnp.zeros((2, B, H), jnp.float32)
        c = jnp.zeros((2, B, H), jnp.float32)

    Bp = _round_up(B, 8)
    Hp = _round_up(H, 128)

    # Time chunking: keep the target chunk, pad T up, mask trailing steps.
    Tc = max(1, min(time_chunk, T))
    n_chunks = -(-T // Tc)
    T_pad = n_chunks * Tc
    unr = max(1, min(unroll, Tc))

    # Time-major input, padded only in batch & time (I stays unpadded in HBM).
    x_tb = jnp.transpose(x.astype(mm_dtype), (1, 0, 2))            # (T, B, I)
    x_tb = jnp.pad(x_tb, ((0, T_pad - T), (0, Bp - B), (0, 0)))

    # One-time weight re-layout (no in-kernel transposes).
    wih0 = _prep_gate_weight(params["wih0"], H, Hp, I, I, mm_dtype)
    whh0 = _prep_gate_weight(params["whh0"], H, Hp, H, Hp, mm_dtype)
    wih1 = _prep_gate_weight(params["wih1"], H, Hp, H, Hp, mm_dtype)
    whh1 = _prep_gate_weight(params["whh1"], H, Hp, H, Hp, mm_dtype)
    b0 = _prep_gate_bias(params["bih0"] + params["bhh0"], H, Hp)
    b1 = _prep_gate_bias(params["bih1"] + params["bhh1"], H, Hp)
    wout = jnp.pad(params["wout"].astype(jnp.float32),
                   ((0, 0), (0, Hp - H))).T.astype(mm_dtype)        # (Hp, O)
    bout = params["bout"].astype(jnp.float32).reshape(1, O)
    h0 = jnp.pad(h.astype(jnp.float32), ((0, 0), (0, Bp - B), (0, Hp - H)))
    c0 = jnp.pad(c.astype(jnp.float32), ((0, 0), (0, Bp - B), (0, Hp - H)))
    tlen = jnp.array([T], jnp.int32)

    # VMEM budget -> raise the scoped limit above the footprint.
    mm_bytes = mm_dtype.itemsize
    weight_bytes = ((I * 4 * Hp) + 3 * (Hp * 4 * Hp) + (Hp * O)) * mm_bytes
    weight_bytes += (2 * 4 * Hp + O) * 4 + 2 * (2 * Bp * Hp) * 4
    pipe_bytes = 2 * (Tc * Bp * I) * mm_bytes + 2 * (Tc * Bp * O) * 4
    pipe_bytes += 2 * 2 * (2 * Bp * Hp) * 4
    scratch_bytes = (Tc * Bp * 5 * Hp) * 4
    vmem_limit = max(32 << 20,
                     int(1.25 * (weight_bytes + pipe_bytes + scratch_bytes))
                     + (4 << 20))

    grid_spec = pltpu.PrefetchScalarGridSpec(
        num_scalar_prefetch=1,
        grid=(n_chunks,),
        in_specs=[
            pl.BlockSpec((Tc, Bp, I), lambda t, tl: (t, 0, 0)),    # x chunk
            _const_spec((I, 4 * Hp)), _const_spec((Hp, 4 * Hp)),
            _const_spec((1, 4 * Hp)),
            _const_spec((Hp, 4 * Hp)), _const_spec((Hp, 4 * Hp)),
            _const_spec((1, 4 * Hp)),
            _const_spec((Hp, O)), _const_spec((1, O)),
            _const_spec((2, Bp, Hp)), _const_spec((2, Bp, Hp)),    # h0, c0
        ],
        out_specs=[
            pl.BlockSpec((Tc, Bp, O), lambda t, tl: (t, 0, 0)),    # logits
            pl.BlockSpec((2, Bp, Hp), lambda t, tl: (0, 0, 0)),    # hN carry
            pl.BlockSpec((2, Bp, Hp), lambda t, tl: (0, 0, 0)),    # cN carry
        ],
        scratch_shapes=[
            pltpu.VMEM((Tc * Bp, 4 * Hp), jnp.float32),            # gates
            pltpu.VMEM((Tc * Bp, Hp), jnp.float32),                # layer outs
        ],
    )

    logits_tb, hN, cN = pl.pallas_call(
        functools.partial(_lstm_chunk_kernel, unroll=unr),
        grid_spec=grid_spec,
        out_shape=(jax.ShapeDtypeStruct((T_pad, Bp, O), jnp.float32),
                   jax.ShapeDtypeStruct((2, Bp, Hp), jnp.float32),
                   jax.ShapeDtypeStruct((2, Bp, Hp), jnp.float32)),
        compiler_params=pltpu.CompilerParams(
            dimension_semantics=("arbitrary",),
            vmem_limit_bytes=vmem_limit),
    )(tlen, x_tb, wih0, whh0, b0, wih1, whh1, b1, wout, bout, h0, c0)

    logits = jnp.transpose(logits_tb[:T, :B, :], (1, 0, 2))         # (B, T, O)
    return logits, hN[:, :B, :H], cN[:, :B, :H]


# ----------------------------------------------------------------------------
# Parameter init (mirrors PyTorch LSTM/Linear shapes & U(-k, k) init)
# ----------------------------------------------------------------------------
def init_params(key, input_size, output_size, hidden_size):
    H = hidden_size
    k = 1.0 / np.sqrt(H)
    ks = jax.random.split(key, 10)

    def u(kk, shape):
        return jax.random.uniform(kk, shape, jnp.float32, -k, k)

    return {
        "wih0": u(ks[0], (4 * H, input_size)),
        "whh0": u(ks[1], (4 * H, H)),
        "bih0": u(ks[2], (4 * H,)),
        "bhh0": u(ks[3], (4 * H,)),
        "wih1": u(ks[4], (4 * H, H)),
        "whh1": u(ks[5], (4 * H, H)),
        "bih1": u(ks[6], (4 * H,)),
        "bhh1": u(ks[7], (4 * H,)),
        "wout": u(ks[8], (output_size, H)),
        "bout": u(ks[9], (output_size,)),
    }


# ----------------------------------------------------------------------------
# Pure-JAX reference (correctness check)
# ----------------------------------------------------------------------------
def reference_forward(x, params, h=None, c=None):
    B, T, _ = x.shape
    H = params["whh0"].shape[1]
    if h is None or c is None:
        h = jnp.zeros((2, B, H), jnp.float32)
        c = jnp.zeros((2, B, H), jnp.float32)

    def cell(x_t, hh, cc, wih, whh, b):
        g = x_t @ wih.T + hh @ whh.T + b
        i = jax.nn.sigmoid(g[:, :H])
        f = jax.nn.sigmoid(g[:, H:2 * H])
        gg = jnp.tanh(g[:, 2 * H:3 * H])
        o = jax.nn.sigmoid(g[:, 3 * H:])
        cc = f * cc + i * gg
        hh = o * jnp.tanh(cc)
        return hh, cc

    b0 = params["bih0"] + params["bhh0"]
    b1 = params["bih1"] + params["bhh1"]
    h0, c0 = h[0], c[0]
    h1, c1 = h[1], c[1]
    outs = []
    for t in range(T):
        h0, c0 = cell(x[:, t, :], h0, c0, params["wih0"], params["whh0"], b0)
        h1, c1 = cell(h0, h1, c1, params["wih1"], params["whh1"], b1)
        outs.append(h1 @ params["wout"].T + params["bout"])
    logits = jnp.stack(outs, axis=1)
    return logits, jnp.stack([h0, h1]), jnp.stack([c0, c1])


if __name__ == "__main__":
    B, T, I, H, O = 2, 8, 8, 32, 16

    key = jax.random.PRNGKey(0)
    kx, kp, kh, kc = jax.random.split(key, 4)
    x = jax.random.normal(kx, (B, T, I), jnp.float32)
    params = init_params(kp, input_size=I, output_size=O, hidden_size=H)

    ref_logits, ref_h, ref_c = reference_forward(x, params)

    # --- f32 matmuls, default chunking; h/c defaulted ---
    fwd = jax.jit(functools.partial(char_lstm_loop_forward, time_chunk=32))
    logits, h_new, c_new = fwd(x, params)
    jax.block_until_ready((logits, h_new, c_new))
    assert logits.shape == (B, T, O)
    assert h_new.shape == (2, B, H) and c_new.shape == (2, B, H)
    np.testing.assert_allclose(np.asarray(logits), np.asarray(ref_logits),
                               rtol=1e-3, atol=1e-3)
    np.testing.assert_allclose(np.asarray(h_new), np.asarray(ref_h),
                               rtol=1e-3, atol=1e-3)
    np.testing.assert_allclose(np.asarray(c_new), np.asarray(ref_c),
                               rtol=1e-3, atol=1e-3)

    # --- explicit (h, c) initial state ---
    h_in = 0.1 * jax.random.normal(kh, (2, B, H), jnp.float32)
    c_in = 0.1 * jax.random.normal(kc, (2, B, H), jnp.float32)
    logits2, h2, c2 = fwd(x, params, h_in, c_in)
    jax.block_until_ready((logits2, h2, c2))
    ref2 = reference_forward(x, params, h_in, c_in)
    for got, want in zip((logits2, h2, c2), ref2):
        np.testing.assert_allclose(np.asarray(got), np.asarray(want),
                                   rtol=1e-3, atol=1e-3)

    # --- ragged time path: Tc=5 over T=8 -> 2 chunks, 2 masked steps ---
    fwd_ragged = jax.jit(functools.partial(char_lstm_loop_forward, time_chunk=5))
    logits3, h3, c3 = fwd_ragged(x, params)
    jax.block_until_ready((logits3, h3, c3))
    np.testing.assert_allclose(np.asarray(logits3), np.asarray(ref_logits),
                               rtol=1e-3, atol=1e-3)
    np.testing.assert_allclose(np.asarray(h3), np.asarray(ref_h),
                               rtol=1e-3, atol=1e-3)
    np.testing.assert_allclose(np.asarray(c3), np.asarray(ref_c),
                               rtol=1e-3, atol=1e-3)

    # --- bf16 MXU-operand path (recommended on v6e/v7x), looser tolerance ---
    fwd_bf16 = jax.jit(functools.partial(char_lstm_loop_forward,
                                         time_chunk=32,
                                         matmul_dtype=jnp.bfloat16))
    logits4, h4, c4 = fwd_bf16(x, params)
    jax.block_until_ready((logits4, h4, c4))
    np.testing.assert_allclose(np.asarray(logits4), np.asarray(ref_logits),
                               rtol=3e-2, atol=3e-2)
    np.testing.assert_allclose(np.asarray(h4), np.asarray(ref_h),
                               rtol=3e-2, atol=3e-2)
    np.testing.assert_allclose(np.asarray(c4), np.asarray(ref_c),
                               rtol=3e-2, atol=3e-2)

    print("KERNEL_OK")
</pallas_src>

<mosaic_0001>
module attributes {stable_mosaic.version = 11 : i64} {
  func.func @_lstm_chunk_kernel(%arg0: i32, %arg1: memref<1xi32, #tpu.memory_space<smem>>, %arg2: memref<8x8x8xf32, #tpu.memory_space<vmem>>, %arg3: memref<8x512xf32, #tpu.memory_space<vmem>>, %arg4: memref<128x512xf32, #tpu.memory_space<vmem>>, %arg5: memref<1x512xf32, #tpu.memory_space<vmem>>, %arg6: memref<128x512xf32, #tpu.memory_space<vmem>>, %arg7: memref<128x512xf32, #tpu.memory_space<vmem>>, %arg8: memref<1x512xf32, #tpu.memory_space<vmem>>, %arg9: memref<128x16xf32, #tpu.memory_space<vmem>>, %arg10: memref<1x16xf32, #tpu.memory_space<vmem>>, %arg11: memref<2x8x128xf32, #tpu.memory_space<vmem>>, %arg12: memref<2x8x128xf32, #tpu.memory_space<vmem>>, %arg13: memref<8x8x16xf32, #tpu.memory_space<vmem>>, %arg14: memref<2x8x128xf32, #tpu.memory_space<vmem>>, %arg15: memref<2x8x128xf32, #tpu.memory_space<vmem>>, %arg16: memref<64x512xf32, #tpu.memory_space<vmem>>, %arg17: memref<64x128xf32, #tpu.memory_space<vmem>>) attributes {dimension_semantics = [#tpu.dimension_semantics<arbitrary>], iteration_bounds = array<i64: 1>, scalar_prefetch = 1 : i64, scratch_operands = 2 : i64, tpu.core_type = #tpu.core_type<tc>, window_params = [{transform_indices = @transform_0, window_bounds = array<i64: 8, 8, 8>}, {pipeline_mode = #tpu.pipeline_mode<synchronous>, transform_indices = @transform_1, window_bounds = array<i64: 8, 512>}, {pipeline_mode = #tpu.pipeline_mode<synchronous>, transform_indices = @transform_2, window_bounds = array<i64: 128, 512>}, {pipeline_mode = #tpu.pipeline_mode<synchronous>, transform_indices = @transform_3, window_bounds = array<i64: 1, 512>}, {pipeline_mode = #tpu.pipeline_mode<synchronous>, transform_indices = @transform_4, window_bounds = array<i64: 128, 512>}, {pipeline_mode = #tpu.pipeline_mode<synchronous>, transform_indices = @transform_5, window_bounds = array<i64: 128, 512>}, {pipeline_mode = #tpu.pipeline_mode<synchronous>, transform_indices = @transform_6, window_bounds = array<i64: 1, 512>}, {pipeline_mode = #tpu.pipeline_mode<synchronous>, transform_indices = @transform_7, window_bounds = array<i64: 128, 16>}, {pipeline_mode = #tpu.pipeline_mode<synchronous>, transform_indices = @transform_8, window_bounds = array<i64: 1, 16>}, {pipeline_mode = #tpu.pipeline_mode<synchronous>, transform_indices = @transform_9, window_bounds = array<i64: 2, 8, 128>}, {pipeline_mode = #tpu.pipeline_mode<synchronous>, transform_indices = @transform_10, window_bounds = array<i64: 2, 8, 128>}, {transform_indices = @transform_11, window_bounds = array<i64: 8, 8, 16>}, {pipeline_mode = #tpu.pipeline_mode<synchronous>, transform_indices = @transform_12, window_bounds = array<i64: 2, 8, 128>}, {pipeline_mode = #tpu.pipeline_mode<synchronous>, transform_indices = @transform_13, window_bounds = array<i64: 2, 8, 128>}]} {
    %c0_i32 = arith.constant 0 : i32
    %0 = arith.cmpi eq, %arg0, %c0_i32 : i32
    %1 = arith.extui %0 : i1 to i32
    %c0_i32_0 = arith.constant 0 : i32
    %2 = arith.cmpi ne, %1, %c0_i32_0 : i32
    scf.if %2 {
      %c0_207 = arith.constant 0 : index
      %c0_208 = arith.constant 0 : index
      %c0_209 = arith.constant 0 : index
      %544 = vector.load %arg11[%c0_207, %c0_208, %c0_209] : memref<2x8x128xf32, #tpu.memory_space<vmem>>, vector<2x8x128xf32>
      %c0_210 = arith.constant 0 : index
      %c0_211 = arith.constant 0 : index
      %c0_212 = arith.constant 0 : index
      %545 = vector.load %arg14[%c0_210, %c0_211, %c0_212] : memref<2x8x128xf32, #tpu.memory_space<vmem>>, vector<2x8x128xf32>
      tpu.vector_store %arg14[%c0_210, %c0_211, %c0_212], %544 {strides = array<i32>} : memref<2x8x128xf32, #tpu.memory_space<vmem>>, vector<2x8x128xf32>,
      %c0_213 = arith.constant 0 : index
      %c0_214 = arith.constant 0 : index
      %c0_215 = arith.constant 0 : index
      %546 = vector.load %arg12[%c0_213, %c0_214, %c0_215] : memref<2x8x128xf32, #tpu.memory_space<vmem>>, vector<2x8x128xf32>
      %c0_216 = arith.constant 0 : index
      %c0_217 = arith.constant 0 : index
      %c0_218 = arith.constant 0 : index
      %547 = vector.load %arg15[%c0_216, %c0_217, %c0_218] : memref<2x8x128xf32, #tpu.memory_space<vmem>>, vector<2x8x128xf32>
      tpu.vector_store %arg15[%c0_216, %c0_217, %c0_218], %546 {strides = array<i32>} : memref<2x8x128xf32, #tpu.memory_space<vmem>>, vector<2x8x128xf32>,
    } else {
    }
    %c0 = arith.constant 0 : index
    %3 = memref.load %arg1[%c0] : memref<1xi32, #tpu.memory_space<smem>>
    %c8_i32 = arith.constant 8 : i32
    %4 = arith.muli %arg0, %c8_i32 : i32
    %c0_1 = arith.constant 0 : index
    %c0_2 = arith.constant 0 : index
    %c0_3 = arith.constant 0 : index
    %5 = vector.load %arg2[%c0_1, %c0_2, %c0_3] : memref<8x8x8xf32, #tpu.memory_space<vmem>>, vector<8x8x8xf32>
    %6 = vector.shape_cast %5 : vector<8x8x8xf32> to vector<64x8xf32>
    %c0_4 = arith.constant 0 : index
    %c0_5 = arith.constant 0 : index
    %7 = vector.load %arg3[%c0_4, %c0_5] : memref<8x512xf32, #tpu.memory_space<vmem>>, vector<8x512xf32>
    %cst = arith.constant dense<0.000000e+00> : vector<64x512xf32>
    %8 = tpu.matmul %6, %7, %cst {dimension_numbers = #tpu.dot_dimension_numbers<[1], [0], [0], [1], [0, 0, 1, 1], [], []>} : vector<64x8xf32>, vector<8x512xf32>, vector<64x512xf32> -> vector<64x512xf32>
    %c0_6 = arith.constant 0 : index
    %c0_7 = arith.constant 0 : index
    %9 = vector.load %arg5[%c0_6, %c0_7] : memref<1x512xf32, #tpu.memory_space<vmem>>, vector<1x512xf32>
    %10 = vector.broadcast %9 : vector<1x512xf32> to vector<64x512xf32>
    %11 = arith.addf %8, %10 : vector<64x512xf32>
    %c0_8 = arith.constant 0 : index
    %c0_9 = arith.constant 0 : index
    %12 = vector.load %arg16[%c0_8, %c0_9] : memref<64x512xf32, #tpu.memory_space<vmem>>, vector<64x512xf32>
    tpu.vector_store %arg16[%c0_8, %c0_9], %11 {strides = array<i32>} : memref<64x512xf32, #tpu.memory_space<vmem>>, vector<64x512xf32>,
    %c0_10 = arith.constant 0 : index
    %c0_11 = arith.constant 0 : index
    %c0_12 = arith.constant 0 : index
    %13 = vector.load %arg14[%c0_10, %c0_11, %c0_12] : memref<2x8x128xf32, #tpu.memory_space<vmem>>, vector<1x8x128xf32>
    %14 = vector.shape_cast %13 : vector<1x8x128xf32> to vector<8x128xf32>
    %c0_13 = arith.constant 0 : index
    %c0_14 = arith.constant 0 : index
    %c0_15 = arith.constant 0 : index
    %15 = vector.load %arg15[%c0_13, %c0_14, %c0_15] : memref<2x8x128xf32, #tpu.memory_space<vmem>>, vector<1x8x128xf32>
    %16 = vector.shape_cast %15 : vector<1x8x128xf32> to vector<8x128xf32>
    %c0_i32_16 = arith.constant 0 : i32
    %c8_i32_17 = arith.constant 8 : i32
    %17 = arith.muli %c0_i32_16, %c8_i32_17 : i32
    %18 = tpu.assume_multiple %17, 8 : i32
    %19 = arith.index_cast %18 : i32 to index
    %c0_18 = arith.constant 0 : index
    %20 = vector.load %arg16[%19, %c0_18] : memref<64x512xf32, #tpu.memory_space<vmem>>, vector<8x512xf32>
    %c0_19 = arith.constant 0 : index
    %c0_20 = arith.constant 0 : index
    %21 = vector.load %arg4[%c0_19, %c0_20] : memref<128x512xf32, #tpu.memory_space<vmem>>, vector<128x512xf32>
    %cst_21 = arith.constant dense<0.000000e+00> : vector<8x512xf32>
    %22 = tpu.matmul %14, %21, %cst_21 {dimension_numbers = #tpu.dot_dimension_numbers<[1], [0], [0], [1], [0, 0, 1, 1], [], []>} : vector<8x128xf32>, vector<128x512xf32>, vector<8x512xf32> -> vector<8x512xf32>
    %23 = arith.addf %20, %22 : vector<8x512xf32>
    %24 = vector.extract_strided_slice %23 {offsets = [0, 0], sizes = [8, 384], strides = [1, 1]} : vector<8x512xf32> to vector<8x384xf32>
    %cst_22 = arith.constant 5.000000e-01 : f32
    %25 = vector.broadcast %cst_22 : f32 to vector<8x384xf32>
    %26 = arith.mulf %25, %24 : vector<8x384xf32>
    %27 = math.tanh %26 : vector<8x384xf32>
    %cst_23 = arith.constant 1.000000e+00 : f32
    %28 = vector.broadcast %cst_23 : f32 to vector<8x384xf32>
    %29 = arith.addf %28, %27 : vector<8x384xf32>
    %cst_24 = arith.constant 5.000000e-01 : f32
    %30 = vector.broadcast %cst_24 : f32 to vector<8x384xf32>
    %31 = arith.mulf %30, %29 : vector<8x384xf32>
    %32 = vector.extract_strided_slice %31 {offsets = [0, 0], sizes = [8, 128], strides = [1, 1]} : vector<8x384xf32> to vector<8x128xf32>
    %33 = vector.extract_strided_slice %31 {offsets = [0, 128], sizes = [8, 128], strides = [1, 1]} : vector<8x384xf32> to vector<8x128xf32>
    %34 = vector.extract_strided_slice %31 {offsets = [0, 256], sizes = [8, 128], strides = [1, 1]} : vector<8x384xf32> to vector<8x128xf32>
    %35 = vector.extract_strided_slice %23 {offsets = [0, 384], sizes = [8, 128], strides = [1, 1]} : vector<8x512xf32> to vector<8x128xf32>
    %36 = math.tanh %35 : vector<8x128xf32>
    %37 = arith.mulf %33, %16 : vector<8x128xf32>
    %38 = arith.mulf %32, %36 : vector<8x128xf32>
    %39 = arith.addf %37, %38 : vector<8x128xf32>
    %40 = math.tanh %39 : vector<8x128xf32>
    %41 = arith.mulf %34, %40 : vector<8x128xf32>
    %42 = arith.addi %4, %c0_i32_16 : i32
    %43 = arith.cmpi slt, %42, %3 : i32
    %44 = arith.select %43, %41, %14 : vector<8x128xf32>
    %45 = arith.select %43, %39, %16 : vector<8x128xf32>
    %46 = arith.index_cast %18 : i32 to index
    %c0_25 = arith.constant 0 : index
    %47 = vector.load %arg17[%46, %c0_25] : memref<64x128xf32, #tpu.memory_space<vmem>>, vector<8x128xf32>
    tpu.vector_store %arg17[%46, %c0_25], %44 {strides = array<i32>} : memref<64x128xf32, #tpu.memory_space<vmem>>, vector<8x128xf32>,
    %c1_i32 = arith.constant 1 : i32
    %c8_i32_26 = arith.constant 8 : i32
    %48 = arith.muli %c1_i32, %c8_i32_26 : i32
    %49 = tpu.assume_multiple %48, 8 : i32
    %50 = arith.index_cast %49 : i32 to index
    %c0_27 = arith.constant 0 : index
    %51 = vector.load %arg16[%50, %c0_27] : memref<64x512xf32, #tpu.memory_space<vmem>>, vector<8x512xf32>
    %c0_28 = arith.constant 0 : index
    %c0_29 = arith.constant 0 : index
    %52 = vector.load %arg4[%c0_28, %c0_29] : memref<128x512xf32, #tpu.memory_space<vmem>>, vector<128x512xf32>
    %cst_30 = arith.constant dense<0.000000e+00> : vector<8x512xf32>
    %53 = tpu.matmul %44, %52, %cst_30 {dimension_numbers = #tpu.dot_dimension_numbers<[1], [0], [0], [1], [0, 0, 1, 1], [], []>} : vector<8x128xf32>, vector<128x512xf32>, vector<8x512xf32> -> vector<8x512xf32>
    %54 = arith.addf %51, %53 : vector<8x512xf32>
    %55 = vector.extract_strided_slice %54 {offsets = [0, 0], sizes = [8, 384], strides = [1, 1]} : vector<8x512xf32> to vector<8x384xf32>
    %cst_31 = arith.constant 5.000000e-01 : f32
    %56 = vector.broadcast %cst_31 : f32 to vector<8x384xf32>
    %57 = arith.mulf %56, %55 : vector<8x384xf32>
    %58 = math.tanh %57 : vector<8x384xf32>
    %cst_32 = arith.constant 1.000000e+00 : f32
    %59 = vector.broadcast %cst_32 : f32 to vector<8x384xf32>
    %60 = arith.addf %59, %58 : vector<8x384xf32>
    %cst_33 = arith.constant 5.000000e-01 : f32
    %61 = vector.broadcast %cst_33 : f32 to vector<8x384xf32>
    %62 = arith.mulf %61, %60 : vector<8x384xf32>
    %63 = vector.extract_strided_slice %62 {offsets = [0, 0], sizes = [8, 128], strides = [1, 1]} : vector<8x384xf32> to vector<8x128xf32>
    %64 = vector.extract_strided_slice %62 {offsets = [0, 128], sizes = [8, 128], strides = [1, 1]} : vector<8x384xf32> to vector<8x128xf32>
    %65 = vector.extract_strided_slice %62 {offsets = [0, 256], sizes = [8, 128], strides = [1, 1]} : vector<8x384xf32> to vector<8x128xf32>
    %66 = vector.extract_strided_slice %54 {offsets = [0, 384], sizes = [8, 128], strides = [1, 1]} : vector<8x512xf32> to vector<8x128xf32>
    %67 = math.tanh %66 : vector<8x128xf32>
    %68 = arith.mulf %64, %45 : vector<8x128xf32>
    %69 = arith.mulf %63, %67 : vector<8x128xf32>
    %70 = arith.addf %68, %69 : vector<8x128xf32>
    %71 = math.tanh %70 : vector<8x128xf32>
    %72 = arith.mulf %65, %71 : vector<8x128xf32>
    %73 = arith.addi %4, %c1_i32 : i32
    %74 = arith.cmpi slt, %73, %3 : i32
    %75 = arith.select %74, %72, %44 : vector<8x128xf32>
    %76 = arith.select %74, %70, %45 : vector<8x128xf32>
    %77 = arith.index_cast %49 : i32 to index
    %c0_34 = arith.constant 0 : index
    %78 = vector.load %arg17[%77, %c0_34] : memref<64x128xf32, #tpu.memory_space<vmem>>, vector<8x128xf32>
    tpu.vector_store %arg17[%77, %c0_34], %75 {strides = array<i32>} : memref<64x128xf32, #tpu.memory_space<vmem>>, vector<8x128xf32>,
    %c2_i32 = arith.constant 2 : i32
    %c8_i32_35 = arith.constant 8 : i32
    %79 = arith.muli %c2_i32, %c8_i32_35 : i32
    %80 = tpu.assume_multiple %79, 8 : i32
    %81 = arith.index_cast %80 : i32 to index
    %c0_36 = arith.constant 0 : index
    %82 = vector.load %arg16[%81, %c0_36] : memref<64x512xf32, #tpu.memory_space<vmem>>, vector<8x512xf32>
    %c0_37 = arith.constant 0 : index
    %c0_38 = arith.constant 0 : index
    %83 = vector.load %arg4[%c0_37, %c0_38] : memref<128x512xf32, #tpu.memory_space<vmem>>, vector<128x512xf32>
    %cst_39 = arith.constant dense<0.000000e+00> : vector<8x512xf32>
    %84 = tpu.matmul %75, %83, %cst_39 {dimension_numbers = #tpu.dot_dimension_numbers<[1], [0], [0], [1], [0, 0, 1, 1], [], []>} : vector<8x128xf32>, vector<128x512xf32>, vector<8x512xf32> -> vector<8x512xf32>
    %85 = arith.addf %82, %84 : vector<8x512xf32>
    %86 = vector.extract_strided_slice %85 {offsets = [0, 0], sizes = [8, 384], strides = [1, 1]} : vector<8x512xf32> to vector<8x384xf32>
    %cst_40 = arith.constant 5.000000e-01 : f32
    %87 = vector.broadcast %cst_40 : f32 to vector<8x384xf32>
    %88 = arith.mulf %87, %86 : vector<8x384xf32>
    %89 = math.tanh %88 : vector<8x384xf32>
    %cst_41 = arith.constant 1.000000e+00 : f32
    %90 = vector.broadcast %cst_41 : f32 to vector<8x384xf32>
    %91 = arith.addf %90, %89 : vector<8x384xf32>
    %cst_42 = arith.constant 5.000000e-01 : f32
    %92 = vector.broadcast %cst_42 : f32 to vector<8x384xf32>
    %93 = arith.mulf %92, %91 : vector<8x384xf32>
    %94 = vector.extract_strided_slice %93 {offsets = [0, 0], sizes = [8, 128], strides = [1, 1]} : vector<8x384xf32> to vector<8x128xf32>
    %95 = vector.extract_strided_slice %93 {offsets = [0, 128], sizes = [8, 128], strides = [1, 1]} : vector<8x384xf32> to vector<8x128xf32>
    %96 = vector.extract_strided_slice %93 {offsets = [0, 256], sizes = [8, 128], strides = [1, 1]} : vector<8x384xf32> to vector<8x128xf32>
    %97 = vector.extract_strided_slice %85 {offsets = [0, 384], sizes = [8, 128], strides = [1, 1]} : vector<8x512xf32> to vector<8x128xf32>
    %98 = math.tanh %97 : vector<8x128xf32>
    %99 = arith.mulf %95, %76 : vector<8x128xf32>
    %100 = arith.mulf %94, %98 : vector<8x128xf32>
    %101 = arith.addf %99, %100 : vector<8x128xf32>
    %102 = math.tanh %101 : vector<8x128xf32>
    %103 = arith.mulf %96, %102 : vector<8x128xf32>
    %104 = arith.addi %4, %c2_i32 : i32
    %105 = arith.cmpi slt, %104, %3 : i32
    %106 = arith.select %105, %103, %75 : vector<8x128xf32>
    %107 = arith.select %105, %101, %76 : vector<8x128xf32>
    %108 = arith.index_cast %80 : i32 to index
    %c0_43 = arith.constant 0 : index
    %109 = vector.load %arg17[%108, %c0_43] : memref<64x128xf32, #tpu.memory_space<vmem>>, vector<8x128xf32>
    tpu.vector_store %arg17[%108, %c0_43], %106 {strides = array<i32>} : memref<64x128xf32, #tpu.memory_space<vmem>>, vector<8x128xf32>,
    %c3_i32 = arith.constant 3 : i32
    %c8_i32_44 = arith.constant 8 : i32
    %110 = arith.muli %c3_i32, %c8_i32_44 : i32
    %111 = tpu.assume_multiple %110, 8 : i32
    %112 = arith.index_cast %111 : i32 to index
    %c0_45 = arith.constant 0 : index
    %113 = vector.load %arg16[%112, %c0_45] : memref<64x512xf32, #tpu.memory_space<vmem>>, vector<8x512xf32>
    %c0_46 = arith.constant 0 : index
    %c0_47 = arith.constant 0 : index
    %114 = vector.load %arg4[%c0_46, %c0_47] : memref<128x512xf32, #tpu.memory_space<vmem>>, vector<128x512xf32>
    %cst_48 = arith.constant dense<0.000000e+00> : vector<8x512xf32>
    %115 = tpu.matmul %106, %114, %cst_48 {dimension_numbers = #tpu.dot_dimension_numbers<[1], [0], [0], [1], [0, 0, 1, 1], [], []>} : vector<8x128xf32>, vector<128x512xf32>, vector<8x512xf32> -> vector<8x512xf32>
    %116 = arith.addf %113, %115 : vector<8x512xf32>
    %117 = vector.extract_strided_slice %116 {offsets = [0, 0], sizes = [8, 384], strides = [1, 1]} : vector<8x512xf32> to vector<8x384xf32>
    %cst_49 = arith.constant 5.000000e-01 : f32
    %118 = vector.broadcast %cst_49 : f32 to vector<8x384xf32>
    %119 = arith.mulf %118, %117 : vector<8x384xf32>
    %120 = math.tanh %119 : vector<8x384xf32>
    %cst_50 = arith.constant 1.000000e+00 : f32
    %121 = vector.broadcast %cst_50 : f32 to vector<8x384xf32>
    %122 = arith.addf %121, %120 : vector<8x384xf32>
    %cst_51 = arith.constant 5.000000e-01 : f32
    %123 = vector.broadcast %cst_51 : f32 to vector<8x384xf32>
    %124 = arith.mulf %123, %122 : vector<8x384xf32>
    %125 = vector.extract_strided_slice %124 {offsets = [0, 0], sizes = [8, 128], strides = [1, 1]} : vector<8x384xf32> to vector<8x128xf32>
    %126 = vector.extract_strided_slice %124 {offsets = [0, 128], sizes = [8, 128], strides = [1, 1]} : vector<8x384xf32> to vector<8x128xf32>
    %127 = vector.extract_strided_slice %124 {offsets = [0, 256], sizes = [8, 128], strides = [1, 1]} : vector<8x384xf32> to vector<8x128xf32>
    %128 = vector.extract_strided_slice %116 {offsets = [0, 384], sizes = [8, 128], strides = [1, 1]} : vector<8x512xf32> to vector<8x128xf32>
    %129 = math.tanh %128 : vector<8x128xf32>
    %130 = arith.mulf %126, %107 : vector<8x128xf32>
    %131 = arith.mulf %125, %129 : vector<8x128xf32>
    %132 = arith.addf %130, %131 : vector<8x128xf32>
    %133 = math.tanh %132 : vector<8x128xf32>
    %134 = arith.mulf %127, %133 : vector<8x128xf32>
    %135 = arith.addi %4, %c3_i32 : i32
    %136 = arith.cmpi slt, %135, %3 : i32
    %137 = arith.select %136, %134, %106 : vector<8x128xf32>
    %138 = arith.select %136, %132, %107 : vector<8x128xf32>
    %139 = arith.index_cast %111 : i32 to index
    %c0_52 = arith.constant 0 : index
    %140 = vector.load %arg17[%139, %c0_52] : memref<64x128xf32, #tpu.memory_space<vmem>>, vector<8x128xf32>
    tpu.vector_store %arg17[%139, %c0_52], %137 {strides = array<i32>} : memref<64x128xf32, #tpu.memory_space<vmem>>, vector<8x128xf32>,
    %c4_i32 = arith.constant 4 : i32
    %c8_i32_53 = arith.constant 8 : i32
    %141 = arith.muli %c4_i32, %c8_i32_53 : i32
    %142 = tpu.assume_multiple %141, 8 : i32
    %143 = arith.index_cast %142 : i32 to index
    %c0_54 = arith.constant 0 : index
    %144 = vector.load %arg16[%143, %c0_54] : memref<64x512xf32, #tpu.memory_space<vmem>>, vector<8x512xf32>
    %c0_55 = arith.constant 0 : index
    %c0_56 = arith.constant 0 : index
    %145 = vector.load %arg4[%c0_55, %c0_56] : memref<128x512xf32, #tpu.memory_space<vmem>>, vector<128x512xf32>
    %cst_57 = arith.constant dense<0.000000e+00> : vector<8x512xf32>
    %146 = tpu.matmul %137, %145, %cst_57 {dimension_numbers = #tpu.dot_dimension_numbers<[1], [0], [0], [1], [0, 0, 1, 1], [], []>} : vector<8x128xf32>, vector<128x512xf32>, vector<8x512xf32> -> vector<8x512xf32>
    %147 = arith.addf %144, %146 : vector<8x512xf32>
    %148 = vector.extract_strided_slice %147 {offsets = [0, 0], sizes = [8, 384], strides = [1, 1]} : vector<8x512xf32> to vector<8x384xf32>
    %cst_58 = arith.constant 5.000000e-01 : f32
    %149 = vector.broadcast %cst_58 : f32 to vector<8x384xf32>
    %150 = arith.mulf %149, %148 : vector<8x384xf32>
    %151 = math.tanh %150 : vector<8x384xf32>
    %cst_59 = arith.constant 1.000000e+00 : f32
    %152 = vector.broadcast %cst_59 : f32 to vector<8x384xf32>
    %153 = arith.addf %152, %151 : vector<8x384xf32>
    %cst_60 = arith.constant 5.000000e-01 : f32
    %154 = vector.broadcast %cst_60 : f32 to vector<8x384xf32>
    %155 = arith.mulf %154, %153 : vector<8x384xf32>
    %156 = vector.extract_strided_slice %155 {offsets = [0, 0], sizes = [8, 128], strides = [1, 1]} : vector<8x384xf32> to vector<8x128xf32>
    %157 = vector.extract_strided_slice %155 {offsets = [0, 128], sizes = [8, 128], strides = [1, 1]} : vector<8x384xf32> to vector<8x128xf32>
    %158 = vector.extract_strided_slice %155 {offsets = [0, 256], sizes = [8, 128], strides = [1, 1]} : vector<8x384xf32> to vector<8x128xf32>
    %159 = vector.extract_strided_slice %147 {offsets = [0, 384], sizes = [8, 128], strides = [1, 1]} : vector<8x512xf32> to vector<8x128xf32>
    %160 = math.tanh %159 : vector<8x128xf32>
    %161 = arith.mulf %157, %138 : vector<8x128xf32>
    %162 = arith.mulf %156, %160 : vector<8x128xf32>
    %163 = arith.addf %161, %162 : vector<8x128xf32>
    %164 = math.tanh %163 : vector<8x128xf32>
    %165 = arith.mulf %158, %164 : vector<8x128xf32>
    %166 = arith.addi %4, %c4_i32 : i32
    %167 = arith.cmpi slt, %166, %3 : i32
    %168 = arith.select %167, %165, %137 : vector<8x128xf32>
    %169 = arith.select %167, %163, %138 : vector<8x128xf32>
    %170 = arith.index_cast %142 : i32 to index
    %c0_61 = arith.constant 0 : index
    %171 = vector.load %arg17[%170, %c0_61] : memref<64x128xf32, #tpu.memory_space<vmem>>, vector<8x128xf32>
    tpu.vector_store %arg17[%170, %c0_61], %168 {strides = array<i32>} : memref<64x128xf32, #tpu.memory_space<vmem>>, vector<8x128xf32>,
    %c5_i32 = arith.constant 5 : i32
    %c8_i32_62 = arith.constant 8 : i32
    %172 = arith.muli %c5_i32, %c8_i32_62 : i32
    %173 = tpu.assume_multiple %172, 8 : i32
    %174 = arith.index_cast %173 : i32 to index
    %c0_63 = arith.constant 0 : index
    %175 = vector.load %arg16[%174, %c0_63] : memref<64x512xf32, #tpu.memory_space<vmem>>, vector<8x512xf32>
    %c0_64 = arith.constant 0 : index
    %c0_65 = arith.constant 0 : index
    %176 = vector.load %arg4[%c0_64, %c0_65] : memref<128x512xf32, #tpu.memory_space<vmem>>, vector<128x512xf32>
    %cst_66 = arith.constant dense<0.000000e+00> : vector<8x512xf32>
    %177 = tpu.matmul %168, %176, %cst_66 {dimension_numbers = #tpu.dot_dimension_numbers<[1], [0], [0], [1], [0, 0, 1, 1], [], []>} : vector<8x128xf32>, vector<128x512xf32>, vector<8x512xf32> -> vector<8x512xf32>
    %178 = arith.addf %175, %177 : vector<8x512xf32>
    %179 = vector.extract_strided_slice %178 {offsets = [0, 0], sizes = [8, 384], strides = [1, 1]} : vector<8x512xf32> to vector<8x384xf32>
    %cst_67 = arith.constant 5.000000e-01 : f32
    %180 = vector.broadcast %cst_67 : f32 to vector<8x384xf32>
    %181 = arith.mulf %180, %179 : vector<8x384xf32>
    %182 = math.tanh %181 : vector<8x384xf32>
    %cst_68 = arith.constant 1.000000e+00 : f32
    %183 = vector.broadcast %cst_68 : f32 to vector<8x384xf32>
    %184 = arith.addf %183, %182 : vector<8x384xf32>
    %cst_69 = arith.constant 5.000000e-01 : f32
    %185 = vector.broadcast %cst_69 : f32 to vector<8x384xf32>
    %186 = arith.mulf %185, %184 : vector<8x384xf32>
    %187 = vector.extract_strided_slice %186 {offsets = [0, 0], sizes = [8, 128], strides = [1, 1]} : vector<8x384xf32> to vector<8x128xf32>
    %188 = vector.extract_strided_slice %186 {offsets = [0, 128], sizes = [8, 128], strides = [1, 1]} : vector<8x384xf32> to vector<8x128xf32>
    %189 = vector.extract_strided_slice %186 {offsets = [0, 256], sizes = [8, 128], strides = [1, 1]} : vector<8x384xf32> to vector<8x128xf32>
    %190 = vector.extract_strided_slice %178 {offsets = [0, 384], sizes = [8, 128], strides = [1, 1]} : vector<8x512xf32> to vector<8x128xf32>
    %191 = math.tanh %190 : vector<8x128xf32>
    %192 = arith.mulf %188, %169 : vector<8x128xf32>
    %193 = arith.mulf %187, %191 : vector<8x128xf32>
    %194 = arith.addf %192, %193 : vector<8x128xf32>
    %195 = math.tanh %194 : vector<8x128xf32>
    %196 = arith.mulf %189, %195 : vector<8x128xf32>
    %197 = arith.addi %4, %c5_i32 : i32
    %198 = arith.cmpi slt, %197, %3 : i32
    %199 = arith.select %198, %196, %168 : vector<8x128xf32>
    %200 = arith.select %198, %194, %169 : vector<8x128xf32>
    %201 = arith.index_cast %173 : i32 to index
    %c0_70 = arith.constant 0 : index
    %202 = vector.load %arg17[%201, %c0_70] : memref<64x128xf32, #tpu.memory_space<vmem>>, vector<8x128xf32>
    tpu.vector_store %arg17[%201, %c0_70], %199 {strides = array<i32>} : memref<64x128xf32, #tpu.memory_space<vmem>>, vector<8x128xf32>,
    %c6_i32 = arith.constant 6 : i32
    %c8_i32_71 = arith.constant 8 : i32
    %203 = arith.muli %c6_i32, %c8_i32_71 : i32
    %204 = tpu.assume_multiple %203, 8 : i32
    %205 = arith.index_cast %204 : i32 to index
    %c0_72 = arith.constant 0 : index
    %206 = vector.load %arg16[%205, %c0_72] : memref<64x512xf32, #tpu.memory_space<vmem>>, vector<8x512xf32>
    %c0_73 = arith.constant 0 : index
    %c0_74 = arith.constant 0 : index
    %207 = vector.load %arg4[%c0_73, %c0_74] : memref<128x512xf32, #tpu.memory_space<vmem>>, vector<128x512xf32>
    %cst_75 = arith.constant dense<0.000000e+00> : vector<8x512xf32>
    %208 = tpu.matmul %199, %207, %cst_75 {dimension_numbers = #tpu.dot_dimension_numbers<[1], [0], [0], [1], [0, 0, 1, 1], [], []>} : vector<8x128xf32>, vector<128x512xf32>, vector<8x512xf32> -> vector<8x512xf32>
    %209 = arith.addf %206, %208 : vector<8x512xf32>
    %210 = vector.extract_strided_slice %209 {offsets = [0, 0], sizes = [8, 384], strides = [1, 1]} : vector<8x512xf32> to vector<8x384xf32>
    %cst_76 = arith.constant 5.000000e-01 : f32
    %211 = vector.broadcast %cst_76 : f32 to vector<8x384xf32>
    %212 = arith.mulf %211, %210 : vector<8x384xf32>
    %213 = math.tanh %212 : vector<8x384xf32>
    %cst_77 = arith.constant 1.000000e+00 : f32
    %214 = vector.broadcast %cst_77 : f32 to vector<8x384xf32>
    %215 = arith.addf %214, %213 : vector<8x384xf32>
    %cst_78 = arith.constant 5.000000e-01 : f32
    %216 = vector.broadcast %cst_78 : f32 to vector<8x384xf32>
    %217 = arith.mulf %216, %215 : vector<8x384xf32>
    %218 = vector.extract_strided_slice %217 {offsets = [0, 0], sizes = [8, 128], strides = [1, 1]} : vector<8x384xf32> to vector<8x128xf32>
    %219 = vector.extract_strided_slice %217 {offsets = [0, 128], sizes = [8, 128], strides = [1, 1]} : vector<8x384xf32> to vector<8x128xf32>
    %220 = vector.extract_strided_slice %217 {offsets = [0, 256], sizes = [8, 128], strides = [1, 1]} : vector<8x384xf32> to vector<8x128xf32>
    %221 = vector.extract_strided_slice %209 {offsets = [0, 384], sizes = [8, 128], strides = [1, 1]} : vector<8x512xf32> to vector<8x128xf32>
    %222 = math.tanh %221 : vector<8x128xf32>
    %223 = arith.mulf %219, %200 : vector<8x128xf32>
    %224 = arith.mulf %218, %222 : vector<8x128xf32>
    %225 = arith.addf %223, %224 : vector<8x128xf32>
    %226 = math.tanh %225 : vector<8x128xf32>
    %227 = arith.mulf %220, %226 : vector<8x128xf32>
    %228 = arith.addi %4, %c6_i32 : i32
    %229 = arith.cmpi slt, %228, %3 : i32
    %230 = arith.select %229, %227, %199 : vector<8x128xf32>
    %231 = arith.select %229, %225, %200 : vector<8x128xf32>
    %232 = arith.index_cast %204 : i32 to index
    %c0_79 = arith.constant 0 : index
    %233 = vector.load %arg17[%232, %c0_79] : memref<64x128xf32, #tpu.memory_space<vmem>>, vector<8x128xf32>
    tpu.vector_store %arg17[%232, %c0_79], %230 {strides = array<i32>} : memref<64x128xf32, #tpu.memory_space<vmem>>, vector<8x128xf32>,
    %c7_i32 = arith.constant 7 : i32
    %c8_i32_80 = arith.constant 8 : i32
    %234 = arith.muli %c7_i32, %c8_i32_80 : i32
    %235 = tpu.assume_multiple %234, 8 : i32
    %236 = arith.index_cast %235 : i32 to index
    %c0_81 = arith.constant 0 : index
    %237 = vector.load %arg16[%236, %c0_81] : memref<64x512xf32, #tpu.memory_space<vmem>>, vector<8x512xf32>
    %c0_82 = arith.constant 0 : index
    %c0_83 = arith.constant 0 : index
    %238 = vector.load %arg4[%c0_82, %c0_83] : memref<128x512xf32, #tpu.memory_space<vmem>>, vector<128x512xf32>
    %cst_84 = arith.constant dense<0.000000e+00> : vector<8x512xf32>
    %239 = tpu.matmul %230, %238, %cst_84 {dimension_numbers = #tpu.dot_dimension_numbers<[1], [0], [0], [1], [0, 0, 1, 1], [], []>} : vector<8x128xf32>, vector<128x512xf32>, vector<8x512xf32> -> vector<8x512xf32>
    %240 = arith.addf %237, %239 : vector<8x512xf32>
    %241 = vector.extract_strided_slice %240 {offsets = [0, 0], sizes = [8, 384], strides = [1, 1]} : vector<8x512xf32> to vector<8x384xf32>
    %cst_85 = arith.constant 5.000000e-01 : f32
    %242 = vector.broadcast %cst_85 : f32 to vector<8x384xf32>
    %243 = arith.mulf %242, %241 : vector<8x384xf32>
    %244 = math.tanh %243 : vector<8x384xf32>
    %cst_86 = arith.constant 1.000000e+00 : f32
    %245 = vector.broadcast %cst_86 : f32 to vector<8x384xf32>
    %246 = arith.addf %245, %244 : vector<8x384xf32>
    %cst_87 = arith.constant 5.000000e-01 : f32
    %247 = vector.broadcast %cst_87 : f32 to vector<8x384xf32>
    %248 = arith.mulf %247, %246 : vector<8x384xf32>
    %249 = vector.extract_strided_slice %248 {offsets = [0, 0], sizes = [8, 128], strides = [1, 1]} : vector<8x384xf32> to vector<8x128xf32>
    %250 = vector.extract_strided_slice %248 {offsets = [0, 128], sizes = [8, 128], strides = [1, 1]} : vector<8x384xf32> to vector<8x128xf32>
    %251 = vector.extract_strided_slice %248 {offsets = [0, 256], sizes = [8, 128], strides = [1, 1]} : vector<8x384xf32> to vector<8x128xf32>
    %252 = vector.extract_strided_slice %240 {offsets = [0, 384], sizes = [8, 128], strides = [1, 1]} : vector<8x512xf32> to vector<8x128xf32>
    %253 = math.tanh %252 : vector<8x128xf32>
    %254 = arith.mulf %250, %231 : vector<8x128xf32>
    %255 = arith.mulf %249, %253 : vector<8x128xf32>
    %256 = arith.addf %254, %255 : vector<8x128xf32>
    %257 = math.tanh %256 : vector<8x128xf32>
    %258 = arith.mulf %251, %257 : vector<8x128xf32>
    %259 = arith.addi %4, %c7_i32 : i32
    %260 = arith.cmpi slt, %259, %3 : i32
    %261 = arith.select %260, %258, %230 : vector<8x128xf32>
    %262 = arith.select %260, %256, %231 : vector<8x128xf32>
    %263 = arith.index_cast %235 : i32 to index
    %c0_88 = arith.constant 0 : index
    %264 = vector.load %arg17[%263, %c0_88] : memref<64x128xf32, #tpu.memory_space<vmem>>, vector<8x128xf32>
    tpu.vector_store %arg17[%263, %c0_88], %261 {strides = array<i32>} : memref<64x128xf32, #tpu.memory_space<vmem>>, vector<8x128xf32>,
    %c8_i32_89 = arith.constant 8 : i32
    %c0_90 = arith.constant 0 : index
    %c0_91 = arith.constant 0 : index
    %265 = vector.load %arg17[%c0_90, %c0_91] : memref<64x128xf32, #tpu.memory_space<vmem>>, vector<64x128xf32>
    %c0_92 = arith.constant 0 : index
    %c0_93 = arith.constant 0 : index
    %266 = vector.load %arg6[%c0_92, %c0_93] : memref<128x512xf32, #tpu.memory_space<vmem>>, vector<128x512xf32>
    %cst_94 = arith.constant dense<0.000000e+00> : vector<64x512xf32>
    %267 = tpu.matmul %265, %266, %cst_94 {dimension_numbers = #tpu.dot_dimension_numbers<[1], [0], [0], [1], [0, 0, 1, 1], [], []>} : vector<64x128xf32>, vector<128x512xf32>, vector<64x512xf32> -> vector<64x512xf32>
    %c0_95 = arith.constant 0 : index
    %c0_96 = arith.constant 0 : index
    %268 = vector.load %arg8[%c0_95, %c0_96] : memref<1x512xf32, #tpu.memory_space<vmem>>, vector<1x512xf32>
    %269 = vector.broadcast %268 : vector<1x512xf32> to vector<64x512xf32>
    %270 = arith.addf %267, %269 : vector<64x512xf32>
    %c0_97 = arith.constant 0 : index
    %c0_98 = arith.constant 0 : index
    %271 = vector.load %arg16[%c0_97, %c0_98] : memref<64x512xf32, #tpu.memory_space<vmem>>, vector<64x512xf32>
    tpu.vector_store %arg16[%c0_97, %c0_98], %270 {strides = array<i32>} : memref<64x512xf32, #tpu.memory_space<vmem>>, vector<64x512xf32>,
    %c1 = arith.constant 1 : index
    %c0_99 = arith.constant 0 : index
    %c0_100 = arith.constant 0 : index
    %272 = vector.load %arg14[%c1, %c0_99, %c0_100] : memref<2x8x128xf32, #tpu.memory_space<vmem>>, vector<1x8x128xf32>
    %273 = vector.shape_cast %272 : vector<1x8x128xf32> to vector<8x128xf32>
    %c1_101 = arith.constant 1 : index
    %c0_102 = arith.constant 0 : index
    %c0_103 = arith.constant 0 : index
    %274 = vector.load %arg15[%c1_101, %c0_102, %c0_103] : memref<2x8x128xf32, #tpu.memory_space<vmem>>, vector<1x8x128xf32>
    %275 = vector.shape_cast %274 : vector<1x8x128xf32> to vector<8x128xf32>
    %c0_i32_104 = arith.constant 0 : i32
    %c8_i32_105 = arith.constant 8 : i32
    %276 = arith.muli %c0_i32_104, %c8_i32_105 : i32
    %277 = tpu.assume_multiple %276, 8 : i32
    %278 = arith.index_cast %277 : i32 to index
    %c0_106 = arith.constant 0 : index
    %279 = vector.load %arg16[%278, %c0_106] : memref<64x512xf32, #tpu.memory_space<vmem>>, vector<8x512xf32>
    %c0_107 = arith.constant 0 : index
    %c0_108 = arith.constant 0 : index
    %280 = vector.load %arg7[%c0_107, %c0_108] : memref<128x512xf32, #tpu.memory_space<vmem>>, vector<128x512xf32>
    %cst_109 = arith.constant dense<0.000000e+00> : vector<8x512xf32>
    %281 = tpu.matmul %273, %280, %cst_109 {dimension_numbers = #tpu.dot_dimension_numbers<[1], [0], [0], [1], [0, 0, 1, 1], [], []>} : vector<8x128xf32>, vector<128x512xf32>, vector<8x512xf32> -> vector<8x512xf32>
    %282 = arith.addf %279, %281 : vector<8x512xf32>
    %283 = vector.extract_strided_slice %282 {offsets = [0, 0], sizes = [8, 384], strides = [1, 1]} : vector<8x512xf32> to vector<8x384xf32>
    %cst_110 = arith.constant 5.000000e-01 : f32
    %284 = vector.broadcast %cst_110 : f32 to vector<8x384xf32>
    %285 = arith.mulf %284, %283 : vector<8x384xf32>
    %286 = math.tanh %285 : vector<8x384xf32>
    %cst_111 = arith.constant 1.000000e+00 : f32
    %287 = vector.broadcast %cst_111 : f32 to vector<8x384xf32>
    %288 = arith.addf %287, %286 : vector<8x384xf32>
    %cst_112 = arith.constant 5.000000e-01 : f32
    %289 = vector.broadcast %cst_112 : f32 to vector<8x384xf32>
    %290 = arith.mulf %289, %288 : vector<8x384xf32>
    %291 = vector.extract_strided_slice %290 {offsets = [0, 0], sizes = [8, 128], strides = [1, 1]} : vector<8x384xf32> to vector<8x128xf32>
    %292 = vector.extract_strided_slice %290 {offsets = [0, 128], sizes = [8, 128], strides = [1, 1]} : vector<8x384xf32> to vector<8x128xf32>
    %293 = vector.extract_strided_slice %290 {offsets = [0, 256], sizes = [8, 128], strides = [1, 1]} : vector<8x384xf32> to vector<8x128xf32>
    %294 = vector.extract_strided_slice %282 {offsets = [0, 384], sizes = [8, 128], strides = [1, 1]} : vector<8x512xf32> to vector<8x128xf32>
    %295 = math.tanh %294 : vector<8x128xf32>
    %296 = arith.mulf %292, %275 : vector<8x128xf32>
    %297 = arith.mulf %291, %295 : vector<8x128xf32>
    %298 = arith.addf %296, %297 : vector<8x128xf32>
    %299 = math.tanh %298 : vector<8x128xf32>
    %300 = arith.mulf %293, %299 : vector<8x128xf32>
    %301 = arith.addi %4, %c0_i32_104 : i32
    %302 = arith.cmpi slt, %301, %3 : i32
    %303 = arith.select %302, %300, %273 : vector<8x128xf32>
    %304 = arith.select %302, %298, %275 : vector<8x128xf32>
    %305 = arith.index_cast %277 : i32 to index
    %c0_113 = arith.constant 0 : index
    %306 = vector.load %arg17[%305, %c0_113] : memref<64x128xf32, #tpu.memory_space<vmem>>, vector<8x128xf32>
    tpu.vector_store %arg17[%305, %c0_113], %303 {strides = array<i32>} : memref<64x128xf32, #tpu.memory_space<vmem>>, vector<8x128xf32>,
    %c1_i32_114 = arith.constant 1 : i32
    %c8_i32_115 = arith.constant 8 : i32
    %307 = arith.muli %c1_i32_114, %c8_i32_115 : i32
    %308 = tpu.assume_multiple %307, 8 : i32
    %309 = arith.index_cast %308 : i32 to index
    %c0_116 = arith.constant 0 : index
    %310 = vector.load %arg16[%309, %c0_116] : memref<64x512xf32, #tpu.memory_space<vmem>>, vector<8x512xf32>
    %c0_117 = arith.constant 0 : index
    %c0_118 = arith.constant 0 : index
    %311 = vector.load %arg7[%c0_117, %c0_118] : memref<128x512xf32, #tpu.memory_space<vmem>>, vector<128x512xf32>
    %cst_119 = arith.constant dense<0.000000e+00> : vector<8x512xf32>
    %312 = tpu.matmul %303, %311, %cst_119 {dimension_numbers = #tpu.dot_dimension_numbers<[1], [0], [0], [1], [0, 0, 1, 1], [], []>} : vector<8x128xf32>, vector<128x512xf32>, vector<8x512xf32> -> vector<8x512xf32>
    %313 = arith.addf %310, %312 : vector<8x512xf32>
    %314 = vector.extract_strided_slice %313 {offsets = [0, 0], sizes = [8, 384], strides = [1, 1]} : vector<8x512xf32> to vector<8x384xf32>
    %cst_120 = arith.constant 5.000000e-01 : f32
    %315 = vector.broadcast %cst_120 : f32 to vector<8x384xf32>
    %316 = arith.mulf %315, %314 : vector<8x384xf32>
    %317 = math.tanh %316 : vector<8x384xf32>
    %cst_121 = arith.constant 1.000000e+00 : f32
    %318 = vector.broadcast %cst_121 : f32 to vector<8x384xf32>
    %319 = arith.addf %318, %317 : vector<8x384xf32>
    %cst_122 = arith.constant 5.000000e-01 : f32
    %320 = vector.broadcast %cst_122 : f32 to vector<8x384xf32>
    %321 = arith.mulf %320, %319 : vector<8x384xf32>
    %322 = vector.extract_strided_slice %321 {offsets = [0, 0], sizes = [8, 128], strides = [1, 1]} : vector<8x384xf32> to vector<8x128xf32>
    %323 = vector.extract_strided_slice %321 {offsets = [0, 128], sizes = [8, 128], strides = [1, 1]} : vector<8x384xf32> to vector<8x128xf32>
    %324 = vector.extract_strided_slice %321 {offsets = [0, 256], sizes = [8, 128], strides = [1, 1]} : vector<8x384xf32> to vector<8x128xf32>
    %325 = vector.extract_strided_slice %313 {offsets = [0, 384], sizes = [8, 128], strides = [1, 1]} : vector<8x512xf32> to vector<8x128xf32>
    %326 = math.tanh %325 : vector<8x128xf32>
    %327 = arith.mulf %323, %304 : vector<8x128xf32>
    %328 = arith.mulf %322, %326 : vector<8x128xf32>
    %329 = arith.addf %327, %328 : vector<8x128xf32>
    %330 = math.tanh %329 : vector<8x128xf32>
    %331 = arith.mulf %324, %330 : vector<8x128xf32>
    %332 = arith.addi %4, %c1_i32_114 : i32
    %333 = arith.cmpi slt, %332, %3 : i32
    %334 = arith.select %333, %331, %303 : vector<8x128xf32>
    %335 = arith.select %333, %329, %304 : vector<8x128xf32>
    %336 = arith.index_cast %308 : i32 to index
    %c0_123 = arith.constant 0 : index
    %337 = vector.load %arg17[%336, %c0_123] : memref<64x128xf32, #tpu.memory_space<vmem>>, vector<8x128xf32>
    tpu.vector_store %arg17[%336, %c0_123], %334 {strides = array<i32>} : memref<64x128xf32, #tpu.memory_space<vmem>>, vector<8x128xf32>,
    %c2_i32_124 = arith.constant 2 : i32
    %c8_i32_125 = arith.constant 8 : i32
    %338 = arith.muli %c2_i32_124, %c8_i32_125 : i32
    %339 = tpu.assume_multiple %338, 8 : i32
    %340 = arith.index_cast %339 : i32 to index
    %c0_126 = arith.constant 0 : index
    %341 = vector.load %arg16[%340, %c0_126] : memref<64x512xf32, #tpu.memory_space<vmem>>, vector<8x512xf32>
    %c0_127 = arith.constant 0 : index
    %c0_128 = arith.constant 0 : index
    %342 = vector.load %arg7[%c0_127, %c0_128] : memref<128x512xf32, #tpu.memory_space<vmem>>, vector<128x512xf32>
    %cst_129 = arith.constant dense<0.000000e+00> : vector<8x512xf32>
    %343 = tpu.matmul %334, %342, %cst_129 {dimension_numbers = #tpu.dot_dimension_numbers<[1], [0], [0], [1], [0, 0, 1, 1], [], []>} : vector<8x128xf32>, vector<128x512xf32>, vector<8x512xf32> -> vector<8x512xf32>
    %344 = arith.addf %341, %343 : vector<8x512xf32>
    %345 = vector.extract_strided_slice %344 {offsets = [0, 0], sizes = [8, 384], strides = [1, 1]} : vector<8x512xf32> to vector<8x384xf32>
    %cst_130 = arith.constant 5.000000e-01 : f32
    %346 = vector.broadcast %cst_130 : f32 to vector<8x384xf32>
    %347 = arith.mulf %346, %345 : vector<8x384xf32>
    %348 = math.tanh %347 : vector<8x384xf32>
    %cst_131 = arith.constant 1.000000e+00 : f32
    %349 = vector.broadcast %cst_131 : f32 to vector<8x384xf32>
    %350 = arith.addf %349, %348 : vector<8x384xf32>
    %cst_132 = arith.constant 5.000000e-01 : f32
    %351 = vector.broadcast %cst_132 : f32 to vector<8x384xf32>
    %352 = arith.mulf %351, %350 : vector<8x384xf32>
    %353 = vector.extract_strided_slice %352 {offsets = [0, 0], sizes = [8, 128], strides = [1, 1]} : vector<8x384xf32> to vector<8x128xf32>
    %354 = vector.extract_strided_slice %352 {offsets = [0, 128], sizes = [8, 128], strides = [1, 1]} : vector<8x384xf32> to vector<8x128xf32>
    %355 = vector.extract_strided_slice %352 {offsets = [0, 256], sizes = [8, 128], strides = [1, 1]} : vector<8x384xf32> to vector<8x128xf32>
    %356 = vector.extract_strided_slice %344 {offsets = [0, 384], sizes = [8, 128], strides = [1, 1]} : vector<8x512xf32> to vector<8x128xf32>
    %357 = math.tanh %356 : vector<8x128xf32>
    %358 = arith.mulf %354, %335 : vector<8x128xf32>
    %359 = arith.mulf %353, %357 : vector<8x128xf32>
    %360 = arith.addf %358, %359 : vector<8x128xf32>
    %361 = math.tanh %360 : vector<8x128xf32>
    %362 = arith.mulf %355, %361 : vector<8x128xf32>
    %363 = arith.addi %4, %c2_i32_124 : i32
    %364 = arith.cmpi slt, %363, %3 : i32
    %365 = arith.select %364, %362, %334 : vector<8x128xf32>
    %366 = arith.select %364, %360, %335 : vector<8x128xf32>
    %367 = arith.index_cast %339 : i32 to index
    %c0_133 = arith.constant 0 : index
    %368 = vector.load %arg17[%367, %c0_133] : memref<64x128xf32, #tpu.memory_space<vmem>>, vector<8x128xf32>
    tpu.vector_store %arg17[%367, %c0_133], %365 {strides = array<i32>} : memref<64x128xf32, #tpu.memory_space<vmem>>, vector<8x128xf32>,
    %c3_i32_134 = arith.constant 3 : i32
    %c8_i32_135 = arith.constant 8 : i32
    %369 = arith.muli %c3_i32_134, %c8_i32_135 : i32
    %370 = tpu.assume_multiple %369, 8 : i32
    %371 = arith.index_cast %370 : i32 to index
    %c0_136 = arith.constant 0 : index
    %372 = vector.load %arg16[%371, %c0_136] : memref<64x512xf32, #tpu.memory_space<vmem>>, vector<8x512xf32>
    %c0_137 = arith.constant 0 : index
    %c0_138 = arith.constant 0 : index
    %373 = vector.load %arg7[%c0_137, %c0_138] : memref<128x512xf32, #tpu.memory_space<vmem>>, vector<128x512xf32>
    %cst_139 = arith.constant dense<0.000000e+00> : vector<8x512xf32>
    %374 = tpu.matmul %365, %373, %cst_139 {dimension_numbers = #tpu.dot_dimension_numbers<[1], [0], [0], [1], [0, 0, 1, 1], [], []>} : vector<8x128xf32>, vector<128x512xf32>, vector<8x512xf32> -> vector<8x512xf32>
    %375 = arith.addf %372, %374 : vector<8x512xf32>
    %376 = vector.extract_strided_slice %375 {offsets = [0, 0], sizes = [8, 384], strides = [1, 1]} : vector<8x512xf32> to vector<8x384xf32>
    %cst_140 = arith.constant 5.000000e-01 : f32
    %377 = vector.broadcast %cst_140 : f32 to vector<8x384xf32>
    %378 = arith.mulf %377, %376 : vector<8x384xf32>
    %379 = math.tanh %378 : vector<8x384xf32>
    %cst_141 = arith.constant 1.000000e+00 : f32
    %380 = vector.broadcast %cst_141 : f32 to vector<8x384xf32>
    %381 = arith.addf %380, %379 : vector<8x384xf32>
    %cst_142 = arith.constant 5.000000e-01 : f32
    %382 = vector.broadcast %cst_142 : f32 to vector<8x384xf32>
    %383 = arith.mulf %382, %381 : vector<8x384xf32>
    %384 = vector.extract_strided_slice %383 {offsets = [0, 0], sizes = [8, 128], strides = [1, 1]} : vector<8x384xf32> to vector<8x128xf32>
    %385 = vector.extract_strided_slice %383 {offsets = [0, 128], sizes = [8, 128], strides = [1, 1]} : vector<8x384xf32> to vector<8x128xf32>
    %386 = vector.extract_strided_slice %383 {offsets = [0, 256], sizes = [8, 128], strides = [1, 1]} : vector<8x384xf32> to vector<8x128xf32>
    %387 = vector.extract_strided_slice %375 {offsets = [0, 384], sizes = [8, 128], strides = [1, 1]} : vector<8x512xf32> to vector<8x128xf32>
    %388 = math.tanh %387 : vector<8x128xf32>
    %389 = arith.mulf %385, %366 : vector<8x128xf32>
    %390 = arith.mulf %384, %388 : vector<8x128xf32>
    %391 = arith.addf %389, %390 : vector<8x128xf32>
    %392 = math.tanh %391 : vector<8x128xf32>
    %393 = arith.mulf %386, %392 : vector<8x128xf32>
    %394 = arith.addi %4, %c3_i32_134 : i32
    %395 = arith.cmpi slt, %394, %3 : i32
    %396 = arith.select %395, %393, %365 : vector<8x128xf32>
    %397 = arith.select %395, %391, %366 : vector<8x128xf32>
    %398 = arith.index_cast %370 : i32 to index
    %c0_143 = arith.constant 0 : index
    %399 = vector.load %arg17[%398, %c0_143] : memref<64x128xf32, #tpu.memory_space<vmem>>, vector<8x128xf32>
    tpu.vector_store %arg17[%398, %c0_143], %396 {strides = array<i32>} : memref<64x128xf32, #tpu.memory_space<vmem>>, vector<8x128xf32>,
    %c4_i32_144 = arith.constant 4 : i32
    %c8_i32_145 = arith.constant 8 : i32
    %400 = arith.muli %c4_i32_144, %c8_i32_145 : i32
    %401 = tpu.assume_multiple %400, 8 : i32
    %402 = arith.index_cast %401 : i32 to index
    %c0_146 = arith.constant 0 : index
    %403 = vector.load %arg16[%402, %c0_146] : memref<64x512xf32, #tpu.memory_space<vmem>>, vector<8x512xf32>
    %c0_147 = arith.constant 0 : index
    %c0_148 = arith.constant 0 : index
    %404 = vector.load %arg7[%c0_147, %c0_148] : memref<128x512xf32, #tpu.memory_space<vmem>>, vector<128x512xf32>
    %cst_149 = arith.constant dense<0.000000e+00> : vector<8x512xf32>
    %405 = tpu.matmul %396, %404, %cst_149 {dimension_numbers = #tpu.dot_dimension_numbers<[1], [0], [0], [1], [0, 0, 1, 1], [], []>} : vector<8x128xf32>, vector<128x512xf32>, vector<8x512xf32> -> vector<8x512xf32>
    %406 = arith.addf %403, %405 : vector<8x512xf32>
    %407 = vector.extract_strided_slice %406 {offsets = [0, 0], sizes = [8, 384], strides = [1, 1]} : vector<8x512xf32> to vector<8x384xf32>
    %cst_150 = arith.constant 5.000000e-01 : f32
    %408 = vector.broadcast %cst_150 : f32 to vector<8x384xf32>
    %409 = arith.mulf %408, %407 : vector<8x384xf32>
    %410 = math.tanh %409 : vector<8x384xf32>
    %cst_151 = arith.constant 1.000000e+00 : f32
    %411 = vector.broadcast %cst_151 : f32 to vector<8x384xf32>
    %412 = arith.addf %411, %410 : vector<8x384xf32>
    %cst_152 = arith.constant 5.000000e-01 : f32
    %413 = vector.broadcast %cst_152 : f32 to vector<8x384xf32>
    %414 = arith.mulf %413, %412 : vector<8x384xf32>
    %415 = vector.extract_strided_slice %414 {offsets = [0, 0], sizes = [8, 128], strides = [1, 1]} : vector<8x384xf32> to vector<8x128xf32>
    %416 = vector.extract_strided_slice %414 {offsets = [0, 128], sizes = [8, 128], strides = [1, 1]} : vector<8x384xf32> to vector<8x128xf32>
    %417 = vector.extract_strided_slice %414 {offsets = [0, 256], sizes = [8, 128], strides = [1, 1]} : vector<8x384xf32> to vector<8x128xf32>
    %418 = vector.extract_strided_slice %406 {offsets = [0, 384], sizes = [8, 128], strides = [1, 1]} : vector<8x512xf32> to vector<8x128xf32>
    %419 = math.tanh %418 : vector<8x128xf32>
    %420 = arith.mulf %416, %397 : vector<8x128xf32>
    %421 = arith.mulf %415, %419 : vector<8x128xf32>
    %422 = arith.addf %420, %421 : vector<8x128xf32>
    %423 = math.tanh %422 : vector<8x128xf32>
    %424 = arith.mulf %417, %423 : vector<8x128xf32>
    %425 = arith.addi %4, %c4_i32_144 : i32
    %426 = arith.cmpi slt, %425, %3 : i32
    %427 = arith.select %426, %424, %396 : vector<8x128xf32>
    %428 = arith.select %426, %422, %397 : vector<8x128xf32>
    %429 = arith.index_cast %401 : i32 to index
    %c0_153 = arith.constant 0 : index
    %430 = vector.load %arg17[%429, %c0_153] : memref<64x128xf32, #tpu.memory_space<vmem>>, vector<8x128xf32>
    tpu.vector_store %arg17[%429, %c0_153], %427 {strides = array<i32>} : memref<64x128xf32, #tpu.memory_space<vmem>>, vector<8x128xf32>,
    %c5_i32_154 = arith.constant 5 : i32
    %c8_i32_155 = arith.constant 8 : i32
    %431 = arith.muli %c5_i32_154, %c8_i32_155 : i32
    %432 = tpu.assume_multiple %431, 8 : i32
    %433 = arith.index_cast %432 : i32 to index
    %c0_156 = arith.constant 0 : index
    %434 = vector.load %arg16[%433, %c0_156] : memref<64x512xf32, #tpu.memory_space<vmem>>, vector<8x512xf32>
    %c0_157 = arith.constant 0 : index
    %c0_158 = arith.constant 0 : index
    %435 = vector.load %arg7[%c0_157, %c0_158] : memref<128x512xf32, #tpu.memory_space<vmem>>, vector<128x512xf32>
    %cst_159 = arith.constant dense<0.000000e+00> : vector<8x512xf32>
    %436 = tpu.matmul %427, %435, %cst_159 {dimension_numbers = #tpu.dot_dimension_numbers<[1], [0], [0], [1], [0, 0, 1, 1], [], []>} : vector<8x128xf32>, vector<128x512xf32>, vector<8x512xf32> -> vector<8x512xf32>
    %437 = arith.addf %434, %436 : vector<8x512xf32>
    %438 = vector.extract_strided_slice %437 {offsets = [0, 0], sizes = [8, 384], strides = [1, 1]} : vector<8x512xf32> to vector<8x384xf32>
    %cst_160 = arith.constant 5.000000e-01 : f32
    %439 = vector.broadcast %cst_160 : f32 to vector<8x384xf32>
    %440 = arith.mulf %439, %438 : vector<8x384xf32>
    %441 = math.tanh %440 : vector<8x384xf32>
    %cst_161 = arith.constant 1.000000e+00 : f32
    %442 = vector.broadcast %cst_161 : f32 to vector<8x384xf32>
    %443 = arith.addf %442, %441 : vector<8x384xf32>
    %cst_162 = arith.constant 5.000000e-01 : f32
    %444 = vector.broadcast %cst_162 : f32 to vector<8x384xf32>
    %445 = arith.mulf %444, %443 : vector<8x384xf32>
    %446 = vector.extract_strided_slice %445 {offsets = [0, 0], sizes = [8, 128], strides = [1, 1]} : vector<8x384xf32> to vector<8x128xf32>
    %447 = vector.extract_strided_slice %445 {offsets = [0, 128], sizes = [8, 128], strides = [1, 1]} : vector<8x384xf32> to vector<8x128xf32>
    %448 = vector.extract_strided_slice %445 {offsets = [0, 256], sizes = [8, 128], strides = [1, 1]} : vector<8x384xf32> to vector<8x128xf32>
    %449 = vector.extract_strided_slice %437 {offsets = [0, 384], sizes = [8, 128], strides = [1, 1]} : vector<8x512xf32> to vector<8x128xf32>
    %450 = math.tanh %449 : vector<8x128xf32>
    %451 = arith.mulf %447, %428 : vector<8x128xf32>
    %452 = arith.mulf %446, %450 : vector<8x128xf32>
    %453 = arith.addf %451, %452 : vector<8x128xf32>
    %454 = math.tanh %453 : vector<8x128xf32>
    %455 = arith.mulf %448, %454 : vector<8x128xf32>
    %456 = arith.addi %4, %c5_i32_154 : i32
    %457 = arith.cmpi slt, %456, %3 : i32
    %458 = arith.select %457, %455, %427 : vector<8x128xf32>
    %459 = arith.select %457, %453, %428 : vector<8x128xf32>
    %460 = arith.index_cast %432 : i32 to index
    %c0_163 = arith.constant 0 : index
    %461 = vector.load %arg17[%460, %c0_163] : memref<64x128xf32, #tpu.memory_space<vmem>>, vector<8x128xf32>
    tpu.vector_store %arg17[%460, %c0_163], %458 {strides = array<i32>} : memref<64x128xf32, #tpu.memory_space<vmem>>, vector<8x128xf32>,
    %c6_i32_164 = arith.constant 6 : i32
    %c8_i32_165 = arith.constant 8 : i32
    %462 = arith.muli %c6_i32_164, %c8_i32_165 : i32
    %463 = tpu.assume_multiple %462, 8 : i32
    %464 = arith.index_cast %463 : i32 to index
    %c0_166 = arith.constant 0 : index
    %465 = vector.load %arg16[%464, %c0_166] : memref<64x512xf32, #tpu.memory_space<vmem>>, vector<8x512xf32>
    %c0_167 = arith.constant 0 : index
    %c0_168 = arith.constant 0 : index
    %466 = vector.load %arg7[%c0_167, %c0_168] : memref<128x512xf32, #tpu.memory_space<vmem>>, vector<128x512xf32>
    %cst_169 = arith.constant dense<0.000000e+00> : vector<8x512xf32>
    %467 = tpu.matmul %458, %466, %cst_169 {dimension_numbers = #tpu.dot_dimension_numbers<[1], [0], [0], [1], [0, 0, 1, 1], [], []>} : vector<8x128xf32>, vector<128x512xf32>, vector<8x512xf32> -> vector<8x512xf32>
    %468 = arith.addf %465, %467 : vector<8x512xf32>
    %469 = vector.extract_strided_slice %468 {offsets = [0, 0], sizes = [8, 384], strides = [1, 1]} : vector<8x512xf32> to vector<8x384xf32>
    %cst_170 = arith.constant 5.000000e-01 : f32
    %470 = vector.broadcast %cst_170 : f32 to vector<8x384xf32>
    %471 = arith.mulf %470, %469 : vector<8x384xf32>
    %472 = math.tanh %471 : vector<8x384xf32>
    %cst_171 = arith.constant 1.000000e+00 : f32
    %473 = vector.broadcast %cst_171 : f32 to vector<8x384xf32>
    %474 = arith.addf %473, %472 : vector<8x384xf32>
    %cst_172 = arith.constant 5.000000e-01 : f32
    %475 = vector.broadcast %cst_172 : f32 to vector<8x384xf32>
    %476 = arith.mulf %475, %474 : vector<8x384xf32>
    %477 = vector.extract_strided_slice %476 {offsets = [0, 0], sizes = [8, 128], strides = [1, 1]} : vector<8x384xf32> to vector<8x128xf32>
    %478 = vector.extract_strided_slice %476 {offsets = [0, 128], sizes = [8, 128], strides = [1, 1]} : vector<8x384xf32> to vector<8x128xf32>
    %479 = vector.extract_strided_slice %476 {offsets = [0, 256], sizes = [8, 128], strides = [1, 1]} : vector<8x384xf32> to vector<8x128xf32>
    %480 = vector.extract_strided_slice %468 {offsets = [0, 384], sizes = [8, 128], strides = [1, 1]} : vector<8x512xf32> to vector<8x128xf32>
    %481 = math.tanh %480 : vector<8x128xf32>
    %482 = arith.mulf %478, %459 : vector<8x128xf32>
    %483 = arith.mulf %477, %481 : vector<8x128xf32>
    %484 = arith.addf %482, %483 : vector<8x128xf32>
    %485 = math.tanh %484 : vector<8x128xf32>
    %486 = arith.mulf %479, %485 : vector<8x128xf32>
    %487 = arith.addi %4, %c6_i32_164 : i32
    %488 = arith.cmpi slt, %487, %3 : i32
    %489 = arith.select %488, %486, %458 : vector<8x128xf32>
    %490 = arith.select %488, %484, %459 : vector<8x128xf32>
    %491 = arith.index_cast %463 : i32 to index
    %c0_173 = arith.constant 0 : index
    %492 = vector.load %arg17[%491, %c0_173] : memref<64x128xf32, #tpu.memory_space<vmem>>, vector<8x128xf32>
    tpu.vector_store %arg17[%491, %c0_173], %489 {strides = array<i32>} : memref<64x128xf32, #tpu.memory_space<vmem>>, vector<8x128xf32>,
    %c7_i32_174 = arith.constant 7 : i32
    %c8_i32_175 = arith.constant 8 : i32
    %493 = arith.muli %c7_i32_174, %c8_i32_175 : i32
    %494 = tpu.assume_multiple %493, 8 : i32
    %495 = arith.index_cast %494 : i32 to index
    %c0_176 = arith.constant 0 : index
    %496 = vector.load %arg16[%495, %c0_176] : memref<64x512xf32, #tpu.memory_space<vmem>>, vector<8x512xf32>
    %c0_177 = arith.constant 0 : index
    %c0_178 = arith.constant 0 : index
    %497 = vector.load %arg7[%c0_177, %c0_178] : memref<128x512xf32, #tpu.memory_space<vmem>>, vector<128x512xf32>
    %cst_179 = arith.constant dense<0.000000e+00> : vector<8x512xf32>
    %498 = tpu.matmul %489, %497, %cst_179 {dimension_numbers = #tpu.dot_dimension_numbers<[1], [0], [0], [1], [0, 0, 1, 1], [], []>} : vector<8x128xf32>, vector<128x512xf32>, vector<8x512xf32> -> vector<8x512xf32>
    %499 = arith.addf %496, %498 : vector<8x512xf32>
    %500 = vector.extract_strided_slice %499 {offsets = [0, 0], sizes = [8, 384], strides = [1, 1]} : vector<8x512xf32> to vector<8x384xf32>
    %cst_180 = arith.constant 5.000000e-01 : f32
    %501 = vector.broadcast %cst_180 : f32 to vector<8x384xf32>
    %502 = arith.mulf %501, %500 : vector<8x384xf32>
    %503 = math.tanh %502 : vector<8x384xf32>
    %cst_181 = arith.constant 1.000000e+00 : f32
    %504 = vector.broadcast %cst_181 : f32 to vector<8x384xf32>
    %505 = arith.addf %504, %503 : vector<8x384xf32>
    %cst_182 = arith.constant 5.000000e-01 : f32
    %506 = vector.broadcast %cst_182 : f32 to vector<8x384xf32>
    %507 = arith.mulf %506, %505 : vector<8x384xf32>
    %508 = vector.extract_strided_slice %507 {offsets = [0, 0], sizes = [8, 128], strides = [1, 1]} : vector<8x384xf32> to vector<8x128xf32>
    %509 = vector.extract_strided_slice %507 {offsets = [0, 128], sizes = [8, 128], strides = [1, 1]} : vector<8x384xf32> to vector<8x128xf32>
    %510 = vector.extract_strided_slice %507 {offsets = [0, 256], sizes = [8, 128], strides = [1, 1]} : vector<8x384xf32> to vector<8x128xf32>
    %511 = vector.extract_strided_slice %499 {offsets = [0, 384], sizes = [8, 128], strides = [1, 1]} : vector<8x512xf32> to vector<8x128xf32>
    %512 = math.tanh %511 : vector<8x128xf32>
    %513 = arith.mulf %509, %490 : vector<8x128xf32>
    %514 = arith.mulf %508, %512 : vector<8x128xf32>
    %515 = arith.addf %513, %514 : vector<8x128xf32>
    %516 = math.tanh %515 : vector<8x128xf32>
    %517 = arith.mulf %510, %516 : vector<8x128xf32>
    %518 = arith.addi %4, %c7_i32_174 : i32
    %519 = arith.cmpi slt, %518, %3 : i32
    %520 = arith.select %519, %517, %489 : vector<8x128xf32>
    %521 = arith.select %519, %515, %490 : vector<8x128xf32>
    %522 = arith.index_cast %494 : i32 to index
    %c0_183 = arith.constant 0 : index
    %523 = vector.load %arg17[%522, %c0_183] : memref<64x128xf32, #tpu.memory_space<vmem>>, vector<8x128xf32>
    tpu.vector_store %arg17[%522, %c0_183], %520 {strides = array<i32>} : memref<64x128xf32, #tpu.memory_space<vmem>>, vector<8x128xf32>,
    %c8_i32_184 = arith.constant 8 : i32
    %c0_185 = arith.constant 0 : index
    %c0_186 = arith.constant 0 : index
    %c0_187 = arith.constant 0 : index
    %524 = vector.load %arg14[%c0_185, %c0_186, %c0_187] : memref<2x8x128xf32, #tpu.memory_space<vmem>>, vector<1x8x128xf32>
    %525 = vector.shape_cast %524 : vector<1x8x128xf32> to vector<8x128xf32>
    %526 = vector.shape_cast %261 : vector<8x128xf32> to vector<1x8x128xf32>
    tpu.vector_store %arg14[%c0_185, %c0_186, %c0_187], %526 {strides = array<i32>} : memref<2x8x128xf32, #tpu.memory_space<vmem>>, vector<1x8x128xf32>,
    %c1_188 = arith.constant 1 : index
    %c0_189 = arith.constant 0 : index
    %c0_190 = arith.constant 0 : index
    %527 = vector.load %arg14[%c1_188, %c0_189, %c0_190] : memref<2x8x128xf32, #tpu.memory_space<vmem>>, vector<1x8x128xf32>
    %528 = vector.shape_cast %527 : vector<1x8x128xf32> to vector<8x128xf32>
    %529 = vector.shape_cast %520 : vector<8x128xf32> to vector<1x8x128xf32>
    tpu.vector_store %arg14[%c1_188, %c0_189, %c0_190], %529 {strides = array<i32>} : memref<2x8x128xf32, #tpu.memory_space<vmem>>, vector<1x8x128xf32>,
    %c0_191 = arith.constant 0 : index
    %c0_192 = arith.constant 0 : index
    %c0_193 = arith.constant 0 : index
    %530 = vector.load %arg15[%c0_191, %c0_192, %c0_193] : memref<2x8x128xf32, #tpu.memory_space<vmem>>, vector<1x8x128xf32>
    %531 = vector.shape_cast %530 : vector<1x8x128xf32> to vector<8x128xf32>
    %532 = vector.shape_cast %262 : vector<8x128xf32> to vector<1x8x128xf32>
    tpu.vector_store %arg15[%c0_191, %c0_192, %c0_193], %532 {strides = array<i32>} : memref<2x8x128xf32, #tpu.memory_space<vmem>>, vector<1x8x128xf32>,
    %c1_194 = arith.constant 1 : index
    %c0_195 = arith.constant 0 : index
    %c0_196 = arith.constant 0 : index
    %533 = vector.load %arg15[%c1_194, %c0_195, %c0_196] : memref<2x8x128xf32, #tpu.memory_space<vmem>>, vector<1x8x128xf32>
    %534 = vector.shape_cast %533 : vector<1x8x128xf32> to vector<8x128xf32>
    %535 = vector.shape_cast %521 : vector<8x128xf32> to vector<1x8x128xf32>
    tpu.vector_store %arg15[%c1_194, %c0_195, %c0_196], %535 {strides = array<i32>} : memref<2x8x128xf32, #tpu.memory_space<vmem>>, vector<1x8x128xf32>,
    %c0_197 = arith.constant 0 : index
    %c0_198 = arith.constant 0 : index
    %536 = vector.load %arg17[%c0_197, %c0_198] : memref<64x128xf32, #tpu.memory_space<vmem>>, vector<64x128xf32>
    %c0_199 = arith.constant 0 : index
    %c0_200 = arith.constant 0 : index
    %537 = vector.load %arg9[%c0_199, %c0_200] : memref<128x16xf32, #tpu.memory_space<vmem>>, vector<128x16xf32>
    %cst_201 = arith.constant dense<0.000000e+00> : vector<64x16xf32>
    %538 = tpu.matmul %536, %537, %cst_201 {dimension_numbers = #tpu.dot_dimension_numbers<[1], [0], [0], [1], [0, 0, 1, 1], [], []>} : vector<64x128xf32>, vector<128x16xf32>, vector<64x16xf32> -> vector<64x16xf32>
    %c0_202 = arith.constant 0 : index
    %c0_203 = arith.constant 0 : index
    %539 = vector.load %arg10[%c0_202, %c0_203] : memref<1x16xf32, #tpu.memory_space<vmem>>, vector<1x16xf32>
    %540 = vector.broadcast %539 : vector<1x16xf32> to vector<64x16xf32>
    %541 = arith.addf %538, %540 : vector<64x16xf32>
    %542 = vector.shape_cast %541 : vector<64x16xf32> to vector<8x8x16xf32>
    %c0_204 = arith.constant 0 : index
    %c0_205 = arith.constant 0 : index
    %c0_206 = arith.constant 0 : index
    %543 = vector.load %arg13[%c0_204, %c0_205, %c0_206] : memref<8x8x16xf32, #tpu.memory_space<vmem>>, vector<8x8x16xf32>
    tpu.vector_store %arg13[%c0_204, %c0_205, %c0_206], %542 {strides = array<i32>} : memref<8x8x16xf32, #tpu.memory_space<vmem>>, vector<8x8x16xf32>,
    return
  }
  func.func @transform_0(%arg0: i32, %arg1: memref<1xi32, #tpu.memory_space<smem>>) -> (i32, i32, i32) {
    %c0_i32 = arith.constant 0 : i32
    %c0_i32_0 = arith.constant 0 : i32
    %c0_i32_1 = arith.constant 0 : i32
    return %arg0, %c0_i32, %c0_i32_0 : i32, i32, i32
  }
  func.func @transform_1(%arg0: i32, %arg1: memref<1xi32, #tpu.memory_space<smem>>) -> (i32, i32) {
    %c0_i32 = arith.constant 0 : i32
    %c0_i32_0 = arith.constant 0 : i32
    %c0_i32_1 = arith.constant 0 : i32
    return %c0_i32, %c0_i32_0 : i32, i32
  }
  func.func @transform_2(%arg0: i32, %arg1: memref<1xi32, #tpu.memory_space<smem>>) -> (i32, i32) {
    %c0_i32 = arith.constant 0 : i32
    %c0_i32_0 = arith.constant 0 : i32
    %c0_i32_1 = arith.constant 0 : i32
    return %c0_i32, %c0_i32_0 : i32, i32
  }
  func.func @transform_3(%arg0: i32, %arg1: memref<1xi32, #tpu.memory_space<smem>>) -> (i32, i32) {
    %c0_i32 = arith.constant 0 : i32
    %c0_i32_0 = arith.constant 0 : i32
    %c0_i32_1 = arith.constant 0 : i32
    return %c0_i32, %c0_i32_0 : i32, i32
  }
  func.func @transform_4(%arg0: i32, %arg1: memref<1xi32, #tpu.memory_space<smem>>) -> (i32, i32) {
    %c0_i32 = arith.constant 0 : i32
    %c0_i32_0 = arith.constant 0 : i32
    %c0_i32_1 = arith.constant 0 : i32
    return %c0_i32, %c0_i32_0 : i32, i32
  }
  func.func @transform_5(%arg0: i32, %arg1: memref<1xi32, #tpu.memory_space<smem>>) -> (i32, i32) {
    %c0_i32 = arith.constant 0 : i32
    %c0_i32_0 = arith.constant 0 : i32
    %c0_i32_1 = arith.constant 0 : i32
    return %c0_i32, %c0_i32_0 : i32, i32
  }
  func.func @transform_6(%arg0: i32, %arg1: memref<1xi32, #tpu.memory_space<smem>>) -> (i32, i32) {
    %c0_i32 = arith.constant 0 : i32
    %c0_i32_0 = arith.constant 0 : i32
    %c0_i32_1 = arith.constant 0 : i32
    return %c0_i32, %c0_i32_0 : i32, i32
  }
  func.func @transform_7(%arg0: i32, %arg1: memref<1xi32, #tpu.memory_space<smem>>) -> (i32, i32) {
    %c0_i32 = arith.constant 0 : i32
    %c0_i32_0 = arith.constant 0 : i32
    %c0_i32_1 = arith.constant 0 : i32
    return %c0_i32, %c0_i32_0 : i32, i32
  }
  func.func @transform_8(%arg0: i32, %arg1: memref<1xi32, #tpu.memory_space<smem>>) -> (i32, i32) {
    %c0_i32 = arith.constant 0 : i32
    %c0_i32_0 = arith.constant 0 : i32
    %c0_i32_1 = arith.constant 0 : i32
    return %c0_i32, %c0_i32_0 : i32, i32
  }
  func.func @transform_9(%arg0: i32, %arg1: memref<1xi32, #tpu.memory_space<smem>>) -> (i32, i32, i32) {
    %c0_i32 = arith.constant 0 : i32
    %c0_i32_0 = arith.constant 0 : i32
    %c0_i32_1 = arith.constant 0 : i32
    %c0_i32_2 = arith.constant 0 : i32
    return %c0_i32, %c0_i32_0, %c0_i32_1 : i32, i32, i32
  }
  func.func @transform_10(%arg0: i32, %arg1: memref<1xi32, #tpu.memory_space<smem>>) -> (i32, i32, i32) {
    %c0_i32 = arith.constant 0 : i32
    %c0_i32_0 = arith.constant 0 : i32
    %c0_i32_1 = arith.constant 0 : i32
    %c0_i32_2 = arith.constant 0 : i32
    return %c0_i32, %c0_i32_0, %c0_i32_1 : i32, i32, i32
  }
  func.func @transform_11(%arg0: i32, %arg1: memref<1xi32, #tpu.memory_space<smem>>) -> (i32, i32, i32) {
    %c0_i32 = arith.constant 0 : i32
    %c0_i32_0 = arith.constant 0 : i32
    %c0_i32_1 = arith.constant 0 : i32
    return %arg0, %c0_i32, %c0_i32_0 : i32, i32, i32
  }
  func.func @transform_12(%arg0: i32, %arg1: memref<1xi32, #tpu.memory_space<smem>>) -> (i32, i32, i32) {
    %c0_i32 = arith.constant 0 : i32
    %c0_i32_0 = arith.constant 0 : i32
    %c0_i32_1 = arith.constant 0 : i32
    %c0_i32_2 = arith.constant 0 : i32
    return %c0_i32, %c0_i32_0, %c0_i32_1 : i32, i32, i32
  }
  func.func @transform_13(%arg0: i32, %arg1: memref<1xi32, #tpu.memory_space<smem>>) -> (i32, i32, i32) {
    %c0_i32 = arith.constant 0 : i32
    %c0_i32_0 = arith.constant 0 : i32
    %c0_i32_1 = arith.constant 0 : i32
    %c0_i32_2 = arith.constant 0 : i32
    return %c0_i32, %c0_i32_0, %c0_i32_1 : i32, i32, i32
  }
}

</mosaic_0001>

<bundles_post_ra>
// kernel: char_lstm_loop_forward.1
= control target key start
LH: loop header
LB: loop body
LE: loop exit
PB: predicated region body
PF: predicated region fallthrough
CT: control target
= control target key end

     0   :  { %v8645_v2 = vmov 0.0   ;;  %vm91_vm0 = vcmask 64512   ;;  %vm4702_vm9 = vcmask 130048   ;;  %s8630_s2 = inlined_call_operand.vmem [shape: f32[8,512], index: 2, kind: input, shape index: {}]   ;;  %s8631_s1 = inlined_call_operand.vmem [shape: f32[8,8,8], index: 1, kind: input, shape index: {}]   ;;  %s8632_s3 = inlined_call_operand.vmem [shape: f32[128,512], index: 3, kind: input, shape index: {}]   ;;  %s8633_s13 = inlined_call_operand.vmem [shape: f32[2,8,128], index: 13, kind: output, shape index: {1}]   ;;  %s8634_s10 = inlined_call_operand.vmem [shape: f32[2,8,128], index: 10, kind: input, shape index: {}, may-alias: {10,11}]   ;;  %s8635_s11 = inlined_call_operand.vmem [shape: f32[2,8,128], index: 11, kind: input, shape index: {}, may-alias: {10,11}]   ;;  %s8636_s14 = inlined_call_operand.vmem [shape: f32[2,8,128], index: 14, kind: output, shape index: {2}]   ;;  %s8637_s4 = inlined_call_operand.vmem [shape: f32[1,512], index: 4, kind: input, shape index: {}]   ;;  %s8638_s0 = inlined_call_operand.<no memory space> [shape: s32[1], index: 0, kind: input, shape index: {}]   ;;  %s8639_s5 = inlined_call_operand.vmem [shape: f32[128,512], index: 5, kind: input, shape index: {}]   ;;  %s8640_s6 = inlined_call_operand.vmem [shape: f32[128,512], index: 6, kind: input, shape index: {}]   ;;  %s8641_s7 = inlined_call_operand.vmem [shape: f32[1,512], index: 7, kind: input, shape index: {}]   ;;  %s8642_s8 = inlined_call_operand.vmem [shape: f32[128,16], index: 8, kind: input, shape index: {}]   ;;  %s8643_s9 = inlined_call_operand.vmem [shape: f32[1,16], index: 9, kind: input, shape index: {}]   ;;  %s8644_s12 = inlined_call_operand.vmem [shape: f32[8,8,16], index: 12, kind: output, shape index: {0}]  }
   0x1   :  { %v68_v0 = vld [vmem:[%s8630_s2 + $0x18] sm:$0xff]  ;;  %v67_v1 = vld [vmem:[%s8630_s2 + $0x10] sm:$0xff]  ;;  %293 = vmatprep.mubr.f32.mxu1 %v8645_v2  ;;  %v57_v3 = vld [vmem:[%s8631_s1] sm:$0xff]  ;;  %180 = vmatprep.mubr.f32.mxu0 %v8645_v2  ;;  %p4746_p0 = scmp.gt.s32.totalorder %s8638_s0, 0  ;;  %p4747_p1 = scmp.gt.s32.totalorder %s8638_s0, 1 }
   0x2   :  { %259 = vmatprep.subr.mxu1 %v68_v0  ;;  %v5078_v4 = vld [vmem:[%s8632_s3 + $0x1e8] sm:$0xff]  ;;  %v5083_v5 = vld [vmem:[%s8632_s3 + $0x1e0] sm:$0xff]  ;;  %v5134_v13 = vld [vmem:[%s8631_s1 + $0x10] sm:$0xff]  ;;  %p4748_p2 = scmp.gt.s32.totalorder %s8638_s0, 2  ;;  %p4749_p3 = scmp.gt.s32.totalorder %s8638_s0, 3 }
   0x3   :  { %260 = vmatpush1.msra.mxu1 %v67_v1  ;;  %v5088_v6 = vld [vmem:[%s8632_s3 + $0x1c8] sm:$0xff]  ;;  %v5095_v7 = vld [vmem:[%s8632_s3 + $0x1c0] sm:$0xff]  ;;  %v5166_v18 = vld [vmem:[%s8631_s1 + $0x18] sm:$0xff]  ;;  %s612_s19 = scalar_select %p4746_p0, 1, 0 }
   0x4   :  { %4738 = vmatmul.mubr.msk.f32.vlgmr.msra.gmra.mxu1 %vm91_vm0, %v57_v3  ;;  %447 = vmatprep.subr.mxu1 %v5078_v4  ;;  %v5102_v8 = vld [vmem:[%s8631_s1 + $0x8] sm:$0xff]  ;;  %v5113_v10 = vld [vmem:[%s8632_s3 + $0x1a0] sm:$0xff]  ;;  %v5278_v36 = vld [vmem:[%s8631_s1 + $0x30] sm:$0xff]  ;;  %s855_s22 = scalar_select %p4747_p1, 1, 0 }
   0x5   :  { %448 = vmatpush1.msra.mxu1 %v5083_v5  ;;  %299 = vmatprep.mubr.f32.mxu1 %v8645_v2  ;;  %v5107_v9 = vld [vmem:[%s8632_s3 + $0x1a8] sm:$0xff]  ;;  %v5127_v12 = vld [vmem:[%s8632_s3 + $0x180] sm:$0xff]  ;;  %v5313_v41 = vld [vmem:[%s8631_s1 + $0x38] sm:$0xff]  ;;  %s1099_s27 = scalar_select %p4748_p2, 1, 0 }
   0x6   :  { %449 = vmatprep.subr.mxu1 %v5088_v6  ;;  %v5119_v11 = vld [vmem:[%s8632_s3 + $0x188] sm:$0xff]  ;;  %v5145_v15 = vld [vmem:[%s8632_s3 + $0x160] sm:$0xff]  ;;  %v5352_v47 = vld [vmem:[%s8632_s3 + $0x1f8] sm:$0xff]  ;;  %s1343_s29 = scalar_select %p4749_p3, 1, 0 }
   0x7   :  { %450 = vmatpush1.msra.mxu1 %v5095_v7  ;;  %v5139_v14 = vld [vmem:[%s8632_s3 + $0x168] sm:$0xff]  ;;  %v5159_v17 = vld [vmem:[%s8632_s3 + $0x140] sm:$0xff]  ;;  %v5358_v48 = vld [vmem:[%s8632_s3 + $0x1f0] sm:$0xff]  ;;  %p4750_p4 = scmp.gt.s32.totalorder %s8638_s0, 4  ;;  %p4751_p5 = scmp.gt.s32.totalorder %s8638_s0, 5 }
   0x8   :  { %4739 = vmatmul.mubr.msk.f32.gmra.mxu1 %vm91_vm0, %v5102_v8  ;;  %451 = vmatprep.subr.mxu1 %v5107_v9  ;;  %v5151_v16 = vld [vmem:[%s8632_s3 + $0x148] sm:$0xff]  ;;  %v5180_v21 = vld [vmem:[%s8632_s3 + $0x120] sm:$0xff]  ;;  %v5365_v49 = vld [vmem:[%s8632_s3 + $0x1d8] sm:$0xff]  ;;  %p4752_p6 = scmp.gt.s32.totalorder %s8638_s0, 6  ;;  %p4753_p7 = scmp.gt.s32.totalorder %s8638_s0, 7 }
   0x9   :  { %452 = vmatpush1.msra.mxu1 %v5113_v10  ;;  %305 = vmatprep.mubr.f32.mxu1 %v8645_v2  ;;  %v5171_v19 = vld [vmem:[%s8632_s3 + $0x128] sm:$0xff]  ;;  %v65_v22 = vld [vmem:[%s8630_s2] sm:$0xff]  ;;  %v5373_v50 = vld [vmem:[%s8632_s3 + $0x1d0] sm:$0xff]  ;;  %s1587_s15 = scalar_select %p4750_p4, 1, 0 }
   0xa   :  { %453 = vmatprep.subr.mxu1 %v5119_v11  ;;  %v66_v20 = vld [vmem:[%s8630_s2 + $0x8] sm:$0xff]  ;;  %v5197_v24 = vld [vmem:[%s8632_s3 + $0x100] sm:$0xff]  ;;  %v5379_v51 = vld [vmem:[%s8632_s3 + $0x1b8] sm:$0xff]  ;;  %s2075_s23 = scalar_select %p4752_p6, 1, 0 }
   0xb   :  { %454 = vmatpush1.msra.mxu1 %v5127_v12  ;;  %146 = vmatprep.subr.mxu0 %v66_v20  ;;  %v5189_v23 = vld [vmem:[%s8632_s3 + $0x108] sm:$0xff]  ;;  %v5207_v26 = vld [vmem:[%s8631_s1 + $0x20] sm:$0xff]  ;;  %v5386_v52 = vld [vmem:[%s8632_s3 + $0x1b0] sm:$0xff] }
   0xc   :  { %4740 = vmatmul.mubr.msk.f32.gmra.mxu1 %vm91_vm0, %v5134_v13  ;;  %455 = vmatprep.subr.mxu1 %v5139_v14  ;;  %v48_v25 = vld [vmem:[%s8634_s10 + $0x8] sm:$0xff]  ;;  %v5221_v28 = vld [vmem:[%s8632_s3 + $0xe0] sm:$0xff]  ;;  %v5393_v53 = vld [vmem:[%s8632_s3 + $0x198] sm:$0xff] }
   0xd   :  { %456 = vmatpush1.msra.mxu1 %v5145_v15  ;;  %311 = vmatprep.mubr.f32.mxu1 %v8645_v2  ;;  %v5212_v27 = vld [vmem:[%s8632_s3 + $0xe8] sm:$0xff]  ;;  %50 = vst [vmem:[%s8633_s13 + $0x8] sm:$0xff] %v48_v25  ;;  %v5237_v30 = vld [vmem:[%s8632_s3 + $0xc0] sm:$0xff]  ;;  %v5401_v54 = vld [vmem:[%s8632_s3 + $0x190] sm:$0xff] }
   0xe   :  { %457 = vmatprep.subr.mxu1 %v5151_v16  ;;  %147 = vmatpush1.msra.mxu0 %v65_v22  ;;  %v5228_v29 = vld [vmem:[%s8632_s3 + $0xc8] sm:$0xff]  ;;  %8843 = vst [vmem:[#allocation7_spill] sm:$0xff] %v5237_v30  ;;  %v5255_v33 = vld [vmem:[%s8632_s3 + $0xa0] sm:$0xff]  ;;  %v5408_v55 = vld [vmem:[%s8632_s3 + $0x178] sm:$0xff] }
   0xf   :  { %458 = vmatpush1.msra.mxu1 %v5159_v17  ;;  %4730 = vmatmul.mubr.msk.f32.vlgmr.msra.gmra.mxu0 %vm91_vm0, %v57_v3  ;;  %8842 = vst [vmem:[#allocation6_spill] sm:$0xff] %v5228_v29  ;;  %v5244_v31 = vld [vmem:[%s8631_s1 + $0x28] sm:$0xff]  ;;  %8845 = vst [vmem:[#allocation9_spill] sm:$0xff] %v5255_v33  ;;  %v5271_v35 = vld [vmem:[%s8632_s3 + $0x80] sm:$0xff] }
  0x10   :  { %4741 = vmatmul.mubr.msk.f32.gmra.mxu1 %vm91_vm0, %v5166_v18  ;;  %459 = vmatprep.subr.mxu1 %v5171_v19  ;;  %v5249_v32 = vld [vmem:[%s8632_s3 + $0xa8] sm:$0xff]  ;;  %8846 = vst [vmem:[#allocation10_spill] sm:$0xff] %v5271_v35  ;;  %v5289_v38 = vld [vmem:[%s8632_s3 + $0x60] sm:$0xff]  ;;  %v5415_v56 = vld [vmem:[%s8632_s3 + $0x170] sm:$0xff] }
  0x11   :  { %460 = vmatpush1.msra.mxu1 %v5180_v21  ;;  %317 = vmatprep.mubr.f32.mxu1 %v8645_v2  ;;  %8844 = vst [vmem:[#allocation8_spill] sm:$0xff] %v5249_v32  ;;  %v5262_v34 = vld [vmem:[%s8632_s3 + $0x88] sm:$0xff]  ;;  %8848 = vst [vmem:[#allocation12_spill] sm:$0xff] %v5289_v38  ;;  %v5306_v40 = vld [vmem:[%s8632_s3 + $0x40] sm:$0xff] }
  0x12   :  { %461 = vmatprep.subr.mxu1 %v5189_v23  ;;  %689 = vmatprep.subr.mxu0 %v5078_v4  ;;  %v5283_v37 = vld [vmem:[%s8632_s3 + $0x68] sm:$0xff]  ;;  %8850 = vst [vmem:[#allocation14_spill] sm:$0xff] %v5306_v40  ;;  %v5324_v43 = vld [vmem:[%s8632_s3 + $0x20] sm:$0xff]  ;;  %v5422_v57 = vld [vmem:[%s8632_s3 + $0x158] sm:$0xff] }
  0x13   :  { %462 = vmatpush1.msra.mxu1 %v5197_v24  ;;  %690 = vmatpush1.msra.mxu0 %v5083_v5  ;;  %8847 = vst [vmem:[#allocation11_spill] sm:$0xff] %v5283_v37  ;;  %v5296_v39 = vld [vmem:[%s8632_s3 + $0x48] sm:$0xff]  ;;  %8852 = vst [vmem:[#allocation16_spill] sm:$0xff] %v5324_v43  ;;  %v5340_v45 = vld [vmem:[%s8632_s3] sm:$0xff] }
  0x14   :  { %4742 = vmatmul.mubr.msk.f32.gmra.mxu1 %vm91_vm0, %v5207_v26  ;;  %463 = vmatprep.subr.mxu1 %v5212_v27  ;;  %8849 = vst [vmem:[#allocation13_spill] sm:$0xff] %v5296_v39  ;;  %v5318_v42 = vld [vmem:[%s8632_s3 + $0x28] sm:$0xff]  ;;  %8854 = vst [vmem:[#allocation18_spill] sm:$0xff] %v5340_v45  ;;  %v5347_v46 = vld [vmem:[%s8634_s10] sm:$0xff] }
  0x15   :  { %464 = vmatpush1.msra.mxu1 %v5221_v28  ;;  %323 = vmatprep.mubr.f32.mxu1 %v8645_v2  ;;  %8851 = vst [vmem:[#allocation15_spill] sm:$0xff] %v5318_v42  ;;  %v5331_v44 = vld [vmem:[%s8632_s3 + $0x8] sm:$0xff]  ;;  %v5429_v58 = vld [vmem:[%s8632_s3 + $0x150] sm:$0xff]  ;;  %v5436_v59 = vld [vmem:[%s8632_s3 + $0x138] sm:$0xff] }
  0x16   :  { %465 = vmatprep.subr.mxu1 %v5228_v29  ;;  %186 = vmatprep.mubr.f32.mxu0 %v8645_v2  ;;  %8853 = vst [vmem:[#allocation17_spill] sm:$0xff] %v5331_v44  ;;  %v5444_v60 = vld [vmem:[%s8632_s3 + $0x130] sm:$0xff]  ;;  %v5451_v61 = vld [vmem:[%s8632_s3 + $0x118] sm:$0xff] }
  0x17   :  { %466 = vmatpush1.msra.mxu1 %v5237_v30  ;;  %691 = vmatprep.subr.mxu0 %v5088_v6  ;;  %v5458_v62 = vld [vmem:[%s8632_s3 + $0x110] sm:$0xff]  ;;  %v5465_v63 = vld [vmem:[%s8632_s3 + $0xf8] sm:$0xff] }
  0x18   :  { %4743 = vmatmul.mubr.msk.f32.gmra.mxu1 %vm91_vm0, %v5244_v31  ;;  %467 = vmatprep.subr.mxu1 %v5249_v32  ;;  %v5472_v0 = vld [vmem:[%s8632_s3 + $0xf0] sm:$0xff]  ;;  %v5479_v1 = vld [vmem:[%s8632_s3 + $0xd8] sm:$0xff] }
  0x19   :  { %468 = vmatpush1.msra.mxu1 %v5255_v33  ;;  %329 = vmatprep.mubr.f32.mxu1 %v8645_v2  ;;  %v5487_v3 = vld [vmem:[%s8632_s3 + $0xd0] sm:$0xff]  ;;  %v5522_v22 = vld [vmem:[%s8632_s3 + $0x78] sm:$0xff] }
  0x1a   :  { %469 = vmatprep.subr.mxu1 %v5262_v34  ;;  %4731 = vmatmul.mubr.msk.f32.gmra.mxu0 %vm91_vm0, %v5102_v8  ;;  %v5494_v8 = vld [vmem:[%s8632_s3 + $0xb8] sm:$0xff]  ;;  %v5515_v20 = vld [vmem:[%s8632_s3 + $0x90] sm:$0xff]  ;;  %8856 = vst [vmem:[#allocation20_spill] sm:$0xff] %v5522_v22 }
  0x1b   :  { %470 = vmatpush1.msra.mxu1 %v5271_v35  ;;  %692 = vmatpush1.msra.mxu0 %v5095_v7  ;;  %8855 = vst [vmem:[#allocation19_spill] sm:$0xff] %v5515_v20  ;;  %v5530_v25 = vld [vmem:[%s8632_s3 + $0x70] sm:$0xff] }
  0x1c   :  { %4744 = vmatmul.mubr.msk.f32.gmra.mxu1 %vm91_vm0, %v5278_v36  ;;  %471 = vmatprep.subr.mxu1 %v5283_v37  ;;  %8857 = vst [vmem:[#allocation21_spill] sm:$0xff] %v5530_v25 }
  0x1d   :  { %472 = vmatpush1.msra.mxu1 %v5289_v38  ;;  %335 = vmatprep.mubr.f32.mxu1 %v8645_v2 }
  0x1e   :  { %473 = vmatprep.subr.mxu1 %v5296_v39  ;;  %693 = vmatprep.subr.mxu0 %v5107_v9 }
  0x1f   :  { %474 = vmatpush1.msra.mxu1 %v5306_v40  ;;  %694 = vmatpush1.msra.mxu0 %v5113_v10 }
  0x20   :  { %4745 = vmatmul.mubr.msk.f32.gmra.mxu1 %vm91_vm0, %v5313_v41  ;;  %475 = vmatprep.subr.mxu1 %v5318_v42 }
  0x21   :  { %476 = vmatpush1.msra.mxu1 %v5324_v43  ;;  %511 = vmatprep.mubr.f32.mxu1 %v8645_v2 }
  0x22   :  { %477 = vmatprep.subr.mxu1 %v5331_v44  ;;  %192 = vmatprep.mubr.f32.mxu0 %v8645_v2 }
  0x23   :  { %478 = vmatpush1.msra.mxu1 %v5340_v45  ;;  %695 = vmatprep.subr.mxu0 %v5119_v11 }
  0x24   :  { %512 = vmatmul.mubr.f32.vlgmr.msra.gmra.mxu1 %v5347_v46  ;;  %518 = vmatprep.subr.mxu1 %v5352_v47 }
  0x25   :  { %519 = vmatpush1.msra.mxu1 %v5358_v48  ;;  %582 = vmatprep.mubr.f32.mxu1 %v8645_v2 }
  0x26   :  { %520 = vmatprep.subr.mxu1 %v5365_v49  ;;  %4732 = vmatmul.mubr.msk.f32.gmra.mxu0 %vm91_vm0, %v5134_v13  ;;  %v5501_v13 = vld [vmem:[%s8632_s3 + $0xb0] sm:$0xff] }
  0x27   :  { %521 = vmatpush1.msra.mxu1 %v5373_v50  ;;  %696 = vmatpush1.msra.mxu0 %v5127_v12 }
  0x28   :  { %522 = vmatprep.subr.mxu1 %v5379_v51  ;;  %697 = vmatprep.subr.mxu0 %v5139_v14 }
  0x29   :  { %523 = vmatpush1.msra.mxu1 %v5386_v52  ;;  %698 = vmatpush1.msra.mxu0 %v5145_v15 }
  0x2a   :  { %524 = vmatprep.subr.mxu1 %v5393_v53  ;;  %198 = vmatprep.mubr.f32.mxu0 %v8645_v2 }
  0x2b   :  { %525 = vmatpush1.msra.mxu1 %v5401_v54  ;;  %699 = vmatprep.subr.mxu0 %v5151_v16 }
  0x2c   :  { %526 = vmatprep.subr.mxu1 %v5408_v55  ;;  %4733 = vmatmul.mubr.msk.f32.gmra.mxu0 %vm91_vm0, %v5166_v18  ;;  %v5508_v18 = vld [vmem:[%s8632_s3 + $0x98] sm:$0xff] }
  0x2d   :  { %527 = vmatpush1.msra.mxu1 %v5415_v56  ;;  %700 = vmatpush1.msra.mxu0 %v5159_v17 }
  0x2e   :  { %528 = vmatprep.subr.mxu1 %v5422_v57  ;;  %701 = vmatprep.subr.mxu0 %v5171_v19 }
  0x2f   :  { %529 = vmatpush1.msra.mxu1 %v5429_v58  ;;  %702 = vmatpush1.msra.mxu0 %v5180_v21 }
  0x30   :  { %530 = vmatprep.subr.mxu1 %v5436_v59  ;;  %204 = vmatprep.mubr.f32.mxu0 %v8645_v2 }
  0x31   :  { %531 = vmatpush1.msra.mxu1 %v5444_v60  ;;  %703 = vmatprep.subr.mxu0 %v5189_v23 }
  0x32   :  { %532 = vmatprep.subr.mxu1 %v5451_v61  ;;  %4734 = vmatmul.mubr.msk.f32.gmra.mxu0 %vm91_vm0, %v5207_v26  ;;  %v5537_v26 = vld [vmem:[%s8632_s3 + $0x58] sm:$0xff] }
  0x33   :  { %533 = vmatpush1.msra.mxu1 %v5458_v62  ;;  %704 = vmatpush1.msra.mxu0 %v5197_v24  ;;  %8858 = vst [vmem:[#allocation22_spill] sm:$0xff] %v5537_v26 }
  0x34   :  { %534 = vmatprep.subr.mxu1 %v5465_v63  ;;  %705 = vmatprep.subr.mxu0 %v5212_v27 }
  0x35   :  { %535 = vmatpush1.msra.mxu1 %v5472_v0  ;;  %706 = vmatpush1.msra.mxu0 %v5221_v28 }
  0x36   :  { %536 = vmatprep.subr.mxu1 %v5479_v1  ;;  %210 = vmatprep.mubr.f32.mxu0 %v8645_v2  ;;  %v5551_v2 = vld [vmem:[%s8632_s3 + $0x38] sm:$0xff] }
  0x37   :  { %537 = vmatpush1.msra.mxu1 %v5487_v3  ;;  %707 = vmatprep.subr.mxu0 %v5228_v29  ;;  %8860 = vst [vmem:[#allocation24_spill] sm:$0xff] %v5551_v2  ;;  %v5573_v29 = vld [vmem:[%s8632_s3 + $0x10] sm:$0xff] }
  0x38   :  { %538 = vmatprep.subr.mxu1 %v5494_v8  ;;  %4735 = vmatmul.mubr.msk.f32.gmra.mxu0 %vm91_vm0, %v5244_v31  ;;  %v5544_v31 = vld [vmem:[%s8632_s3 + $0x50] sm:$0xff]  ;;  %8864 = vst [vmem:[#allocation27_spill] sm:$0xff] %v5573_v29 }
  0x39   :  { %539 = vmatpush1.msra.mxu1 %v5501_v13  ;;  %708 = vmatpush1.msra.mxu0 %v5237_v30  ;;  %8859 = vst [vmem:[#allocation23_spill] sm:$0xff] %v5544_v31  ;;  %v8861_v30 = vmov 0.0  }
  0x3a   :  { %540 = vmatprep.subr.mxu1 %v5508_v18  ;;  %709 = vmatprep.subr.mxu0 %v5249_v32  ;;  %v5558_v32 = vld [vmem:[%s8632_s3 + $0x30] sm:$0xff] }
  0x3b   :  { %541 = vmatpush1.msra.mxu1 %v5515_v20  ;;  %710 = vmatpush1.msra.mxu0 %v5255_v33  ;;  %8862 = vst [vmem:[#allocation25_spill] sm:$0xff] %v5558_v32  ;;  %v5565_v33 = vld [vmem:[%s8632_s3 + $0x18] sm:$0xff] }
  0x3c   :  { %542 = vmatprep.subr.mxu1 %v5522_v22  ;;  %216 = vmatprep.mubr.f32.mxu0 %v8861_v30  ;;  %8863 = vst [vmem:[#allocation26_spill] sm:$0xff] %v5565_v33 }
  0x3d   :  { %543 = vmatpush1.msra.mxu1 %v5530_v25  ;;  %711 = vmatprep.subr.mxu0 %v5262_v34 }
  0x3e   :  { %544 = vmatprep.subr.mxu1 %v5537_v26  ;;  %4736 = vmatmul.mubr.msk.f32.gmra.mxu0 %vm91_vm0, %v5278_v36  ;;  %v71_v36 = vlaneseq }
  0x3f   :  { %545 = vmatpush1.msra.mxu1 %v5544_v31  ;;  %712 = vmatpush1.msra.mxu0 %v5271_v35 }
  0x40   :  { %546 = vmatprep.subr.mxu1 %v5551_v2  ;;  %713 = vmatprep.subr.mxu0 %v5283_v37 }
  0x41   :  { %547 = vmatpush1.msra.mxu1 %v5558_v32  ;;  %714 = vmatpush1.msra.mxu0 %v5289_v38 }
  0x42   :  { %548 = vmatprep.subr.mxu1 %v5565_v33  ;;  %222 = vmatprep.mubr.f32.mxu0 %v8861_v30 }
  0x43   :  { %549 = vmatpush1.msra.mxu1 %v5573_v29  ;;  %715 = vmatprep.subr.mxu0 %v5296_v39 }
  0x44   :  { %583 = vmatmul.mubr.f32.vlgmr.msra.gmra.mxu1 %v5347_v46  ;;  %760 = vmatprep.subr.mxu1 %v5352_v47 }
  0x45   :  { %761 = vmatpush1.msra.mxu1 %v5358_v48  ;;  %4737 = vmatmul.mubr.msk.f32.gmra.mxu0 %vm91_vm0, %v5313_v41  ;;  %v5633_v41 = vshrl.u32 %v71_v36, 7 }
  0x46   :  { %762 = vmatprep.subr.mxu1 %v5365_v49  ;;  %716 = vmatpush1.msra.mxu0 %v5306_v40 }
  0x47   :  { %763 = vmatpush1.msra.mxu1 %v5373_v50  ;;  %717 = vmatprep.subr.mxu0 %v5318_v42  ;;  %8865 = vst [vmem:[#allocation28_spill] sm:$0xff] %v5633_v41 }
  0x48   :  { %764 = vmatprep.subr.mxu1 %v5379_v51  ;;  %718 = vmatpush1.msra.mxu0 %v5324_v43 }
  0x49   :  { %765 = vmatpush1.msra.mxu1 %v5386_v52  ;;  %719 = vmatprep.subr.mxu0 %v5331_v44 }
  0x4a   :  { %766 = vmatprep.subr.mxu1 %v5393_v53  ;;  %720 = vmatpush1.msra.mxu0 %v5340_v45  ;;  %v69_v45 = vld [vmem:[%s8637_s4] sm:$0xf]  ;;  %s1831_s4 = scalar_select %p4751_p5, 1, 0 }
  0x4b   :  { %767 = vmatpush1.msra.mxu1 %v5401_v54  ;;  %753 = vmatprep.mubr.f32.mxu0 %v8861_v30 }
  0x4c   :  { %768 = vmatprep.subr.mxu1 %v5408_v55  ;;  %824 = vmatprep.mubr.f32.mxu1 %v8861_v30  ;;  %v8662_v30 = vsub.s32 2, %v5633_v41 }
  0x4d   :  { %769 = vmatpush1.msra.mxu1 %v5415_v56  ;;  %933 = vmatprep.subr.mxu0 %v5078_v4  ;;  %v52_v4 = vld [vmem:[%s8635_s11 + $0x8] sm:$0xff] }
  0x4e   :  { %770 = vmatprep.subr.mxu1 %v5422_v57  ;;  %54 = vst [vmem:[%s8636_s14 + $0x8] sm:$0xff] %v52_v4  ;;  %v5646_v44 = vrot.slane %v69_v45, %v8662_v30 }
  0x4f   :  { %771 = vmatpush1.msra.mxu1 %v5429_v58 }
  0x50   :  { %772 = vmatprep.subr.mxu1 %v5436_v59 }
  0x51   :  { %773 = vmatpush1.msra.mxu1 %v5444_v60 }
  0x52   :  { %774 = vmatprep.subr.mxu1 %v5451_v61 }
  0x53   :  { %775 = vmatpush1.msra.mxu1 %v5458_v62 }
  0x54   :  { %776 = vmatprep.subr.mxu1 %v5465_v63 }
  0x55   :  { %777 = vmatpush1.msra.mxu1 %v5472_v0 }
  0x56   :  { %778 = vmatprep.subr.mxu1 %v5479_v1 }
  0x57   :  { %779 = vmatpush1.msra.mxu1 %v5487_v3 }
  0x58   :  { %780 = vmatprep.subr.mxu1 %v5494_v8 }
  0x59   :  { %781 = vmatpush1.msra.mxu1 %v5501_v13 }
  0x5a   :  { %782 = vmatprep.subr.mxu1 %v5508_v18 }
  0x5b   :  { %783 = vmatpush1.msra.mxu1 %v5515_v20 }
  0x5c   :  { %784 = vmatprep.subr.mxu1 %v5522_v22 }
  0x5d   :  { %785 = vmatpush1.msra.mxu1 %v5530_v25 }
  0x5e   :  { %786 = vmatprep.subr.mxu1 %v5537_v26 }
  0x5f   :  { %787 = vmatpush1.msra.mxu1 %v5544_v31 }
  0x60   :  { %788 = vmatprep.subr.mxu1 %v5551_v2 }
  0x61   :  { %789 = vmatpush1.msra.mxu1 %v5558_v32 }
  0x62   :  { %790 = vmatprep.subr.mxu1 %v5565_v33 }
  0x63   :  { %791 = vmatpush1.msra.mxu1 %v5573_v29 }
  0x64   :  { %1004 = vmatprep.subr.mxu1 %v5352_v47  ;;  %v8665_v47 = vsub.s32 3, %v5633_v41 }
  0x66   :  { %v5650_v36 = vrot.slane %v69_v45, %v8665_v47 }
  0xc4   :  { %v5639_v29 = vpop.f32.mrf.mxu1 }
  0xc6   :  { %v5642_v33 = vpop.f32.mrf.mxu1 }
  0xc8   :  { %v301_v4 = vpop.f32.mrf.mxu1 }
  0xc9   :  { %v5653_v32 = vadd.f32 %v301_v4, %v5646_v44 }
  0xca   :  { %v303_v43 = vpop.f32.mrf.mxu1 }
  0xcb   :  { %8866 = vst [vmem:[#allocation29_spill] sm:$0xff] %v5653_v32  ;;  %v5656_v2 = vadd.f32 %v303_v43, %v5650_v36 }
  0xcc   :  { %v307_v42 = vpop.f32.mrf.mxu1 }
  0xcd   :  { %8867 = vst [vmem:[#allocation30_spill] sm:$0xff] %v5656_v2  ;;  %v5659_v31 = vadd.f32 %v307_v42, %v5646_v44 }
  0xce   :  { %v309_v40 = vpop.f32.mrf.mxu1 }
  0xcf   :  { %8868 = vst [vmem:[#allocation31_spill] sm:$0xff] %v5659_v31  ;;  %v5662_v30 = vadd.f32 %v309_v40, %v5650_v36 }
  0xd0   :  { %v313_v26 = vpop.f32.mrf.mxu1 }
  0xd1   :  { %8869 = vst [vmem:[#allocation32_spill] sm:$0xff] %v5662_v30  ;;  %v5665_v39 = vadd.f32 %v313_v26, %v5646_v44  ;;  %v182_v30 = vpop.f32.mrf.mxu0 }
  0xd2   :  { %v315_v47 = vpop.f32.mrf.mxu1 }
  0xd3   :  { %8870 = vst [vmem:[#allocation33_spill] sm:$0xff] %v5665_v39  ;;  %v5668_v4 = vadd.f32 %v315_v47, %v5650_v36 }
  0xd4   :  { %v319_v32 = vpop.f32.mrf.mxu1 }
  0xd5   :  { %8871 = vst [vmem:[#allocation34_spill] sm:$0xff] %v5668_v4  ;;  %v5671_v43 = vadd.f32 %v319_v32, %v5646_v44  ;;  %v184_v4 = vpop.f32.mrf.mxu0 }
  0xd6   :  { %v321_v2 = vpop.f32.mrf.mxu1 }
  0xd7   :  { %8872 = vst [vmem:[#allocation35_spill] sm:$0xff] %v5671_v43  ;;  %v5674_v42 = vadd.f32 %v321_v2, %v5650_v36 }
  0xd8   :  { %v325_v31 = vpop.f32.mrf.mxu1 }
  0xd9   :  { %8873 = vst [vmem:[#allocation36_spill] sm:$0xff] %v5674_v42  ;;  %v5677_v40 = vadd.f32 %v325_v31, %v5646_v44 }
  0xda   :  { %v327_v25 = vpop.f32.mrf.mxu1  ;;  %v5688_v2 = vpop.f32.mrf.mxu0 }
  0xdb   :  { %8874 = vst [vmem:[#allocation37_spill] sm:$0xff] %v5677_v40  ;;  %v5680_v26 = vadd.f32 %v327_v25, %v5650_v36  ;;  %8878 = vst [vmem:[#allocation41_spill] sm:$0xff] %v5688_v2  ;;  %v8668_v40 = vsub.s32 0, %v5633_v41 }
  0xdc   :  { %v331_v39 = vpop.f32.mrf.mxu1 }
  0xdd   :  { %8875 = vst [vmem:[#allocation38_spill] sm:$0xff] %v5680_v26  ;;  %v5683_v47 = vadd.f32 %v331_v39, %v5646_v44  ;;  %v5697_v26 = vpop.f32.mrf.mxu0  ;;  %v8671_v39 = vsub.s32 1, %v5633_v41 }
  0xde   :  { %v333_v32 = vpop.f32.mrf.mxu1  ;;  %8881 = vst [vmem:[#allocation44_spill] sm:$0xff] %v5697_v26 }
  0xdf   :  { %8876 = vst [vmem:[#allocation39_spill] sm:$0xff] %v5683_v47  ;;  %v5686_v43 = vadd.f32 %v333_v32, %v5650_v36  ;;  %v5702_v32 = vrot.slane %v69_v45, %v8668_v40 }
  0xe0   :  { %v337_v42 = vpop.f32.mrf.mxu1 }
  0xe1   :  { %8877 = vst [vmem:[#allocation40_spill] sm:$0xff] %v5686_v43  ;;  %v5691_v31 = vadd.f32 %v337_v42, %v5646_v44  ;;  %v5706_v43 = vrot.slane %v69_v45, %v8671_v39 }
  0xe2   :  { %v339_v38 = vpop.f32.mrf.mxu1 }
  0xe3   :  { %8879 = vst [vmem:[#allocation42_spill] sm:$0xff] %v5691_v31  ;;  %v5695_v25 = vadd.f32 %v339_v38, %v5650_v36  ;;  %8882 = vst [vmem:[#allocation45_spill] sm:$0xff] %v5706_v43  ;;  %v185_v45 = vadd.f32 %v184_v4, %v5706_v43 }
  0xe4   :  { %v513_v22 = vpop.f32.mrf.mxu1 }
  0xe5   :  { %8880 = vst [vmem:[#allocation43_spill] sm:$0xff] %v5695_v25 }
  0xe6   :  { %v194_v47 = vpop.f32.mrf.mxu0 }
  0xe7   :  { %v5709_v42 = vadd.f32 %v194_v47, %v5702_v32  ;;  %v515_v47 = vpop.f32.mrf.mxu1 }
  0xe8   :  { %v196_v31 = vpop.f32.mrf.mxu0 }
  0xe9   :  { %8883 = vst [vmem:[#allocation46_spill] sm:$0xff] %v5709_v42  ;;  %v5712_v38 = vadd.f32 %v196_v31, %v5706_v43  ;;  %v183_v31 = vadd.f32 %v182_v30, %v5702_v32 }
  0xeb   :  { %8884 = vst [vmem:[#allocation47_spill] sm:$0xff] %v5712_v38  ;;  %v589_v42 = vadd.f32 %v513_v22, %v183_v31 }
  0xec   :  { %v200_v25 = vpop.f32.mrf.mxu0 }
  0xed   :  { %v5715_v26 = vadd.f32 %v200_v25, %v5702_v32  ;;  %v590_v25 = vadd.f32 %v515_v47, %v185_v45 }
  0xee   :  { %v202_v2 = vpop.f32.mrf.mxu0 }
  0xef   :  { %8885 = vst [vmem:[#allocation48_spill] sm:$0xff] %v5715_v26  ;;  %v5718_v40 = vadd.f32 %v202_v2, %v5706_v43  ;;  %v594_v20 = vmul.f32 0.5, %v590_v25 }
  0xf1   :  { %8886 = vst [vmem:[#allocation49_spill] sm:$0xff] %v5718_v40  ;;  %4828 = vtanh.f32 %v594_v20  ;;  %v296_v20 = vadd.f32 %v5639_v29, %v5646_v44  ;;  %v613_v29 = vstv %s612_s19 }
  0xf2   :  { %v206_v37 = vpop.f32.mrf.mxu0  ;;  %vm5753_vm1 = vcmp.eq.s32.totalorder %v613_v29, 1 }
  0xf3   :  { %v5722_v39 = vadd.f32 %v206_v37, %v5702_v32  ;;  %v593_v37 = vmul.f32 0.5, %v589_v42 }
  0xf4   :  { %v208_v41 = vpop.f32.mrf.mxu0 }
  0xf5   :  { %8887 = vst [vmem:[#allocation50_spill] sm:$0xff] %v5722_v39  ;;  %v5726_v38 = vadd.f32 %v208_v41, %v5706_v43  ;;  %4830 = vtanh.f32 %v593_v37 }
  0xf7   :  { %8888 = vst [vmem:[#allocation51_spill] sm:$0xff] %v5726_v38  ;;  %v6221_v38 = vld [vmem:[%s8632_s3 + $0x8] sm:$0xff] }
  0xf8   :  { %v212_v26 = vpop.f32.mrf.mxu0 }
  0xf9   :  { %v5729_v2 = vadd.f32 %v212_v26, %v5702_v32  ;;  %v298_v26 = vadd.f32 %v5642_v33, %v5650_v36 }
  0xfa   :  { %v214_v40 = vpop.f32.mrf.mxu0 }
  0xfb   :  { %8889 = vst [vmem:[#allocation52_spill] sm:$0xff] %v5729_v2  ;;  %v5732_v4 = vadd.f32 %v214_v40, %v5706_v43  ;;  %v6214_v2 = vld [vmem:[%s8632_s3 + $0x30] sm:$0xff] }
  0xfd   :  { %8890 = vst [vmem:[#allocation53_spill] sm:$0xff] %v5732_v4  ;;  %v6209_v4 = vld [vmem:[%s8632_s3 + $0x20] sm:$0xff] }
  0xfe   :  { %v218_v39 = vpop.f32.mrf.mxu0  ;;  %v4829_v42 = vpop.eup %4828 }
  0xff   :  { %v5735_v35 = vadd.f32 %v218_v39, %v5702_v32  ;;  %v600_v37 = vadd.f32 1.0, %v4829_v42 }
 0x100   :  { %v220_v30 = vpop.f32.mrf.mxu0 }
 0x101   :  { %8891 = vst [vmem:[#allocation54_spill] sm:$0xff] %v5735_v35  ;;  %v5738_v41 = vadd.f32 %v220_v30, %v5706_v43  ;;  %v603_v36 = vmul.f32 0.5, %v600_v37  ;;  %v6202_v35 = vld [vmem:[%s8632_s3 + $0x38] sm:$0xff] }
 0x102   :  { %v4831_v25 = vpop.eup %4830 }
 0x103   :  { %8892 = vst [vmem:[#allocation55_spill] sm:$0xff] %v5738_v41  ;;  %v599_v33 = vadd.f32 1.0, %v4831_v25  ;;  %v6197_v41 = vld [vmem:[%s8632_s3 + $0x28] sm:$0xff] }
 0x104   :  { %v584_v22 = vpop.f32.mrf.mxu1 }
 0x105   :  { %v224_v47 = vpop.f32.mrf.mxu0  ;;  %v591_v39 = vadd.f32 %v584_v22, %v296_v20 }
 0x106   :  { %v586_v45 = vpop.f32.mrf.mxu1  ;;  %v5743_v40 = vadd.f32 %v224_v47, %v5702_v32 }
 0x107   :  { %v592_v31 = vadd.f32 %v586_v45, %v298_v26  ;;  %v595_v30 = vmul.f32 0.5, %v591_v39  ;;  %v51_v26 = vld [vmem:[%s8635_s11] sm:$0xff]  ;;  %v602_v45 = vmul.f32 0.5, %v599_v33 }
 0x108   :  { %8893 = vst [vmem:[#allocation56_spill] sm:$0xff] %v5743_v40  ;;  %v606_v22 = vmul.f32 %v603_v36, %v51_v26 }
 0x109   :  { %4832 = vtanh.f32 %v592_v31  ;;  %v8894_v31 = vmov 0 }
 0x10a   :  { %4834 = vtanh.f32 %v595_v30  ;;  %v8895_v31 = vsel %vm5753_vm1, 4294967295, %v8894_v31 }
 0x10b   :  { %8896 = vst [vmem:[#allocation57_spill] sm:$0xff] %v8895_v31  ;;  %v6173_v31 = vld [vmem:[%s8632_s3 + $0x48] sm:$0xff] }
 0x116   :  { %v4833_v44 = vpop.eup %4832 }
 0x117   :  { %v607_v47 = vmul.f32 %v4833_v44, %v602_v45  ;;  %v4835_v42 = vpop.eup %4834 }
 0x118   :  { %v601_v25 = vadd.f32 1.0, %v4835_v42  ;;  %v8926_v42 = vmov 0 }
 0x119   :  { %v608_v20 = vadd.f32 %v607_v47, %v606_v22  ;;  %v856_v47 = vstv %s855_s22 }
 0x11a   :  { %v604_v37 = vmul.f32 0.5, %v601_v25  ;;  %vm5844_vm2 = vcmp.eq.s32.totalorder %v856_v47, 1  ;;  %v6118_v47 = vld [vmem:[%s8632_s3 + $0xb0] sm:$0xff] }
 0x11b   :  { %4836 = vtanh.f32 %v608_v20  ;;  %v5759_v39 = vsel %vm5753_vm1, %v608_v20, %v51_v26  ;;  %v8927_v42 = vsel %vm5844_vm2, 4294967295, %v8926_v42 }
 0x128   :  { %v4837_v30 = vpop.eup %4836 }
 0x129   :  { %v610_v40 = vmul.f32 %v4837_v30, %v604_v37 }
 0x12b   :  { %v5764_v33 = vsel %vm5753_vm1, %v610_v40, %v5347_v46  ;;  %v8916_v46 = vld [vmem:[#allocation17_spill] sm:$0xff] }
 0x12c   :  { %8897 = vst [vmem:[#allocation58_spill] sm:$0xff] %v5764_v33  ;;  %754 = vmatmul.mubr.f32.vlgmr.msra.gmra.mxu0 %v5764_v33  ;;  %825 = vmatmul.mubr.f32.vlgmr.msra.gmra.mxu1 %v5764_v33 }
 0x12d   :  { %934 = vmatpush1.msra.mxu0 %v5083_v5  ;;  %1005 = vmatpush1.msra.mxu1 %v5358_v48  ;;  %v8898_v5 = vld [vmem:[#allocation6_spill] sm:$0xff] }
 0x12e   :  { %935 = vmatprep.subr.mxu0 %v5088_v6  ;;  %1006 = vmatprep.subr.mxu1 %v5365_v49  ;;  %v8899_v6 = vld [vmem:[#allocation7_spill] sm:$0xff]  ;;  %v8917_v48 = vld [vmem:[#allocation26_spill] sm:$0xff] }
 0x12f   :  { %936 = vmatpush1.msra.mxu0 %v5095_v7  ;;  %1007 = vmatpush1.msra.mxu1 %v5373_v50  ;;  %v8900_v7 = vld [vmem:[#allocation8_spill] sm:$0xff]  ;;  %v8918_v49 = vld [vmem:[#allocation18_spill] sm:$0xff]  ;;  %v8919_v50 = vmov 0.0   ;;  %8928 = vst [vmem:[#allocation7_spill] sm:$0xff] %v8927_v42 }
 0x130   :  { %937 = vmatprep.subr.mxu0 %v5107_v9  ;;  %1008 = vmatprep.subr.mxu1 %v5379_v51  ;;  %v8901_v9 = vld [vmem:[#allocation9_spill] sm:$0xff]  ;;  %v8920_v51 = vld [vmem:[#allocation27_spill] sm:$0xff]  ;;  %v6166_v42 = vld [vmem:[%s8632_s3 + $0x70] sm:$0xff] }
 0x131   :  { %938 = vmatpush1.msra.mxu0 %v5113_v10  ;;  %1009 = vmatpush1.msra.mxu1 %v5386_v52  ;;  %v8902_v10 = vld [vmem:[#allocation10_spill] sm:$0xff]  ;;  %v5832_v52 = vpop.f32.mrf.mxu0 }
 0x132   :  { %939 = vmatprep.subr.mxu0 %v5119_v11  ;;  %1010 = vmatprep.subr.mxu1 %v5393_v53  ;;  %v8903_v11 = vld [vmem:[#allocation19_spill] sm:$0xff]  ;;  %8921 = vst [vmem:[#allocation6_spill] sm:$0xff] %v5832_v52  ;;  %v8922_v53 = vld [vmem:[#allocation41_spill] sm:$0xff] }
 0x133   :  { %940 = vmatpush1.msra.mxu0 %v5127_v12  ;;  %1011 = vmatpush1.msra.mxu1 %v5401_v54  ;;  %v8904_v12 = vld [vmem:[#allocation11_spill] sm:$0xff]  ;;  %v189_v54 = vadd.f32 %v8922_v53, %v5702_v32  ;;  %v5973_v53 = vld [vmem:[%s8632_s3 + $0x160] sm:$0xff]  ;;  %v6178_v52 = vld [vmem:[%s8632_s3 + $0x58] sm:$0xff] }
 0x134   :  { %941 = vmatprep.subr.mxu0 %v5139_v14  ;;  %1012 = vmatprep.subr.mxu1 %v5408_v55  ;;  %v8905_v14 = vld [vmem:[#allocation20_spill] sm:$0xff] }
 0x135   :  { %942 = vmatpush1.msra.mxu0 %v5145_v15  ;;  %1013 = vmatpush1.msra.mxu1 %v5415_v56  ;;  %v8906_v15 = vld [vmem:[#allocation12_spill] sm:$0xff] }
 0x136   :  { %943 = vmatprep.subr.mxu0 %v5151_v16  ;;  %1014 = vmatprep.subr.mxu1 %v5422_v57  ;;  %v8907_v16 = vld [vmem:[#allocation21_spill] sm:$0xff]  ;;  %v8923_v57 = vld [vmem:[#allocation44_spill] sm:$0xff]  ;;  %8935 = vst [vmem:[#allocation12_spill] sm:$0xff] %v6166_v42 }
 0x137   :  { %944 = vmatpush1.msra.mxu0 %v5159_v17  ;;  %1015 = vmatpush1.msra.mxu1 %v5429_v58  ;;  %v8908_v17 = vld [vmem:[#allocation13_spill] sm:$0xff]  ;;  %v191_v58 = vadd.f32 %v8923_v57, %v5706_v43  ;;  %v5997_v57 = vld [vmem:[%s8632_s3 + $0x140] sm:$0xff]  ;;  %8936 = vst [vmem:[#allocation21_spill] sm:$0xff] %v6173_v31 }
 0x138   :  { %945 = vmatprep.subr.mxu0 %v5171_v19  ;;  %1016 = vmatprep.subr.mxu1 %v5436_v59  ;;  %v8909_v19 = vld [vmem:[#allocation22_spill] sm:$0xff]  ;;  %8937 = vst [vmem:[#allocation13_spill] sm:$0xff] %v6178_v52 }
 0x139   :  { %946 = vmatpush1.msra.mxu0 %v5180_v21  ;;  %1017 = vmatpush1.msra.mxu1 %v5444_v60  ;;  %v8910_v21 = vld [vmem:[#allocation14_spill] sm:$0xff] }
 0x13a   :  { %947 = vmatprep.subr.mxu0 %v5189_v23  ;;  %1018 = vmatprep.subr.mxu1 %v5451_v61  ;;  %v8911_v23 = vld [vmem:[#allocation23_spill] sm:$0xff]  ;;  %v6185_v43 = vld [vmem:[%s8632_s3 + $0x40] sm:$0xff] }
 0x13b   :  { %948 = vmatpush1.msra.mxu0 %v5197_v24  ;;  %1019 = vmatpush1.msra.mxu1 %v5458_v62  ;;  %v8912_v24 = vld [vmem:[#allocation15_spill] sm:$0xff]  ;;  %8938 = vst [vmem:[#allocation22_spill] sm:$0xff] %v6185_v43  ;;  %8940 = vst [vmem:[#allocation23_spill] sm:$0xff] %v6197_v41 }
 0x13c   :  { %949 = vmatprep.subr.mxu0 %v5212_v27  ;;  %1020 = vmatprep.subr.mxu1 %v5465_v63  ;;  %v8913_v27 = vld [vmem:[#allocation24_spill] sm:$0xff]  ;;  %8941 = vst [vmem:[#allocation15_spill] sm:$0xff] %v6202_v35 }
 0x13d   :  { %950 = vmatpush1.msra.mxu0 %v5221_v28  ;;  %1021 = vmatpush1.msra.mxu1 %v5472_v0  ;;  %v8914_v28 = vld [vmem:[#allocation16_spill] sm:$0xff]  ;;  %8942 = vst [vmem:[#allocation24_spill] sm:$0xff] %v6209_v4 }
 0x13e   :  { %951 = vmatprep.subr.mxu0 %v8898_v5  ;;  %1022 = vmatprep.subr.mxu1 %v5479_v1  ;;  %v8924_v1 = vld [vmem:[#allocation30_spill] sm:$0xff]  ;;  %8943 = vst [vmem:[#allocation16_spill] sm:$0xff] %v6214_v2 }
 0x13f   :  { %952 = vmatpush1.msra.mxu0 %v8899_v6  ;;  %1023 = vmatpush1.msra.mxu1 %v5487_v3 }
 0x140   :  { %953 = vmatprep.subr.mxu0 %v8900_v7  ;;  %1024 = vmatprep.subr.mxu1 %v5494_v8  ;;  %v8925_v8 = vld [vmem:[#allocation29_spill] sm:$0xff] }
 0x141   :  { %954 = vmatpush1.msra.mxu0 %v8901_v9  ;;  %1025 = vmatpush1.msra.mxu1 %v5501_v13 }
 0x142   :  { %955 = vmatprep.subr.mxu0 %v5262_v34  ;;  %1026 = vmatprep.subr.mxu1 %v5508_v18  ;;  %v8915_v34 = vld [vmem:[#allocation25_spill] sm:$0xff] }
 0x143   :  { %956 = vmatpush1.msra.mxu0 %v8902_v10  ;;  %1027 = vmatpush1.msra.mxu1 %v8903_v11  ;;  %v5870_v11 = vld [vmem:[%s8632_s3 + $0x1f8] sm:$0xff]  ;;  %8944 = vst [vmem:[#allocation25_spill] sm:$0xff] %v6221_v38 }
 0x144   :  { %957 = vmatprep.subr.mxu0 %v8904_v12  ;;  %1028 = vmatprep.subr.mxu1 %v8905_v14  ;;  %8931 = vst [vmem:[#allocation10_spill] sm:$0xff] %v5870_v11  ;;  %v5877_v12 = vld [vmem:[%s8632_s3 + $0x1e0] sm:$0xff]  ;;  %v5882_v14 = vld [vmem:[%s8632_s3 + $0x1f0] sm:$0xff] }
 0x145   :  { %958 = vmatpush1.msra.mxu0 %v8906_v15  ;;  %1029 = vmatpush1.msra.mxu1 %v8907_v16  ;;  %v5889_v15 = vld [vmem:[%s8632_s3 + $0x1c8] sm:$0xff]  ;;  %v5894_v16 = vld [vmem:[%s8632_s3 + $0x1d8] sm:$0xff] }
 0x146   :  { %959 = vmatprep.subr.mxu0 %v8908_v17  ;;  %1030 = vmatprep.subr.mxu1 %v8909_v19  ;;  %v5901_v17 = vld [vmem:[%s8632_s3 + $0x1c0] sm:$0xff]  ;;  %v5906_v19 = vld [vmem:[%s8632_s3 + $0x1d0] sm:$0xff] }
 0x147   :  { %960 = vmatpush1.msra.mxu0 %v8910_v21  ;;  %1031 = vmatpush1.msra.mxu1 %v8911_v23  ;;  %v5913_v21 = vld [vmem:[%s8632_s3 + $0x1a8] sm:$0xff]  ;;  %v5918_v23 = vld [vmem:[%s8632_s3 + $0x1b8] sm:$0xff] }
 0x148   :  { %961 = vmatprep.subr.mxu0 %v8912_v24  ;;  %1032 = vmatprep.subr.mxu1 %v8913_v27  ;;  %v5925_v24 = vld [vmem:[%s8632_s3 + $0x1a0] sm:$0xff]  ;;  %v5930_v27 = vld [vmem:[%s8632_s3 + $0x1b0] sm:$0xff] }
 0x149   :  { %962 = vmatpush1.msra.mxu0 %v8914_v28  ;;  %1033 = vmatpush1.msra.mxu1 %v8915_v34  ;;  %v5937_v28 = vld [vmem:[%s8632_s3 + $0x188] sm:$0xff]  ;;  %v5942_v34 = vld [vmem:[%s8632_s3 + $0x198] sm:$0xff] }
 0x14a   :  { %963 = vmatprep.subr.mxu0 %v8916_v46  ;;  %1034 = vmatprep.subr.mxu1 %v8917_v48  ;;  %v5949_v46 = vld [vmem:[%s8632_s3 + $0x180] sm:$0xff]  ;;  %v5954_v48 = vld [vmem:[%s8632_s3 + $0x190] sm:$0xff] }
 0x14b   :  { %964 = vmatpush1.msra.mxu0 %v8918_v49  ;;  %997 = vmatprep.mubr.f32.mxu0 %v8919_v50  ;;  %v5961_v49 = vld [vmem:[%s8632_s3 + $0x168] sm:$0xff] }
 0x14c   :  { %1035 = vmatpush1.msra.mxu1 %v8920_v51  ;;  %1068 = vmatprep.mubr.f32.mxu1 %v8919_v50  ;;  %v5966_v51 = vld [vmem:[%s8632_s3 + $0x178] sm:$0xff] }
 0x14d   :  { %1248 = vmatprep.subr.mxu1 %v5870_v11 }
 0x1ec   :  { %v755_v55 = vpop.f32.mrf.mxu0  ;;  %v826_v56 = vpop.f32.mrf.mxu1 }
 0x1ed   :  { %v831_v59 = vadd.f32 %v755_v55, %v189_v54  ;;  %v833_v13 = vadd.f32 %v826_v56, %v8925_v8  ;;  %v5978_v54 = vld [vmem:[%s8632_s3 + $0x170] sm:$0xff]  ;;  %v5985_v55 = vld [vmem:[%s8632_s3 + $0x148] sm:$0xff]  ;;  %v5990_v56 = vld [vmem:[%s8632_s3 + $0x158] sm:$0xff] }
 0x1ee   :  { %v757_v60 = vpop.f32.mrf.mxu0  ;;  %v828_v61 = vpop.f32.mrf.mxu1  ;;  %v6055_v8 = vld [vmem:[%s8632_s3 + $0xe8] sm:$0xff] }
 0x1ef   :  { %v835_v62 = vmul.f32 0.5, %v831_v59  ;;  %v832_v63 = vadd.f32 %v757_v60, %v191_v58  ;;  %v834_v3 = vadd.f32 %v828_v61, %v8924_v1  ;;  %v837_v18 = vmul.f32 0.5, %v833_v13  ;;  %v6002_v58 = vld [vmem:[%s8632_s3 + $0x150] sm:$0xff]  ;;  %v6009_v59 = vld [vmem:[%s8632_s3 + $0x128] sm:$0xff]  ;;  %v6014_v60 = vld [vmem:[%s8632_s3 + $0x138] sm:$0xff] }
 0x1f0   :  { %v6021_v61 = vld [vmem:[%s8632_s3 + $0x120] sm:$0xff]  ;;  %v6060_v13 = vld [vmem:[%s8632_s3 + $0xf8] sm:$0xff] }
 0x1f1   :  { %4838 = vtanh.f32 %v835_v62  ;;  %v836_v0 = vmul.f32 0.5, %v832_v63  ;;  %v6026_v62 = vld [vmem:[%s8632_s3 + $0x130] sm:$0xff]  ;;  %v6031_v63 = vld [vmem:[%s8632_s3 + $0x108] sm:$0xff]  ;;  %v6043_v1 = vld [vmem:[%s8632_s3 + $0x100] sm:$0xff] }
 0x1f3   :  { %4840 = vtanh.f32 %v836_v0  ;;  %v6038_v0 = vld [vmem:[%s8632_s3 + $0x118] sm:$0xff] }
 0x1f4   :  { %4842 = vtanh.f32 %v834_v3  ;;  %v6048_v3 = vld [vmem:[%s8632_s3 + $0x110] sm:$0xff] }
 0x1f5   :  { %4844 = vtanh.f32 %v837_v18  ;;  %v6065_v18 = vld [vmem:[%s8632_s3 + $0xe0] sm:$0xff] }
 0x1fe   :  { %v4839_v32 = vpop.eup %4838 }
 0x1ff   :  { %v841_v40 = vadd.f32 1.0, %v4839_v32  ;;  %v6072_v32 = vld [vmem:[%s8632_s3 + $0xf0] sm:$0xff] }
 0x200   :  { %v4841_v36 = vpop.eup %4840 }
 0x201   :  { %v844_v26 = vmul.f32 0.5, %v841_v40  ;;  %v842_v45 = vadd.f32 1.0, %v4841_v36  ;;  %v4843_v29 = vpop.eup %4842  ;;  %v6077_v40 = vld [vmem:[%s8632_s3 + $0xc8] sm:$0xff]  ;;  %v6082_v36 = vld [vmem:[%s8632_s3 + $0xd8] sm:$0xff] }
 0x202   :  { %v4845_v30 = vpop.eup %4844 }
 0x203   :  { %v845_v44 = vmul.f32 0.5, %v842_v45  ;;  %v849_v22 = vmul.f32 %v4843_v29, %v844_v26  ;;  %v843_v5 = vadd.f32 1.0, %v4845_v30  ;;  %v6089_v26 = vld [vmem:[%s8632_s3 + $0xc0] sm:$0xff]  ;;  %v6094_v45 = vld [vmem:[%s8632_s3 + $0xd0] sm:$0xff]  ;;  %v6101_v29 = vld [vmem:[%s8632_s3 + $0xa8] sm:$0xff] }
 0x204   :  { %v6137_v30 = vld [vmem:[%s8632_s3 + $0x80] sm:$0xff] }
 0x205   :  { %v848_v20 = vmul.f32 %v845_v44, %v5759_v39  ;;  %v846_v6 = vmul.f32 0.5, %v843_v5  ;;  %v6106_v44 = vld [vmem:[%s8632_s3 + $0xb8] sm:$0xff]  ;;  %v6142_v5 = vld [vmem:[%s8632_s3 + $0x90] sm:$0xff] }
 0x207   :  { %v850_v25 = vadd.f32 %v849_v22, %v848_v20  ;;  %v6113_v22 = vld [vmem:[%s8632_s3 + $0xa0] sm:$0xff]  ;;  %v6125_v20 = vld [vmem:[%s8632_s3 + $0x88] sm:$0xff] }
 0x209   :  { %4846 = vtanh.f32 %v850_v25  ;;  %v5851_v37 = vsel %vm5844_vm2, %v850_v25, %v5759_v39  ;;  %v5865_v39 = vld [vmem:[%s8632_s3 + $0x1e8] sm:$0xff]  ;;  %v6130_v25 = vld [vmem:[%s8632_s3 + $0x98] sm:$0xff] }
 0x20a   :  { %8930 = vst [vmem:[#allocation9_spill] sm:$0xff] %v5865_v39  ;;  %1177 = vmatprep.subr.mxu0 %v5865_v39 }
 0x216   :  { %v4847_v7 = vpop.eup %4846 }
 0x217   :  { %v852_v9 = vmul.f32 %v4847_v7, %v846_v6  ;;  %v6149_v6 = vld [vmem:[%s8632_s3 + $0x68] sm:$0xff]  ;;  %v6154_v7 = vld [vmem:[%s8632_s3 + $0x78] sm:$0xff] }
 0x218   :  { %8932 = vst [vmem:[#allocation19_spill] sm:$0xff] %v6149_v6  ;;  %8933 = vst [vmem:[#allocation11_spill] sm:$0xff] %v6154_v7 }
 0x219   :  { %v5856_v10 = vsel %vm5844_vm2, %v852_v9, %v5764_v33  ;;  %v6161_v9 = vld [vmem:[%s8632_s3 + $0x60] sm:$0xff]  ;;  %v6190_v33 = vld [vmem:[%s8632_s3 + $0x50] sm:$0xff] }
 0x21a   :  { %8929 = vst [vmem:[#allocation8_spill] sm:$0xff] %v5856_v10  ;;  %998 = vmatmul.mubr.f32.vlgmr.msra.gmra.mxu0 %v5856_v10  ;;  %1069 = vmatmul.mubr.f32.vlgmr.msra.gmra.mxu1 %v5856_v10  ;;  %8934 = vst [vmem:[#allocation20_spill] sm:$0xff] %v6161_v9 }
 0x21b   :  { %1241 = vmatprep.mubr.f32.mxu0 %v8919_v50  ;;  %1312 = vmatprep.mubr.f32.mxu1 %v8919_v50  ;;  %8939 = vst [vmem:[#allocation14_spill] sm:$0xff] %v6190_v33  ;;  %v6226_v50 = vld [vmem:[%s8632_s3 + $0x18] sm:$0xff] }
 0x21c   :  { %1178 = vmatpush1.msra.mxu0 %v5877_v12  ;;  %1249 = vmatpush1.msra.mxu1 %v5882_v14  ;;  %8945 = vst [vmem:[#allocation17_spill] sm:$0xff] %v6226_v50 }
 0x21d   :  { %1179 = vmatprep.subr.mxu0 %v5889_v15  ;;  %1250 = vmatprep.subr.mxu1 %v5894_v16 }
 0x21e   :  { %1180 = vmatpush1.msra.mxu0 %v5901_v17  ;;  %1251 = vmatpush1.msra.mxu1 %v5906_v19 }
 0x21f   :  { %1181 = vmatprep.subr.mxu0 %v5913_v21  ;;  %1252 = vmatprep.subr.mxu1 %v5918_v23 }
 0x220   :  { %1182 = vmatpush1.msra.mxu0 %v5925_v24  ;;  %1253 = vmatpush1.msra.mxu1 %v5930_v27 }
 0x221   :  { %1183 = vmatprep.subr.mxu0 %v5937_v28  ;;  %1254 = vmatprep.subr.mxu1 %v5942_v34 }
 0x222   :  { %1184 = vmatpush1.msra.mxu0 %v5949_v46  ;;  %1255 = vmatpush1.msra.mxu1 %v5954_v48 }
 0x223   :  { %1185 = vmatprep.subr.mxu0 %v5961_v49  ;;  %1256 = vmatprep.subr.mxu1 %v5966_v51 }
 0x224   :  { %1186 = vmatpush1.msra.mxu0 %v5973_v53  ;;  %1257 = vmatpush1.msra.mxu1 %v5978_v54 }
 0x225   :  { %1187 = vmatprep.subr.mxu0 %v5985_v55  ;;  %1258 = vmatprep.subr.mxu1 %v5990_v56 }
 0x226   :  { %1188 = vmatpush1.msra.mxu0 %v5997_v57  ;;  %1259 = vmatpush1.msra.mxu1 %v6002_v58 }
 0x227   :  { %1189 = vmatprep.subr.mxu0 %v6009_v59  ;;  %1260 = vmatprep.subr.mxu1 %v6014_v60 }
 0x228   :  { %1190 = vmatpush1.msra.mxu0 %v6021_v61  ;;  %1261 = vmatpush1.msra.mxu1 %v6026_v62 }
 0x229   :  { %1191 = vmatprep.subr.mxu0 %v6031_v63  ;;  %1262 = vmatprep.subr.mxu1 %v6038_v0 }
 0x22a   :  { %1192 = vmatpush1.msra.mxu0 %v6043_v1  ;;  %1263 = vmatpush1.msra.mxu1 %v6048_v3 }
 0x22b   :  { %1193 = vmatprep.subr.mxu0 %v6055_v8  ;;  %1264 = vmatprep.subr.mxu1 %v6060_v13 }
 0x22c   :  { %1194 = vmatpush1.msra.mxu0 %v6065_v18  ;;  %1265 = vmatpush1.msra.mxu1 %v6072_v32 }
 0x22d   :  { %1195 = vmatprep.subr.mxu0 %v6077_v40  ;;  %1266 = vmatprep.subr.mxu1 %v6082_v36 }
 0x22e   :  { %1196 = vmatpush1.msra.mxu0 %v6089_v26  ;;  %1267 = vmatpush1.msra.mxu1 %v6094_v45 }
 0x22f   :  { %1197 = vmatprep.subr.mxu0 %v6101_v29  ;;  %1268 = vmatprep.subr.mxu1 %v6106_v44 }
 0x230   :  { %1198 = vmatpush1.msra.mxu0 %v6113_v22  ;;  %1269 = vmatpush1.msra.mxu1 %v6118_v47 }
 0x231   :  { %1199 = vmatprep.subr.mxu0 %v6125_v20  ;;  %1270 = vmatprep.subr.mxu1 %v6130_v25 }
 0x232   :  { %1200 = vmatpush1.msra.mxu0 %v6137_v30  ;;  %1271 = vmatpush1.msra.mxu1 %v6142_v5 }
 0x233   :  { %1201 = vmatprep.subr.mxu0 %v6149_v6  ;;  %1272 = vmatprep.subr.mxu1 %v6154_v7 }
 0x234   :  { %1202 = vmatpush1.msra.mxu0 %v6161_v9  ;;  %1273 = vmatpush1.msra.mxu1 %v6166_v42 }
 0x235   :  { %1203 = vmatprep.subr.mxu0 %v6173_v31  ;;  %1274 = vmatprep.subr.mxu1 %v6178_v52  ;;  %v8948_v52 = vld [vmem:[#allocation46_spill] sm:$0xff] }
 0x236   :  { %1204 = vmatpush1.msra.mxu0 %v6185_v43  ;;  %1275 = vmatpush1.msra.mxu1 %v6190_v33  ;;  %v6233_v43 = vld [vmem:[%s8632_s3] sm:$0xff]  ;;  %v6238_v33 = vld [vmem:[%s8632_s3 + $0x10] sm:$0xff] }
 0x237   :  { %1205 = vmatprep.subr.mxu0 %v6197_v41  ;;  %1276 = vmatprep.subr.mxu1 %v6202_v35  ;;  %8946 = vst [vmem:[#allocation26_spill] sm:$0xff] %v6233_v43  ;;  %8947 = vst [vmem:[#allocation18_spill] sm:$0xff] %v6238_v33 }
 0x238   :  { %1206 = vmatpush1.msra.mxu0 %v6209_v4  ;;  %1277 = vmatpush1.msra.mxu1 %v6214_v2  ;;  %v8949_v2 = vld [vmem:[#allocation47_spill] sm:$0xff] }
 0x239   :  { %1207 = vmatprep.subr.mxu0 %v6221_v38  ;;  %1278 = vmatprep.subr.mxu1 %v6226_v50  ;;  %v8950_v50 = vld [vmem:[#allocation32_spill] sm:$0xff] }
 0x23a   :  { %1208 = vmatpush1.msra.mxu0 %v6233_v43  ;;  %1279 = vmatpush1.msra.mxu1 %v6238_v33  ;;  %v8951_v33 = vld [vmem:[#allocation31_spill] sm:$0xff] }
 0x23b   :  { %1421 = vmatprep.subr.mxu0 %v5865_v39  ;;  %1492 = vmatprep.subr.mxu1 %v5870_v11 }
 0x2da   :  { %v999_v35 = vpop.f32.mrf.mxu0  ;;  %v1070_v41 = vpop.f32.mrf.mxu1 }
 0x2db   :  { %v1075_v31 = vadd.f32 %v999_v35, %v8948_v52  ;;  %v1077_v43 = vadd.f32 %v1070_v41, %v8951_v33  ;;  %v8952_v41 = vmov 0 }
 0x2dc   :  { %v1001_v42 = vpop.f32.mrf.mxu0  ;;  %v1072_v4 = vpop.f32.mrf.mxu1 }
 0x2dd   :  { %v1079_v9 = vmul.f32 0.5, %v1075_v31  ;;  %v1076_v7 = vadd.f32 %v1001_v42, %v8949_v2  ;;  %v1078_v6 = vadd.f32 %v1072_v4, %v8950_v50  ;;  %v1081_v11 = vmul.f32 0.5, %v1077_v43 }
 0x2de   :  { %v1100_v4 = vstv %s1099_s27 }
 0x2df   :  { %4848 = vtanh.f32 %v1079_v9  ;;  %v1080_v38 = vmul.f32 0.5, %v1076_v7  ;;  %vm6256_vm3 = vcmp.eq.s32.totalorder %v1100_v4, 1  ;;  %v8962_v4 = vld [vmem:[#allocation22_spill] sm:$0xff] }
 0x2e0   :  { %v8953_v41 = vsel %vm6256_vm3, 4294967295, %v8952_v41 }
 0x2e1   :  { %4850 = vtanh.f32 %v1080_v38  ;;  %8954 = vst [vmem:[#allocation27_spill] sm:$0xff] %v8953_v41  ;;  %v8970_v41 = vld [vmem:[#allocation26_spill] sm:$0xff] }
 0x2e2   :  { %4852 = vtanh.f32 %v1078_v6 }
 0x2e3   :  { %4854 = vtanh.f32 %v1081_v11 }
 0x2ec   :  { %v4849_v39 = vpop.eup %4848 }
 0x2ed   :  { %v1085_v35 = vadd.f32 1.0, %v4849_v39 }
 0x2ee   :  { %v4851_v52 = vpop.eup %4850 }
 0x2ef   :  { %v1088_v31 = vmul.f32 0.5, %v1085_v35  ;;  %v1086_v2 = vadd.f32 1.0, %v4851_v52  ;;  %v4853_v42 = vpop.eup %4852 }
 0x2f0   :  { %v4855_v50 = vpop.eup %4854 }
 0x2f1   :  { %v1089_v7 = vmul.f32 0.5, %v1086_v2  ;;  %v1093_v9 = vmul.f32 %v4853_v42, %v1088_v31  ;;  %v1087_v39 = vadd.f32 1.0, %v4855_v50  ;;  %v8957_v31 = vld [vmem:[#allocation11_spill] sm:$0xff]  ;;  %v8958_v2 = vld [vmem:[#allocation20_spill] sm:$0xff] }
 0x2f2   :  { %v8959_v42 = vld [vmem:[#allocation12_spill] sm:$0xff]  ;;  %v8965_v50 = vld [vmem:[#allocation15_spill] sm:$0xff] }
 0x2f3   :  { %v1092_v38 = vmul.f32 %v1089_v7, %v5851_v37  ;;  %v1090_v11 = vmul.f32 0.5, %v1087_v39  ;;  %v8960_v7 = vld [vmem:[#allocation21_spill] sm:$0xff]  ;;  %v8966_v39 = vld [vmem:[#allocation24_spill] sm:$0xff] }
 0x2f5   :  { %v1094_v33 = vadd.f32 %v1093_v9, %v1092_v38  ;;  %v8961_v9 = vld [vmem:[#allocation13_spill] sm:$0xff]  ;;  %v8963_v38 = vld [vmem:[#allocation14_spill] sm:$0xff] }
 0x2f7   :  { %4856 = vtanh.f32 %v1094_v33  ;;  %v6263_v43 = vsel %vm6256_vm3, %v1094_v33, %v5851_v37  ;;  %v8956_v37 = vld [vmem:[#allocation19_spill] sm:$0xff] }
 0x2f8   :  { %v8964_v33 = vld [vmem:[#allocation23_spill] sm:$0xff] }
 0x304   :  { %v4857_v6 = vpop.eup %4856 }
 0x305   :  { %v1096_v35 = vmul.f32 %v4857_v6, %v1090_v11  ;;  %v8967_v11 = vld [vmem:[#allocation16_spill] sm:$0xff]  ;;  %v8968_v6 = vld [vmem:[#allocation25_spill] sm:$0xff] }
 0x307   :  { %v6268_v52 = vsel %vm6256_vm3, %v1096_v35, %v5856_v10  ;;  %v8969_v35 = vld [vmem:[#allocation17_spill] sm:$0xff]  ;;  %v8971_v10 = vmov 0.0  }
 0x308   :  { %8955 = vst [vmem:[#allocation41_spill] sm:$0xff] %v6268_v52  ;;  %1242 = vmatmul.mubr.f32.vlgmr.msra.gmra.mxu0 %v6268_v52  ;;  %1313 = vmatmul.mubr.f32.vlgmr.msra.gmra.mxu1 %v6268_v52 }
 0x309   :  { %1422 = vmatpush1.msra.mxu0 %v5877_v12  ;;  %1493 = vmatpush1.msra.mxu1 %v5882_v14 }
 0x30a   :  { %1423 = vmatprep.subr.mxu0 %v5889_v15  ;;  %1494 = vmatprep.subr.mxu1 %v5894_v16 }
 0x30b   :  { %1424 = vmatpush1.msra.mxu0 %v5901_v17  ;;  %1495 = vmatpush1.msra.mxu1 %v5906_v19 }
 0x30c   :  { %1425 = vmatprep.subr.mxu0 %v5913_v21  ;;  %1496 = vmatprep.subr.mxu1 %v5918_v23 }
 0x30d   :  { %1426 = vmatpush1.msra.mxu0 %v5925_v24  ;;  %1497 = vmatpush1.msra.mxu1 %v5930_v27 }
 0x30e   :  { %1427 = vmatprep.subr.mxu0 %v5937_v28  ;;  %1498 = vmatprep.subr.mxu1 %v5942_v34 }
 0x30f   :  { %1428 = vmatpush1.msra.mxu0 %v5949_v46  ;;  %1499 = vmatpush1.msra.mxu1 %v5954_v48 }
 0x310   :  { %1429 = vmatprep.subr.mxu0 %v5961_v49  ;;  %1500 = vmatprep.subr.mxu1 %v5966_v51 }
 0x311   :  { %1430 = vmatpush1.msra.mxu0 %v5973_v53  ;;  %1501 = vmatpush1.msra.mxu1 %v5978_v54 }
 0x312   :  { %1431 = vmatprep.subr.mxu0 %v5985_v55  ;;  %1502 = vmatprep.subr.mxu1 %v5990_v56 }
 0x313   :  { %1432 = vmatpush1.msra.mxu0 %v5997_v57  ;;  %1503 = vmatpush1.msra.mxu1 %v6002_v58 }
 0x314   :  { %1433 = vmatprep.subr.mxu0 %v6009_v59  ;;  %1504 = vmatprep.subr.mxu1 %v6014_v60 }
 0x315   :  { %1434 = vmatpush1.msra.mxu0 %v6021_v61  ;;  %1505 = vmatpush1.msra.mxu1 %v6026_v62 }
 0x316   :  { %1435 = vmatprep.subr.mxu0 %v6031_v63  ;;  %1506 = vmatprep.subr.mxu1 %v6038_v0 }
 0x317   :  { %1436 = vmatpush1.msra.mxu0 %v6043_v1  ;;  %1507 = vmatpush1.msra.mxu1 %v6048_v3 }
 0x318   :  { %1437 = vmatprep.subr.mxu0 %v6055_v8  ;;  %1508 = vmatprep.subr.mxu1 %v6060_v13 }
 0x319   :  { %1438 = vmatpush1.msra.mxu0 %v6065_v18  ;;  %1509 = vmatpush1.msra.mxu1 %v6072_v32 }
 0x31a   :  { %1439 = vmatprep.subr.mxu0 %v6077_v40  ;;  %1510 = vmatprep.subr.mxu1 %v6082_v36 }
 0x31b   :  { %1440 = vmatpush1.msra.mxu0 %v6089_v26  ;;  %1511 = vmatpush1.msra.mxu1 %v6094_v45 }
 0x31c   :  { %1441 = vmatprep.subr.mxu0 %v6101_v29  ;;  %1512 = vmatprep.subr.mxu1 %v6106_v44 }
 0x31d   :  { %1442 = vmatpush1.msra.mxu0 %v6113_v22  ;;  %1513 = vmatpush1.msra.mxu1 %v6118_v47 }
 0x31e   :  { %1443 = vmatprep.subr.mxu0 %v6125_v20  ;;  %1514 = vmatprep.subr.mxu1 %v6130_v25 }
 0x31f   :  { %1444 = vmatpush1.msra.mxu0 %v6137_v30  ;;  %1515 = vmatpush1.msra.mxu1 %v6142_v5 }
 0x320   :  { %1445 = vmatprep.subr.mxu0 %v8956_v37  ;;  %1516 = vmatprep.subr.mxu1 %v8957_v31  ;;  %v8977_v31 = vld [vmem:[#allocation34_spill] sm:$0xff] }
 0x321   :  { %1446 = vmatpush1.msra.mxu0 %v8958_v2  ;;  %1517 = vmatpush1.msra.mxu1 %v8959_v42 }
 0x322   :  { %1447 = vmatprep.subr.mxu0 %v8960_v7  ;;  %1518 = vmatprep.subr.mxu1 %v8961_v9  ;;  %v8972_v9 = vld [vmem:[#allocation18_spill] sm:$0xff] }
 0x323   :  { %1448 = vmatpush1.msra.mxu0 %v8962_v4  ;;  %1519 = vmatpush1.msra.mxu1 %v8963_v38  ;;  %v8973_v38 = vld [vmem:[#allocation9_spill] sm:$0xff]  ;;  %v8975_v4 = vld [vmem:[#allocation48_spill] sm:$0xff] }
 0x324   :  { %1449 = vmatprep.subr.mxu0 %v8964_v33  ;;  %1520 = vmatprep.subr.mxu1 %v8965_v50  ;;  %v8974_v33 = vld [vmem:[#allocation10_spill] sm:$0xff] }
 0x325   :  { %1450 = vmatpush1.msra.mxu0 %v8966_v39  ;;  %1521 = vmatpush1.msra.mxu1 %v8967_v11 }
 0x326   :  { %1451 = vmatprep.subr.mxu0 %v8968_v6  ;;  %1522 = vmatprep.subr.mxu1 %v8969_v35  ;;  %v8976_v35 = vld [vmem:[#allocation49_spill] sm:$0xff] }
 0x327   :  { %1452 = vmatpush1.msra.mxu0 %v8970_v41  ;;  %1485 = vmatprep.mubr.f32.mxu0 %v8971_v10 }
 0x328   :  { %1523 = vmatpush1.msra.mxu1 %v8972_v9  ;;  %1556 = vmatprep.mubr.f32.mxu1 %v8971_v10  ;;  %v8978_v9 = vld [vmem:[#allocation33_spill] sm:$0xff] }
 0x329   :  { %1665 = vmatprep.subr.mxu0 %v8973_v38  ;;  %1736 = vmatprep.subr.mxu1 %v8974_v33 }
 0x3c8   :  { %v1243_v50 = vpop.f32.mrf.mxu0  ;;  %v1314_v39 = vpop.f32.mrf.mxu1 }
 0x3c9   :  { %v1319_v11 = vadd.f32 %v1243_v50, %v8975_v4  ;;  %v1321_v10 = vadd.f32 %v1314_v39, %v8978_v9 }
 0x3ca   :  { %v1245_v7 = vpop.f32.mrf.mxu0  ;;  %v1316_v6 = vpop.f32.mrf.mxu1 }
 0x3cb   :  { %v1323_v42 = vmul.f32 0.5, %v1319_v11  ;;  %v1320_v2 = vadd.f32 %v1245_v7, %v8976_v35  ;;  %v1322_v37 = vadd.f32 %v1316_v6, %v8977_v31  ;;  %v1325_v33 = vmul.f32 0.5, %v1321_v10 }
 0x3cc   :  { %v1344_v31 = vstv %s1343_s29  ;;  %s2319_s29 = scalar_select %p4753_p7, 1, 0 }
 0x3cd   :  { %4858 = vtanh.f32 %v1323_v42  ;;  %v1324_v41 = vmul.f32 0.5, %v1320_v2  ;;  %vm6346_vm4 = vcmp.eq.s32.totalorder %v1344_v31, 1  ;;  %v8988_v31 = vld [vmem:[#allocation22_spill] sm:$0xff] }
 0x3cf   :  { %4860 = vtanh.f32 %v1324_v41 }
 0x3d0   :  { %4862 = vtanh.f32 %v1322_v37  ;;  %v8979_v37 = vmov 0 }
 0x3d1   :  { %4864 = vtanh.f32 %v1325_v33  ;;  %v8980_v37 = vsel %vm6346_vm4, 4294967295, %v8979_v37 }
 0x3d2   :  { %8981 = vst [vmem:[#allocation44_spill] sm:$0xff] %v8980_v37  ;;  %v8996_v37 = vld [vmem:[#allocation26_spill] sm:$0xff] }
 0x3da   :  { %v4859_v38 = vpop.eup %4858 }
 0x3db   :  { %v1329_v4 = vadd.f32 1.0, %v4859_v38 }
 0x3dc   :  { %v4861_v50 = vpop.eup %4860 }
 0x3dd   :  { %v1332_v11 = vmul.f32 0.5, %v1329_v4  ;;  %v1330_v7 = vadd.f32 1.0, %v4861_v50  ;;  %v4863_v42 = vpop.eup %4862 }
 0x3de   :  { %v4865_v38 = vpop.eup %4864 }
 0x3df   :  { %v1333_v2 = vmul.f32 0.5, %v1330_v7  ;;  %v1337_v35 = vmul.f32 %v4863_v42, %v1332_v11  ;;  %v1331_v33 = vadd.f32 1.0, %v4865_v38  ;;  %v8983_v11 = vld [vmem:[#allocation11_spill] sm:$0xff]  ;;  %v8984_v7 = vld [vmem:[#allocation20_spill] sm:$0xff] }
 0x3e0   :  { %v8985_v42 = vld [vmem:[#allocation12_spill] sm:$0xff]  ;;  %v8991_v38 = vld [vmem:[#allocation15_spill] sm:$0xff] }
 0x3e1   :  { %v1336_v41 = vmul.f32 %v1333_v2, %v6263_v43  ;;  %v1334_v39 = vmul.f32 0.5, %v1331_v33  ;;  %v8986_v2 = vld [vmem:[#allocation21_spill] sm:$0xff]  ;;  %v8992_v33 = vld [vmem:[#allocation24_spill] sm:$0xff] }
 0x3e3   :  { %v1338_v9 = vadd.f32 %v1337_v35, %v1336_v41  ;;  %v8987_v35 = vld [vmem:[#allocation13_spill] sm:$0xff]  ;;  %v8989_v41 = vld [vmem:[#allocation14_spill] sm:$0xff] }
 0x3e5   :  { %4866 = vtanh.f32 %v1338_v9  ;;  %v6353_v10 = vsel %vm6346_vm4, %v1338_v9, %v6263_v43  ;;  %v8982_v43 = vld [vmem:[#allocation19_spill] sm:$0xff] }
 0x3e6   :  { %v8990_v9 = vld [vmem:[#allocation23_spill] sm:$0xff] }
 0x3f2   :  { %v4867_v6 = vpop.eup %4866 }
 0x3f3   :  { %v1340_v4 = vmul.f32 %v4867_v6, %v1334_v39  ;;  %v8993_v39 = vld [vmem:[#allocation16_spill] sm:$0xff]  ;;  %v8994_v6 = vld [vmem:[#allocation25_spill] sm:$0xff] }
 0x3f5   :  { %v6358_v50 = vsel %vm6346_vm4, %v1340_v4, %v6268_v52  ;;  %v8995_v4 = vld [vmem:[#allocation17_spill] sm:$0xff]  ;;  %v8997_v52 = vmov 0.0  }
 0x3f6   :  { %1486 = vmatmul.mubr.f32.vlgmr.msra.gmra.mxu0 %v6358_v50  ;;  %1557 = vmatmul.mubr.f32.vlgmr.msra.gmra.mxu1 %v6358_v50 }
 0x3f7   :  { %1666 = vmatpush1.msra.mxu0 %v5877_v12  ;;  %1737 = vmatpush1.msra.mxu1 %v5882_v14 }
 0x3f8   :  { %1667 = vmatprep.subr.mxu0 %v5889_v15  ;;  %1738 = vmatprep.subr.mxu1 %v5894_v16 }
 0x3f9   :  { %1668 = vmatpush1.msra.mxu0 %v5901_v17  ;;  %1739 = vmatpush1.msra.mxu1 %v5906_v19 }
 0x3fa   :  { %1669 = vmatprep.subr.mxu0 %v5913_v21  ;;  %1740 = vmatprep.subr.mxu1 %v5918_v23 }
 0x3fb   :  { %1670 = vmatpush1.msra.mxu0 %v5925_v24  ;;  %1741 = vmatpush1.msra.mxu1 %v5930_v27 }
 0x3fc   :  { %1671 = vmatprep.subr.mxu0 %v5937_v28  ;;  %1742 = vmatprep.subr.mxu1 %v5942_v34 }
 0x3fd   :  { %1672 = vmatpush1.msra.mxu0 %v5949_v46  ;;  %1743 = vmatpush1.msra.mxu1 %v5954_v48 }
 0x3fe   :  { %1673 = vmatprep.subr.mxu0 %v5961_v49  ;;  %1744 = vmatprep.subr.mxu1 %v5966_v51 }
 0x3ff   :  { %1674 = vmatpush1.msra.mxu0 %v5973_v53  ;;  %1745 = vmatpush1.msra.mxu1 %v5978_v54 }
 0x400   :  { %1675 = vmatprep.subr.mxu0 %v5985_v55  ;;  %1746 = vmatprep.subr.mxu1 %v5990_v56 }
 0x401   :  { %1676 = vmatpush1.msra.mxu0 %v5997_v57  ;;  %1747 = vmatpush1.msra.mxu1 %v6002_v58 }
 0x402   :  { %1677 = vmatprep.subr.mxu0 %v6009_v59  ;;  %1748 = vmatprep.subr.mxu1 %v6014_v60 }
 0x403   :  { %1678 = vmatpush1.msra.mxu0 %v6021_v61  ;;  %1749 = vmatpush1.msra.mxu1 %v6026_v62 }
 0x404   :  { %1679 = vmatprep.subr.mxu0 %v6031_v63  ;;  %1750 = vmatprep.subr.mxu1 %v6038_v0 }
 0x405   :  { %1680 = vmatpush1.msra.mxu0 %v6043_v1  ;;  %1751 = vmatpush1.msra.mxu1 %v6048_v3 }
 0x406   :  { %1681 = vmatprep.subr.mxu0 %v6055_v8  ;;  %1752 = vmatprep.subr.mxu1 %v6060_v13 }
 0x407   :  { %1682 = vmatpush1.msra.mxu0 %v6065_v18  ;;  %1753 = vmatpush1.msra.mxu1 %v6072_v32 }
 0x408   :  { %1683 = vmatprep.subr.mxu0 %v6077_v40  ;;  %1754 = vmatprep.subr.mxu1 %v6082_v36 }
 0x409   :  { %1684 = vmatpush1.msra.mxu0 %v6089_v26  ;;  %1755 = vmatpush1.msra.mxu1 %v6094_v45 }
 0x40a   :  { %1685 = vmatprep.subr.mxu0 %v6101_v29  ;;  %1756 = vmatprep.subr.mxu1 %v6106_v44 }
 0x40b   :  { %1686 = vmatpush1.msra.mxu0 %v6113_v22  ;;  %1757 = vmatpush1.msra.mxu1 %v6118_v47 }
 0x40c   :  { %1687 = vmatprep.subr.mxu0 %v6125_v20  ;;  %1758 = vmatprep.subr.mxu1 %v6130_v25 }
 0x40d   :  { %1688 = vmatpush1.msra.mxu0 %v6137_v30  ;;  %1759 = vmatpush1.msra.mxu1 %v6142_v5 }
 0x40e   :  { %1689 = vmatprep.subr.mxu0 %v8982_v43  ;;  %1760 = vmatprep.subr.mxu1 %v8983_v11  ;;  %v9003_v11 = vld [vmem:[#allocation36_spill] sm:$0xff] }
 0x40f   :  { %1690 = vmatpush1.msra.mxu0 %v8984_v7  ;;  %1761 = vmatpush1.msra.mxu1 %v8985_v42 }
 0x410   :  { %1691 = vmatprep.subr.mxu0 %v8986_v2  ;;  %1762 = vmatprep.subr.mxu1 %v8987_v35  ;;  %v8998_v35 = vld [vmem:[#allocation18_spill] sm:$0xff] }
 0x411   :  { %1692 = vmatpush1.msra.mxu0 %v8988_v31  ;;  %1763 = vmatpush1.msra.mxu1 %v8989_v41  ;;  %v8999_v41 = vld [vmem:[#allocation9_spill] sm:$0xff]  ;;  %v9001_v31 = vld [vmem:[#allocation50_spill] sm:$0xff] }
 0x412   :  { %1693 = vmatprep.subr.mxu0 %v8990_v9  ;;  %1764 = vmatprep.subr.mxu1 %v8991_v38  ;;  %v9000_v9 = vld [vmem:[#allocation10_spill] sm:$0xff] }
 0x413   :  { %1694 = vmatpush1.msra.mxu0 %v8992_v33  ;;  %1765 = vmatpush1.msra.mxu1 %v8993_v39 }
 0x414   :  { %1695 = vmatprep.subr.mxu0 %v8994_v6  ;;  %1766 = vmatprep.subr.mxu1 %v8995_v4  ;;  %v9002_v4 = vld [vmem:[#allocation51_spill] sm:$0xff] }
 0x415   :  { %1696 = vmatpush1.msra.mxu0 %v8996_v37  ;;  %1729 = vmatprep.mubr.f32.mxu0 %v8997_v52 }
 0x416   :  { %1767 = vmatpush1.msra.mxu1 %v8998_v35  ;;  %1800 = vmatprep.mubr.f32.mxu1 %v8997_v52  ;;  %v9004_v35 = vld [vmem:[#allocation35_spill] sm:$0xff] }
 0x417   :  { %1909 = vmatprep.subr.mxu0 %v8999_v41  ;;  %1980 = vmatprep.subr.mxu1 %v9000_v9 }
 0x4b6   :  { %v1487_v38 = vpop.f32.mrf.mxu0  ;;  %v1558_v33 = vpop.f32.mrf.mxu1 }
 0x4b7   :  { %v1563_v39 = vadd.f32 %v1487_v38, %v9001_v31  ;;  %v1565_v52 = vadd.f32 %v1558_v33, %v9004_v35 }
 0x4b8   :  { %v1489_v2 = vpop.f32.mrf.mxu0  ;;  %v1560_v6 = vpop.f32.mrf.mxu1 }
 0x4b9   :  { %v1567_v42 = vmul.f32 0.5, %v1563_v39  ;;  %v1564_v7 = vadd.f32 %v1489_v2, %v9002_v4  ;;  %v1566_v43 = vadd.f32 %v1560_v6, %v9003_v11  ;;  %v1569_v41 = vmul.f32 0.5, %v1565_v52 }
 0x4ba   :  { %v1588_v11 = vstv %s1587_s15 }
 0x4bb   :  { %4868 = vtanh.f32 %v1567_v42  ;;  %v1568_v37 = vmul.f32 0.5, %v1564_v7  ;;  %vm6436_vm5 = vcmp.eq.s32.totalorder %v1588_v11, 1  ;;  %v2152_v11 = vld [vmem:[%s8632_s3 + $0x1f8] sm:$0xff] }
 0x4bd   :  { %4870 = vtanh.f32 %v1568_v37 }
 0x4be   :  { %4872 = vtanh.f32 %v1566_v43  ;;  %v9005_v43 = vmov 0 }
 0x4bf   :  { %4874 = vtanh.f32 %v1569_v41  ;;  %v9006_v43 = vsel %vm6436_vm5, 4294967295, %v9005_v43 }
 0x4c0   :  { %9007 = vst [vmem:[#allocation30_spill] sm:$0xff] %v9006_v43  ;;  %v7342_v43 = vld [vmem:[%s8640_s6 + $0x8] sm:$0xff] }
 0x4c8   :  { %v4869_v9 = vpop.eup %4868 }
 0x4c9   :  { %v1573_v31 = vadd.f32 1.0, %v4869_v9 }
 0x4ca   :  { %v4871_v38 = vpop.eup %4870 }
 0x4cb   :  { %v1576_v39 = vmul.f32 0.5, %v1573_v31  ;;  %v1574_v2 = vadd.f32 1.0, %v4871_v38  ;;  %v4873_v42 = vpop.eup %4872 }
 0x4cc   :  { %v4875_v33 = vpop.eup %4874 }
 0x4cd   :  { %v1577_v7 = vmul.f32 0.5, %v1574_v2  ;;  %v1581_v4 = vmul.f32 %v4873_v42, %v1576_v39  ;;  %v1575_v6 = vadd.f32 1.0, %v4875_v33  ;;  %v2148_v33 = vld [vmem:[%s8632_s3 + $0x1d8] sm:$0xff] }
 0x4cf   :  { %v1580_v37 = vmul.f32 %v1577_v7, %v6353_v10  ;;  %v1578_v41 = vmul.f32 0.5, %v1575_v6  ;;  %v2145_v6 = vld [vmem:[%s8632_s3 + $0x1c0] sm:$0xff] }
 0x4d1   :  { %v1582_v35 = vadd.f32 %v1581_v4, %v1580_v37  ;;  %v2150_v4 = vld [vmem:[%s8632_s3 + $0x1e8] sm:$0xff]  ;;  %v2149_v37 = vld [vmem:[%s8632_s3 + $0x1e0] sm:$0xff] }
 0x4d3   :  { %4876 = vtanh.f32 %v1582_v35  ;;  %v6443_v52 = vsel %vm6436_vm5, %v1582_v35, %v6353_v10  ;;  %v2151_v35 = vld [vmem:[%s8632_s3 + $0x1f0] sm:$0xff] }
 0x4e0   :  { %v4877_v9 = vpop.eup %4876 }
 0x4e1   :  { %v1584_v31 = vmul.f32 %v4877_v9, %v1578_v41  ;;  %v2147_v41 = vld [vmem:[%s8632_s3 + $0x1d0] sm:$0xff]  ;;  %v2142_v9 = vld [vmem:[%s8632_s3 + $0x1a8] sm:$0xff] }
 0x4e3   :  { %v6448_v38 = vsel %vm6436_vm5, %v1584_v31, %v6358_v50  ;;  %v2144_v31 = vld [vmem:[%s8632_s3 + $0x1b8] sm:$0xff] }
 0x4e4   :  { %1730 = vmatmul.mubr.f32.vlgmr.msra.gmra.mxu0 %v6448_v38  ;;  %1801 = vmatmul.mubr.f32.vlgmr.msra.gmra.mxu1 %v6448_v38 }
 0x4e5   :  { %1910 = vmatpush1.msra.mxu0 %v5877_v12  ;;  %1981 = vmatpush1.msra.mxu1 %v5882_v14  ;;  %v9008_v12 = vld [vmem:[#allocation19_spill] sm:$0xff] }
 0x4e6   :  { %1911 = vmatprep.subr.mxu0 %v5889_v15  ;;  %1982 = vmatprep.subr.mxu1 %v5894_v16  ;;  %v9009_v14 = vld [vmem:[#allocation11_spill] sm:$0xff]  ;;  %v9010_v15 = vld [vmem:[#allocation20_spill] sm:$0xff] }
 0x4e7   :  { %1912 = vmatpush1.msra.mxu0 %v5901_v17  ;;  %1983 = vmatpush1.msra.mxu1 %v5906_v19  ;;  %v9011_v16 = vld [vmem:[#allocation12_spill] sm:$0xff]  ;;  %v9012_v17 = vld [vmem:[#allocation21_spill] sm:$0xff] }
 0x4e8   :  { %1913 = vmatprep.subr.mxu0 %v5913_v21  ;;  %1984 = vmatprep.subr.mxu1 %v5918_v23  ;;  %v9013_v19 = vld [vmem:[#allocation13_spill] sm:$0xff]  ;;  %v9014_v21 = vld [vmem:[#allocation22_spill] sm:$0xff] }
 0x4e9   :  { %1914 = vmatpush1.msra.mxu0 %v5925_v24  ;;  %1985 = vmatpush1.msra.mxu1 %v5930_v27  ;;  %v9015_v23 = vld [vmem:[#allocation14_spill] sm:$0xff]  ;;  %v9016_v24 = vld [vmem:[#allocation23_spill] sm:$0xff]  ;;  %9061 = vst [vmem:[#allocation22_spill] sm:$0xff] %v7342_v43 }
 0x4ea   :  { %1915 = vmatprep.subr.mxu0 %v5937_v28  ;;  %1986 = vmatprep.subr.mxu1 %v5942_v34  ;;  %v9017_v27 = vld [vmem:[#allocation15_spill] sm:$0xff]  ;;  %v9018_v28 = vld [vmem:[#allocation24_spill] sm:$0xff] }
 0x4eb   :  { %1916 = vmatpush1.msra.mxu0 %v5949_v46  ;;  %1987 = vmatpush1.msra.mxu1 %v5954_v48  ;;  %v9019_v34 = vld [vmem:[#allocation16_spill] sm:$0xff]  ;;  %v9020_v46 = vld [vmem:[#allocation25_spill] sm:$0xff] }
 0x4ec   :  { %1917 = vmatprep.subr.mxu0 %v5961_v49  ;;  %1988 = vmatprep.subr.mxu1 %v5966_v51  ;;  %v9021_v48 = vld [vmem:[#allocation17_spill] sm:$0xff]  ;;  %v9022_v49 = vld [vmem:[#allocation26_spill] sm:$0xff]  ;;  %v9023_v51 = vmov 0.0  }
 0x4ed   :  { %1918 = vmatpush1.msra.mxu0 %v5973_v53  ;;  %1989 = vmatpush1.msra.mxu1 %v5978_v54  ;;  %v9024_v53 = vld [vmem:[#allocation18_spill] sm:$0xff] }
 0x4ee   :  { %1919 = vmatprep.subr.mxu0 %v5985_v55  ;;  %1990 = vmatprep.subr.mxu1 %v5990_v56  ;;  %v9025_v56 = vld [vmem:[#allocation52_spill] sm:$0xff] }
 0x4ef   :  { %1920 = vmatpush1.msra.mxu0 %v5997_v57  ;;  %1991 = vmatpush1.msra.mxu1 %v6002_v58 }
 0x4f0   :  { %1921 = vmatprep.subr.mxu0 %v6009_v59  ;;  %1992 = vmatprep.subr.mxu1 %v6014_v60 }
 0x4f1   :  { %1922 = vmatpush1.msra.mxu0 %v6021_v61  ;;  %1993 = vmatpush1.msra.mxu1 %v6026_v62  ;;  %v9026_v61 = vld [vmem:[#allocation53_spill] sm:$0xff] }
 0x4f2   :  { %1923 = vmatprep.subr.mxu0 %v6031_v63  ;;  %1994 = vmatprep.subr.mxu1 %v6038_v0  ;;  %v9027_v0 = vld [vmem:[#allocation38_spill] sm:$0xff] }
 0x4f3   :  { %1924 = vmatpush1.msra.mxu0 %v6043_v1  ;;  %1995 = vmatpush1.msra.mxu1 %v6048_v3  ;;  %v9028_v3 = vld [vmem:[#allocation37_spill] sm:$0xff] }
 0x4f4   :  { %1925 = vmatprep.subr.mxu0 %v6055_v8  ;;  %1996 = vmatprep.subr.mxu1 %v6060_v13 }
 0x4f5   :  { %1926 = vmatpush1.msra.mxu0 %v6065_v18  ;;  %1997 = vmatpush1.msra.mxu1 %v6072_v32 }
 0x4f6   :  { %1927 = vmatprep.subr.mxu0 %v6077_v40  ;;  %1998 = vmatprep.subr.mxu1 %v6082_v36 }
 0x4f7   :  { %1928 = vmatpush1.msra.mxu0 %v6089_v26  ;;  %1999 = vmatpush1.msra.mxu1 %v6094_v45 }
 0x4f8   :  { %1929 = vmatprep.subr.mxu0 %v6101_v29  ;;  %2000 = vmatprep.subr.mxu1 %v6106_v44 }
 0x4f9   :  { %1930 = vmatpush1.msra.mxu0 %v6113_v22  ;;  %2001 = vmatpush1.msra.mxu1 %v6118_v47  ;;  %v1832_v22 = vstv %s1831_s4 }
 0x4fa   :  { %1931 = vmatprep.subr.mxu0 %v6125_v20  ;;  %2002 = vmatprep.subr.mxu1 %v6130_v25  ;;  %vm6524_vm6 = vcmp.eq.s32.totalorder %v1832_v22, 1  ;;  %v9029_v20 = vmov 0  ;;  %v2104_v22 = vld [vmem:[%s8632_s3 + $0x78] sm:$0xff] }
 0x4fb   :  { %1932 = vmatpush1.msra.mxu0 %v6137_v30  ;;  %2003 = vmatpush1.msra.mxu1 %v6142_v5  ;;  %v9030_v20 = vsel %vm6524_vm6, 4294967295, %v9029_v20 }
 0x4fc   :  { %1933 = vmatprep.subr.mxu0 %v9008_v12  ;;  %2004 = vmatprep.subr.mxu1 %v9009_v14  ;;  %9031 = vst [vmem:[#allocation29_spill] sm:$0xff] %v9030_v20  ;;  %v2141_v12 = vld [vmem:[%s8632_s3 + $0x1a0] sm:$0xff]  ;;  %v2143_v14 = vld [vmem:[%s8632_s3 + $0x1b0] sm:$0xff] }
 0x4fd   :  { %1934 = vmatpush1.msra.mxu0 %v9010_v15  ;;  %2005 = vmatpush1.msra.mxu1 %v9011_v16  ;;  %v2138_v15 = vld [vmem:[%s8632_s3 + $0x188] sm:$0xff]  ;;  %v2140_v16 = vld [vmem:[%s8632_s3 + $0x198] sm:$0xff]  ;;  %v7336_v20 = vld [vmem:[%s8640_s6 + $0x30] sm:$0xff] }
 0x4fe   :  { %1935 = vmatprep.subr.mxu0 %v9012_v17  ;;  %2006 = vmatprep.subr.mxu1 %v9013_v19  ;;  %v2137_v17 = vld [vmem:[%s8632_s3 + $0x180] sm:$0xff]  ;;  %v2139_v19 = vld [vmem:[%s8632_s3 + $0x190] sm:$0xff]  ;;  %9060 = vst [vmem:[#allocation13_spill] sm:$0xff] %v7336_v20 }
 0x4ff   :  { %1936 = vmatpush1.msra.mxu0 %v9014_v21  ;;  %2007 = vmatpush1.msra.mxu1 %v9015_v23  ;;  %v2134_v21 = vld [vmem:[%s8632_s3 + $0x168] sm:$0xff]  ;;  %v2136_v23 = vld [vmem:[%s8632_s3 + $0x178] sm:$0xff] }
 0x500   :  { %1937 = vmatprep.subr.mxu0 %v9016_v24  ;;  %2008 = vmatprep.subr.mxu1 %v9017_v27  ;;  %v2133_v24 = vld [vmem:[%s8632_s3 + $0x160] sm:$0xff]  ;;  %v2135_v27 = vld [vmem:[%s8632_s3 + $0x170] sm:$0xff] }
 0x501   :  { %1938 = vmatpush1.msra.mxu0 %v9018_v28  ;;  %2009 = vmatpush1.msra.mxu1 %v9019_v34  ;;  %v2130_v28 = vld [vmem:[%s8632_s3 + $0x148] sm:$0xff]  ;;  %v2132_v34 = vld [vmem:[%s8632_s3 + $0x158] sm:$0xff] }
 0x502   :  { %1939 = vmatprep.subr.mxu0 %v9020_v46  ;;  %2010 = vmatprep.subr.mxu1 %v9021_v48  ;;  %v2129_v46 = vld [vmem:[%s8632_s3 + $0x140] sm:$0xff]  ;;  %v2131_v48 = vld [vmem:[%s8632_s3 + $0x150] sm:$0xff] }
 0x503   :  { %1940 = vmatpush1.msra.mxu0 %v9022_v49  ;;  %1973 = vmatprep.mubr.f32.mxu0 %v9023_v51  ;;  %v2126_v49 = vld [vmem:[%s8632_s3 + $0x128] sm:$0xff] }
 0x504   :  { %2011 = vmatpush1.msra.mxu1 %v9024_v53  ;;  %2044 = vmatprep.mubr.f32.mxu1 %v9023_v51  ;;  %v2128_v53 = vld [vmem:[%s8632_s3 + $0x138] sm:$0xff] }
 0x505   :  { %2153 = vmatprep.subr.mxu0 %v2150_v4  ;;  %2224 = vmatprep.subr.mxu1 %v2152_v11  ;;  %v2096_v4 = vld [vmem:[%s8632_s3 + $0x38] sm:$0xff]  ;;  %v2093_v11 = vld [vmem:[%s8632_s3 + $0x20] sm:$0xff] }
 0x5a4   :  { %v1731_v54 = vpop.f32.mrf.mxu0  ;;  %v1802_v55 = vpop.f32.mrf.mxu1 }
 0x5a5   :  { %v1807_v57 = vadd.f32 %v1731_v54, %v9025_v56  ;;  %v1809_v8 = vadd.f32 %v1802_v55, %v9028_v3  ;;  %v2125_v54 = vld [vmem:[%s8632_s3 + $0x120] sm:$0xff]  ;;  %v2127_v55 = vld [vmem:[%s8632_s3 + $0x130] sm:$0xff]  ;;  %v2122_v56 = vld [vmem:[%s8632_s3 + $0x108] sm:$0xff] }
 0x5a6   :  { %v1733_v58 = vpop.f32.mrf.mxu0  ;;  %v1804_v59 = vpop.f32.mrf.mxu1  ;;  %v2113_v3 = vld [vmem:[%s8632_s3 + $0xc0] sm:$0xff] }
 0x5a7   :  { %v1811_v60 = vmul.f32 0.5, %v1807_v57  ;;  %v1808_v62 = vadd.f32 %v1733_v58, %v9026_v61  ;;  %v1810_v1 = vadd.f32 %v1804_v59, %v9027_v0  ;;  %v1813_v13 = vmul.f32 0.5, %v1809_v8  ;;  %v2124_v57 = vld [vmem:[%s8632_s3 + $0x118] sm:$0xff]  ;;  %v2121_v58 = vld [vmem:[%s8632_s3 + $0x100] sm:$0xff]  ;;  %v2123_v59 = vld [vmem:[%s8632_s3 + $0x110] sm:$0xff] }
 0x5a8   :  { %v2120_v61 = vld [vmem:[%s8632_s3 + $0xf8] sm:$0xff]  ;;  %v2114_v0 = vld [vmem:[%s8632_s3 + $0xc8] sm:$0xff]  ;;  %v2115_v8 = vld [vmem:[%s8632_s3 + $0xd0] sm:$0xff] }
 0x5a9   :  { %4878 = vtanh.f32 %v1811_v60  ;;  %v1812_v63 = vmul.f32 0.5, %v1808_v62  ;;  %v2118_v60 = vld [vmem:[%s8632_s3 + $0xe8] sm:$0xff]  ;;  %v2117_v62 = vld [vmem:[%s8632_s3 + $0xe0] sm:$0xff] }
 0x5ab   :  { %4880 = vtanh.f32 %v1812_v63  ;;  %v2119_v63 = vld [vmem:[%s8632_s3 + $0xf0] sm:$0xff] }
 0x5ac   :  { %4882 = vtanh.f32 %v1810_v1  ;;  %v2116_v1 = vld [vmem:[%s8632_s3 + $0xd8] sm:$0xff] }
 0x5ad   :  { %4884 = vtanh.f32 %v1813_v13  ;;  %v2110_v13 = vld [vmem:[%s8632_s3 + $0xa8] sm:$0xff] }
 0x5b6   :  { %v4879_v18 = vpop.eup %4878 }
 0x5b7   :  { %v1817_v32 = vadd.f32 1.0, %v4879_v18  ;;  %v2112_v18 = vld [vmem:[%s8632_s3 + $0xb8] sm:$0xff] }
 0x5b8   :  { %v4881_v40 = vpop.eup %4880 }
 0x5b9   :  { %v1820_v36 = vmul.f32 0.5, %v1817_v32  ;;  %v1818_v26 = vadd.f32 1.0, %v4881_v40  ;;  %v4883_v45 = vpop.eup %4882  ;;  %v2109_v32 = vld [vmem:[%s8632_s3 + $0xa0] sm:$0xff]  ;;  %v2111_v40 = vld [vmem:[%s8632_s3 + $0xb0] sm:$0xff] }
 0x5ba   :  { %v4885_v5 = vpop.eup %4884 }
 0x5bb   :  { %v1821_v29 = vmul.f32 0.5, %v1818_v26  ;;  %v1825_v44 = vmul.f32 %v4883_v45, %v1820_v36  ;;  %v1819_v10 = vadd.f32 1.0, %v4885_v5  ;;  %v2106_v36 = vld [vmem:[%s8632_s3 + $0x88] sm:$0xff]  ;;  %v2108_v26 = vld [vmem:[%s8632_s3 + $0x98] sm:$0xff]  ;;  %v2105_v45 = vld [vmem:[%s8632_s3 + $0x80] sm:$0xff] }
 0x5bc   :  { %v2098_v5 = vld [vmem:[%s8632_s3 + $0x48] sm:$0xff] }
 0x5bd   :  { %v1824_v47 = vmul.f32 %v1821_v29, %v6443_v52  ;;  %v1822_v39 = vmul.f32 0.5, %v1819_v10  ;;  %v2107_v29 = vld [vmem:[%s8632_s3 + $0x90] sm:$0xff]  ;;  %v2100_v10 = vld [vmem:[%s8632_s3 + $0x58] sm:$0xff] }
 0x5bf   :  { %v1826_v25 = vadd.f32 %v1825_v44, %v1824_v47  ;;  %v2102_v44 = vld [vmem:[%s8632_s3 + $0x68] sm:$0xff]  ;;  %v2101_v47 = vld [vmem:[%s8632_s3 + $0x60] sm:$0xff] }
 0x5c1   :  { %4886 = vtanh.f32 %v1826_v25  ;;  %v6531_v30 = vsel %vm6524_vm6, %v1826_v25, %v6443_v52  ;;  %v2146_v52 = vld [vmem:[%s8632_s3 + $0x1c8] sm:$0xff]  ;;  %v2103_v25 = vld [vmem:[%s8632_s3 + $0x70] sm:$0xff] }
 0x5ce   :  { %v4887_v2 = vpop.eup %4886 }
 0x5cf   :  { %v1828_v42 = vmul.f32 %v4887_v2, %v1822_v39  ;;  %v2097_v39 = vld [vmem:[%s8632_s3 + $0x40] sm:$0xff]  ;;  %v2099_v2 = vld [vmem:[%s8632_s3 + $0x50] sm:$0xff] }
 0x5d1   :  { %v6536_v7 = vsel %vm6524_vm6, %v1828_v42, %v6448_v38  ;;  %v2094_v42 = vld [vmem:[%s8632_s3 + $0x28] sm:$0xff] }
 0x5d2   :  { %1974 = vmatmul.mubr.f32.vlgmr.msra.gmra.mxu0 %v6536_v7  ;;  %2045 = vmatmul.mubr.f32.vlgmr.msra.gmra.mxu1 %v6536_v7 }
 0x5d3   :  { %2217 = vmatprep.mubr.f32.mxu0 %v9023_v51  ;;  %2288 = vmatprep.mubr.f32.mxu1 %v9023_v51 }
 0x5d4   :  { %2154 = vmatpush1.msra.mxu0 %v2149_v37  ;;  %2225 = vmatpush1.msra.mxu1 %v2151_v35  ;;  %v2095_v37 = vld [vmem:[%s8632_s3 + $0x30] sm:$0xff]  ;;  %v2090_v35 = vld [vmem:[%s8632_s3 + $0x8] sm:$0xff] }
 0x5d5   :  { %2155 = vmatprep.subr.mxu0 %v2146_v52  ;;  %2226 = vmatprep.subr.mxu1 %v2148_v33  ;;  %v2092_v52 = vld [vmem:[%s8632_s3 + $0x18] sm:$0xff]  ;;  %v2089_v33 = vld [vmem:[%s8632_s3] sm:$0xff] }
 0x5d6   :  { %2156 = vmatpush1.msra.mxu0 %v2145_v6  ;;  %2227 = vmatpush1.msra.mxu1 %v2147_v41  ;;  %v2091_v6 = vld [vmem:[%s8632_s3 + $0x10] sm:$0xff]  ;;  %v2395_v41 = vld [vmem:[%s8639_s5 + $0x1e8] sm:$0xff] }
 0x5d7   :  { %2157 = vmatprep.subr.mxu0 %v2142_v9  ;;  %2228 = vmatprep.subr.mxu1 %v2144_v31  ;;  %v2397_v9 = vld [vmem:[%s8639_s5 + $0x1f8] sm:$0xff] }
 0x5d8   :  { %2158 = vmatpush1.msra.mxu0 %v2141_v12  ;;  %2229 = vmatpush1.msra.mxu1 %v2143_v14  ;;  %v9032_v14 = vld [vmem:[#allocation54_spill] sm:$0xff] }
 0x5d9   :  { %2159 = vmatprep.subr.mxu0 %v2138_v15  ;;  %2230 = vmatprep.subr.mxu1 %v2140_v16 }
 0x5da   :  { %2160 = vmatpush1.msra.mxu0 %v2137_v17  ;;  %2231 = vmatpush1.msra.mxu1 %v2139_v19 }
 0x5db   :  { %2161 = vmatprep.subr.mxu0 %v2134_v21  ;;  %2232 = vmatprep.subr.mxu1 %v2136_v23  ;;  %v9033_v21 = vld [vmem:[#allocation55_spill] sm:$0xff] }
 0x5dc   :  { %2162 = vmatpush1.msra.mxu0 %v2133_v24  ;;  %2233 = vmatpush1.msra.mxu1 %v2135_v27  ;;  %v9034_v27 = vld [vmem:[#allocation40_spill] sm:$0xff] }
 0x5dd   :  { %2163 = vmatprep.subr.mxu0 %v2130_v28  ;;  %2234 = vmatprep.subr.mxu1 %v2132_v34  ;;  %v9035_v34 = vld [vmem:[#allocation39_spill] sm:$0xff] }
 0x5de   :  { %2164 = vmatpush1.msra.mxu0 %v2129_v46  ;;  %2235 = vmatpush1.msra.mxu1 %v2131_v48 }
 0x5df   :  { %2165 = vmatprep.subr.mxu0 %v2126_v49  ;;  %2236 = vmatprep.subr.mxu1 %v2128_v53 }
 0x5e0   :  { %2166 = vmatpush1.msra.mxu0 %v2125_v54  ;;  %2237 = vmatpush1.msra.mxu1 %v2127_v55 }
 0x5e1   :  { %2167 = vmatprep.subr.mxu0 %v2122_v56  ;;  %2238 = vmatprep.subr.mxu1 %v2124_v57 }
 0x5e2   :  { %2168 = vmatpush1.msra.mxu0 %v2121_v58  ;;  %2239 = vmatpush1.msra.mxu1 %v2123_v59 }
 0x5e3   :  { %2169 = vmatprep.subr.mxu0 %v2118_v60  ;;  %2240 = vmatprep.subr.mxu1 %v2120_v61  ;;  %v2076_v60 = vstv %s2075_s23 }
 0x5e4   :  { %2170 = vmatpush1.msra.mxu0 %v2117_v62  ;;  %2241 = vmatpush1.msra.mxu1 %v2119_v63  ;;  %vm6748_vm7 = vcmp.eq.s32.totalorder %v2076_v60, 1  ;;  %v9036_v62 = vmov 0  ;;  %v2349_v60 = vld [vmem:[%s8639_s5 + $0x78] sm:$0xff] }
 0x5e5   :  { %2171 = vmatprep.subr.mxu0 %v2114_v0  ;;  %2242 = vmatprep.subr.mxu1 %v2116_v1  ;;  %v9037_v62 = vsel %vm6748_vm7, 4294967295, %v9036_v62 }
 0x5e6   :  { %2172 = vmatpush1.msra.mxu0 %v2113_v3  ;;  %2243 = vmatpush1.msra.mxu1 %v2115_v8  ;;  %9038 = vst [vmem:[#allocation46_spill] sm:$0xff] %v9037_v62  ;;  %v7329_v62 = vld [vmem:[%s8640_s6 + $0x38] sm:$0xff] }
 0x5e7   :  { %2173 = vmatprep.subr.mxu0 %v2110_v13  ;;  %2244 = vmatprep.subr.mxu1 %v2112_v18  ;;  %9059 = vst [vmem:[#allocation21_spill] sm:$0xff] %v7329_v62 }
 0x5e8   :  { %2174 = vmatpush1.msra.mxu0 %v2109_v32  ;;  %2245 = vmatpush1.msra.mxu1 %v2111_v40  ;;  %v2394_v32 = vld [vmem:[%s8639_s5 + $0x1e0] sm:$0xff]  ;;  %v2396_v40 = vld [vmem:[%s8639_s5 + $0x1f0] sm:$0xff] }
 0x5e9   :  { %2175 = vmatprep.subr.mxu0 %v2106_v36  ;;  %2246 = vmatprep.subr.mxu1 %v2108_v26  ;;  %v2393_v26 = vld [vmem:[%s8639_s5 + $0x1d8] sm:$0xff] }
 0x5ea   :  { %2176 = vmatpush1.msra.mxu0 %v2105_v45  ;;  %2247 = vmatpush1.msra.mxu1 %v2107_v29  ;;  %v2390_v45 = vld [vmem:[%s8639_s5 + $0x1c0] sm:$0xff]  ;;  %v2392_v29 = vld [vmem:[%s8639_s5 + $0x1d0] sm:$0xff] }
 0x5eb   :  { %2177 = vmatprep.subr.mxu0 %v2102_v44  ;;  %2248 = vmatprep.subr.mxu1 %v2104_v22  ;;  %v2387_v44 = vld [vmem:[%s8639_s5 + $0x1a8] sm:$0xff]  ;;  %v2389_v22 = vld [vmem:[%s8639_s5 + $0x1b8] sm:$0xff] }
 0x5ec   :  { %2178 = vmatpush1.msra.mxu0 %v2101_v47  ;;  %2249 = vmatpush1.msra.mxu1 %v2103_v25  ;;  %v2386_v47 = vld [vmem:[%s8639_s5 + $0x1a0] sm:$0xff]  ;;  %v2388_v25 = vld [vmem:[%s8639_s5 + $0x1b0] sm:$0xff] }
 0x5ed   :  { %2179 = vmatprep.subr.mxu0 %v2098_v5  ;;  %2250 = vmatprep.subr.mxu1 %v2100_v10  ;;  %v2383_v5 = vld [vmem:[%s8639_s5 + $0x188] sm:$0xff]  ;;  %v2385_v10 = vld [vmem:[%s8639_s5 + $0x198] sm:$0xff] }
 0x5ee   :  { %2180 = vmatpush1.msra.mxu0 %v2097_v39  ;;  %2251 = vmatpush1.msra.mxu1 %v2099_v2  ;;  %v2382_v39 = vld [vmem:[%s8639_s5 + $0x180] sm:$0xff]  ;;  %v2384_v2 = vld [vmem:[%s8639_s5 + $0x190] sm:$0xff] }
 0x5ef   :  { %2181 = vmatprep.subr.mxu0 %v2094_v42  ;;  %2252 = vmatprep.subr.mxu1 %v2096_v4  ;;  %v2379_v42 = vld [vmem:[%s8639_s5 + $0x168] sm:$0xff]  ;;  %v2381_v4 = vld [vmem:[%s8639_s5 + $0x178] sm:$0xff] }
 0x5f0   :  { %2182 = vmatpush1.msra.mxu0 %v2093_v11  ;;  %2253 = vmatpush1.msra.mxu1 %v2095_v37  ;;  %v2378_v11 = vld [vmem:[%s8639_s5 + $0x160] sm:$0xff]  ;;  %v2380_v37 = vld [vmem:[%s8639_s5 + $0x170] sm:$0xff] }
 0x5f1   :  { %2183 = vmatprep.subr.mxu0 %v2090_v35  ;;  %2254 = vmatprep.subr.mxu1 %v2092_v52  ;;  %v2375_v35 = vld [vmem:[%s8639_s5 + $0x148] sm:$0xff]  ;;  %v2377_v52 = vld [vmem:[%s8639_s5 + $0x158] sm:$0xff] }
 0x5f2   :  { %2184 = vmatpush1.msra.mxu0 %v2089_v33  ;;  %2255 = vmatpush1.msra.mxu1 %v2091_v6  ;;  %v2374_v33 = vld [vmem:[%s8639_s5 + $0x140] sm:$0xff]  ;;  %v2376_v6 = vld [vmem:[%s8639_s5 + $0x150] sm:$0xff] }
 0x5f3   :  { %2420 = vmatprep.subr.mxu0 %v2395_v41  ;;  %2533 = vmatprep.subr.mxu1 %v2397_v9  ;;  %v2371_v41 = vld [vmem:[%s8639_s5 + $0x128] sm:$0xff]  ;;  %v2373_v9 = vld [vmem:[%s8639_s5 + $0x138] sm:$0xff] }
 0x692   :  { %v1975_v31 = vpop.f32.mrf.mxu0  ;;  %v2046_v12 = vpop.f32.mrf.mxu1 }
 0x693   :  { %v2051_v15 = vadd.f32 %v1975_v31, %v9032_v14  ;;  %v2053_v46 = vadd.f32 %v2046_v12, %v9035_v34  ;;  %v2370_v31 = vld [vmem:[%s8639_s5 + $0x120] sm:$0xff]  ;;  %v2372_v12 = vld [vmem:[%s8639_s5 + $0x130] sm:$0xff]  ;;  %v2367_v14 = vld [vmem:[%s8639_s5 + $0x108] sm:$0xff] }
 0x694   :  { %v1977_v16 = vpop.f32.mrf.mxu0  ;;  %v2048_v17 = vpop.f32.mrf.mxu1  ;;  %v2358_v34 = vld [vmem:[%s8639_s5 + $0xc0] sm:$0xff] }
 0x695   :  { %v2055_v19 = vmul.f32 0.5, %v2051_v15  ;;  %v2052_v23 = vadd.f32 %v1977_v16, %v9033_v21  ;;  %v2054_v28 = vadd.f32 %v2048_v17, %v9034_v27  ;;  %v2057_v48 = vmul.f32 0.5, %v2053_v46  ;;  %v2369_v15 = vld [vmem:[%s8639_s5 + $0x118] sm:$0xff]  ;;  %v2366_v16 = vld [vmem:[%s8639_s5 + $0x100] sm:$0xff]  ;;  %v2368_v17 = vld [vmem:[%s8639_s5 + $0x110] sm:$0xff] }
 0x696   :  { %v2365_v21 = vld [vmem:[%s8639_s5 + $0xf8] sm:$0xff]  ;;  %v2359_v27 = vld [vmem:[%s8639_s5 + $0xc8] sm:$0xff]  ;;  %v2360_v46 = vld [vmem:[%s8639_s5 + $0xd0] sm:$0xff] }
 0x697   :  { %4888 = vtanh.f32 %v2055_v19  ;;  %v2056_v24 = vmul.f32 0.5, %v2052_v23  ;;  %v2363_v19 = vld [vmem:[%s8639_s5 + $0xe8] sm:$0xff]  ;;  %v2362_v23 = vld [vmem:[%s8639_s5 + $0xe0] sm:$0xff] }
 0x699   :  { %4890 = vtanh.f32 %v2056_v24  ;;  %v2364_v24 = vld [vmem:[%s8639_s5 + $0xf0] sm:$0xff] }
 0x69a   :  { %4892 = vtanh.f32 %v2054_v28  ;;  %v2361_v28 = vld [vmem:[%s8639_s5 + $0xd8] sm:$0xff] }
 0x69b   :  { %4894 = vtanh.f32 %v2057_v48  ;;  %v2355_v48 = vld [vmem:[%s8639_s5 + $0xa8] sm:$0xff] }
 0x6a4   :  { %v4889_v49 = vpop.eup %4888 }
 0x6a5   :  { %v2061_v53 = vadd.f32 1.0, %v4889_v49  ;;  %v2357_v49 = vld [vmem:[%s8639_s5 + $0xb8] sm:$0xff] }
 0x6a6   :  { %v4891_v54 = vpop.eup %4890 }
 0x6a7   :  { %v2064_v55 = vmul.f32 0.5, %v2061_v53  ;;  %v2062_v56 = vadd.f32 1.0, %v4891_v54  ;;  %v4893_v57 = vpop.eup %4892  ;;  %v2354_v53 = vld [vmem:[%s8639_s5 + $0xa0] sm:$0xff]  ;;  %v2356_v54 = vld [vmem:[%s8639_s5 + $0xb0] sm:$0xff] }
 0x6a8   :  { %v4895_v1 = vpop.eup %4894 }
 0x6a9   :  { %v2065_v58 = vmul.f32 0.5, %v2062_v56  ;;  %v2069_v59 = vmul.f32 %v4893_v57, %v2064_v55  ;;  %v2063_v3 = vadd.f32 1.0, %v4895_v1  ;;  %v2351_v55 = vld [vmem:[%s8639_s5 + $0x88] sm:$0xff]  ;;  %v2353_v56 = vld [vmem:[%s8639_s5 + $0x98] sm:$0xff]  ;;  %v2350_v57 = vld [vmem:[%s8639_s5 + $0x80] sm:$0xff] }
 0x6aa   :  { %v2343_v1 = vld [vmem:[%s8639_s5 + $0x48] sm:$0xff] }
 0x6ab   :  { %v2068_v61 = vmul.f32 %v2065_v58, %v6531_v30  ;;  %v2066_v8 = vmul.f32 0.5, %v2063_v3  ;;  %v2352_v58 = vld [vmem:[%s8639_s5 + $0x90] sm:$0xff]  ;;  %v2345_v3 = vld [vmem:[%s8639_s5 + $0x58] sm:$0xff] }
 0x6ad   :  { %v2070_v63 = vadd.f32 %v2069_v59, %v2068_v61  ;;  %v2347_v59 = vld [vmem:[%s8639_s5 + $0x68] sm:$0xff]  ;;  %v2346_v61 = vld [vmem:[%s8639_s5 + $0x60] sm:$0xff] }
 0x6af   :  { %4896 = vtanh.f32 %v2070_v63  ;;  %v6755_v0 = vsel %vm6748_vm7, %v2070_v63, %v6531_v30  ;;  %v2391_v30 = vld [vmem:[%s8639_s5 + $0x1c8] sm:$0xff]  ;;  %v2348_v63 = vld [vmem:[%s8639_s5 + $0x70] sm:$0xff] }
 0x6bc   :  { %v4897_v13 = vpop.eup %4896 }
 0x6bd   :  { %v2072_v18 = vmul.f32 %v4897_v13, %v2066_v8  ;;  %v2342_v8 = vld [vmem:[%s8639_s5 + $0x40] sm:$0xff]  ;;  %v2344_v13 = vld [vmem:[%s8639_s5 + $0x50] sm:$0xff] }
 0x6bf   :  { %v6766_v36 = vsel %vm6748_vm7, %v2072_v18, %v6536_v7  ;;  %v2339_v18 = vld [vmem:[%s8639_s5 + $0x28] sm:$0xff] }
 0x6c0   :  { %2218 = vmatmul.mubr.f32.vlgmr.msra.gmra.mxu0 %v6766_v36  ;;  %2289 = vmatmul.mubr.f32.vlgmr.msra.gmra.mxu1 %v6766_v36 }
 0x6c1   :  { %2421 = vmatpush1.msra.mxu0 %v2394_v32  ;;  %2534 = vmatpush1.msra.mxu1 %v2396_v40  ;;  %v2341_v32 = vld [vmem:[%s8639_s5 + $0x38] sm:$0xff]  ;;  %v2338_v40 = vld [vmem:[%s8639_s5 + $0x20] sm:$0xff] }
 0x6c2   :  { %2422 = vmatprep.subr.mxu0 %v2391_v30  ;;  %2535 = vmatprep.subr.mxu1 %v2393_v26  ;;  %v2340_v30 = vld [vmem:[%s8639_s5 + $0x30] sm:$0xff]  ;;  %v2335_v26 = vld [vmem:[%s8639_s5 + $0x8] sm:$0xff] }
 0x6c3   :  { %2423 = vmatpush1.msra.mxu0 %v2390_v45  ;;  %2536 = vmatpush1.msra.mxu1 %v2392_v29  ;;  %v2337_v45 = vld [vmem:[%s8639_s5 + $0x18] sm:$0xff]  ;;  %v2334_v29 = vld [vmem:[%s8639_s5] sm:$0xff] }
 0x6c4   :  { %2424 = vmatprep.subr.mxu0 %v2387_v44  ;;  %2537 = vmatprep.subr.mxu1 %v2389_v22  ;;  %v2336_v44 = vld [vmem:[%s8639_s5 + $0x10] sm:$0xff]  ;;  %v9039_v22 = vld [vmem:[#allocation58_spill] sm:$0xff] }
 0x6c5   :  { %2425 = vmatpush1.msra.mxu0 %v2386_v47  ;;  %2538 = vmatpush1.msra.mxu1 %v2388_v25  ;;  %v9040_v47 = vld [vmem:[#allocation8_spill] sm:$0xff]  ;;  %v9041_v25 = vld [vmem:[#allocation41_spill] sm:$0xff] }
 0x6c6   :  { %2426 = vmatprep.subr.mxu0 %v2383_v5  ;;  %2539 = vmatprep.subr.mxu1 %v2385_v10  ;;  %v7000_v5 = vld [vmem:[%s8640_s6 + $0x1f0] sm:$0xff]  ;;  %v7006_v10 = vld [vmem:[%s8640_s6 + $0x1c8] sm:$0xff] }
 0x6c7   :  { %2427 = vmatpush1.msra.mxu0 %v2382_v39  ;;  %2540 = vmatpush1.msra.mxu1 %v2384_v2  ;;  %v7012_v39 = vld [vmem:[%s8640_s6 + $0x1d8] sm:$0xff]  ;;  %v7018_v2 = vld [vmem:[%s8640_s6 + $0x1c0] sm:$0xff] }
 0x6c8   :  { %2428 = vmatprep.subr.mxu0 %v2379_v42  ;;  %2541 = vmatprep.subr.mxu1 %v2381_v4  ;;  %v7024_v42 = vld [vmem:[%s8640_s6 + $0x1d0] sm:$0xff]  ;;  %v7030_v4 = vld [vmem:[%s8640_s6 + $0x1a8] sm:$0xff] }
 0x6c9   :  { %2429 = vmatpush1.msra.mxu0 %v2378_v11  ;;  %2542 = vmatpush1.msra.mxu1 %v2380_v37  ;;  %v7036_v11 = vld [vmem:[%s8640_s6 + $0x1b8] sm:$0xff]  ;;  %v7042_v37 = vld [vmem:[%s8640_s6 + $0x1a0] sm:$0xff] }
 0x6ca   :  { %2430 = vmatprep.subr.mxu0 %v2375_v35  ;;  %2543 = vmatprep.subr.mxu1 %v2377_v52  ;;  %v7048_v35 = vld [vmem:[%s8640_s6 + $0x188] sm:$0xff]  ;;  %v7053_v52 = vld [vmem:[%s8640_s6 + $0x1b0] sm:$0xff] }
 0x6cb   :  { %2431 = vmatpush1.msra.mxu0 %v2374_v33  ;;  %2544 = vmatpush1.msra.mxu1 %v2376_v6  ;;  %v7060_v33 = vld [vmem:[%s8640_s6 + $0x180] sm:$0xff]  ;;  %v7065_v6 = vld [vmem:[%s8640_s6 + $0x198] sm:$0xff] }
 0x6cc   :  { %2432 = vmatprep.subr.mxu0 %v2371_v41  ;;  %2545 = vmatprep.subr.mxu1 %v2373_v9  ;;  %v7070_v41 = vld [vmem:[%s8640_s6 + $0x168] sm:$0xff]  ;;  %v7077_v9 = vld [vmem:[%s8640_s6 + $0x190] sm:$0xff] }
 0x6cd   :  { %2433 = vmatpush1.msra.mxu0 %v2370_v31  ;;  %2546 = vmatpush1.msra.mxu1 %v2372_v12  ;;  %v7082_v31 = vld [vmem:[%s8640_s6 + $0x160] sm:$0xff]  ;;  %v7087_v12 = vld [vmem:[%s8640_s6 + $0x178] sm:$0xff] }
 0x6ce   :  { %2434 = vmatprep.subr.mxu0 %v2367_v14  ;;  %2547 = vmatprep.subr.mxu1 %v2369_v15  ;;  %v7094_v14 = vld [vmem:[%s8640_s6 + $0x148] sm:$0xff]  ;;  %v7099_v15 = vld [vmem:[%s8640_s6 + $0x170] sm:$0xff] }
 0x6cf   :  { %2435 = vmatpush1.msra.mxu0 %v2366_v16  ;;  %2548 = vmatpush1.msra.mxu1 %v2368_v17  ;;  %v7106_v16 = vld [vmem:[%s8640_s6 + $0x140] sm:$0xff]  ;;  %v7111_v17 = vld [vmem:[%s8640_s6 + $0x158] sm:$0xff] }
 0x6d0   :  { %2436 = vmatprep.subr.mxu0 %v2363_v19  ;;  %2549 = vmatprep.subr.mxu1 %v2365_v21  ;;  %v7116_v19 = vld [vmem:[%s8640_s6 + $0x150] sm:$0xff]  ;;  %v7123_v21 = vld [vmem:[%s8640_s6 + $0x128] sm:$0xff] }
 0x6d1   :  { %2437 = vmatpush1.msra.mxu0 %v2362_v23  ;;  %2550 = vmatpush1.msra.mxu1 %v2364_v24  ;;  %v7128_v23 = vld [vmem:[%s8640_s6 + $0x138] sm:$0xff]  ;;  %v7135_v24 = vld [vmem:[%s8640_s6 + $0x120] sm:$0xff] }
 0x6d2   :  { %2438 = vmatprep.subr.mxu0 %v2359_v27  ;;  %2551 = vmatprep.subr.mxu1 %v2361_v28  ;;  %v7144_v27 = vld [vmem:[%s8640_s6 + $0x130] sm:$0xff]  ;;  %v7150_v28 = vld [vmem:[%s8640_s6 + $0x108] sm:$0xff] }
 0x6d3   :  { %2439 = vmatpush1.msra.mxu0 %v2358_v34  ;;  %2552 = vmatpush1.msra.mxu1 %v2360_v46  ;;  %v7156_v34 = vld [vmem:[%s8640_s6 + $0x100] sm:$0xff]  ;;  %v7161_v46 = vld [vmem:[%s8640_s6 + $0x118] sm:$0xff] }
 0x6d4   :  { %2440 = vmatprep.subr.mxu0 %v2355_v48  ;;  %2553 = vmatprep.subr.mxu1 %v2357_v49  ;;  %v7168_v48 = vld [vmem:[%s8640_s6 + $0x110] sm:$0xff]  ;;  %v7174_v49 = vld [vmem:[%s8640_s6 + $0xe8] sm:$0xff] }
 0x6d5   :  { %2441 = vmatpush1.msra.mxu0 %v2354_v53  ;;  %2554 = vmatpush1.msra.mxu1 %v2356_v54  ;;  %v7180_v53 = vld [vmem:[%s8640_s6 + $0xe0] sm:$0xff]  ;;  %v7185_v54 = vld [vmem:[%s8640_s6 + $0xf8] sm:$0xff] }
 0x6d6   :  { %2442 = vmatprep.subr.mxu0 %v2351_v55  ;;  %2555 = vmatprep.subr.mxu1 %v2353_v56  ;;  %v7192_v55 = vld [vmem:[%s8640_s6 + $0xf0] sm:$0xff]  ;;  %v7198_v56 = vld [vmem:[%s8640_s6 + $0xc8] sm:$0xff] }
 0x6d7   :  { %2443 = vmatpush1.msra.mxu0 %v2350_v57  ;;  %2556 = vmatpush1.msra.mxu1 %v2352_v58  ;;  %v7204_v57 = vld [vmem:[%s8640_s6 + $0xc0] sm:$0xff]  ;;  %v7209_v58 = vld [vmem:[%s8640_s6 + $0xd8] sm:$0xff] }
 0x6d8   :  { %2444 = vmatprep.subr.mxu0 %v2347_v59  ;;  %2557 = vmatprep.subr.mxu1 %v2349_v60  ;;  %v7216_v59 = vld [vmem:[%s8640_s6 + $0xd0] sm:$0xff]  ;;  %v7222_v60 = vld [vmem:[%s8640_s6 + $0xa8] sm:$0xff] }
 0x6d9   :  { %2445 = vmatpush1.msra.mxu0 %v2346_v61  ;;  %2558 = vmatpush1.msra.mxu1 %v2348_v63  ;;  %v7228_v61 = vld [vmem:[%s8640_s6 + $0xa0] sm:$0xff]  ;;  %v7233_v63 = vld [vmem:[%s8640_s6 + $0xb8] sm:$0xff] }
 0x6da   :  { %2446 = vmatprep.subr.mxu0 %v2343_v1  ;;  %2559 = vmatprep.subr.mxu1 %v2345_v3  ;;  %v7240_v1 = vld [vmem:[%s8640_s6 + $0xb0] sm:$0xff]  ;;  %v7246_v3 = vld [vmem:[%s8640_s6 + $0x88] sm:$0xff] }
 0x6db   :  { %2447 = vmatpush1.msra.mxu0 %v2342_v8  ;;  %2560 = vmatpush1.msra.mxu1 %v2344_v13  ;;  %9044 = vst [vmem:[#allocation31_spill] sm:$0xff] %v7240_v1  ;;  %9045 = vst [vmem:[#allocation48_spill] sm:$0xff] %v7246_v3  ;;  %v7252_v8 = vld [vmem:[%s8640_s6 + $0x80] sm:$0xff]  ;;  %v7257_v13 = vld [vmem:[%s8640_s6 + $0x98] sm:$0xff] }
 0x6dc   :  { %2448 = vmatprep.subr.mxu0 %v2339_v18  ;;  %2561 = vmatprep.subr.mxu1 %v2341_v32  ;;  %9046 = vst [vmem:[#allocation49_spill] sm:$0xff] %v7252_v8  ;;  %9047 = vst [vmem:[#allocation34_spill] sm:$0xff] %v7257_v13  ;;  %v7264_v18 = vld [vmem:[%s8640_s6 + $0x90] sm:$0xff]  ;;  %v7270_v32 = vld [vmem:[%s8640_s6 + $0x68] sm:$0xff] }
 0x6dd   :  { %2449 = vmatpush1.msra.mxu0 %v2338_v40  ;;  %2562 = vmatpush1.msra.mxu1 %v2340_v30  ;;  %9048 = vst [vmem:[#allocation33_spill] sm:$0xff] %v7264_v18  ;;  %9049 = vst [vmem:[#allocation9_spill] sm:$0xff] %v7270_v32  ;;  %v7276_v40 = vld [vmem:[%s8640_s6 + $0x60] sm:$0xff]  ;;  %v7281_v30 = vld [vmem:[%s8640_s6 + $0x78] sm:$0xff] }
 0x6de   :  { %2450 = vmatprep.subr.mxu0 %v2335_v26  ;;  %2563 = vmatprep.subr.mxu1 %v2337_v45  ;;  %9050 = vst [vmem:[#allocation10_spill] sm:$0xff] %v7276_v40  ;;  %9051 = vst [vmem:[#allocation50_spill] sm:$0xff] %v7281_v30  ;;  %v7288_v26 = vld [vmem:[%s8640_s6 + $0x70] sm:$0xff]  ;;  %v7294_v45 = vld [vmem:[%s8640_s6 + $0x48] sm:$0xff] }
 0x6df   :  { %2451 = vmatpush1.msra.mxu0 %v2334_v29  ;;  %2484 = vmatprep.mubr.f32.mxu0 %v9023_v51  ;;  %9052 = vst [vmem:[#allocation51_spill] sm:$0xff] %v7288_v26  ;;  %9053 = vst [vmem:[#allocation36_spill] sm:$0xff] %v7294_v45  ;;  %v7300_v29 = vld [vmem:[%s8640_s6 + $0x40] sm:$0xff] }
 0x6e0   :  { %2564 = vmatpush1.msra.mxu1 %v2336_v44  ;;  %2597 = vmatprep.mubr.f32.mxu1 %v9023_v51  ;;  %9054 = vst [vmem:[#allocation35_spill] sm:$0xff] %v7300_v29  ;;  %v7305_v44 = vld [vmem:[%s8640_s6 + $0x58] sm:$0xff] }
 0x6e1   :  { %2485 = vmatmul.mubr.f32.vlgmr.msra.gmra.mxu0 %v9039_v22  ;;  %2598 = vmatmul.mubr.f32.vlgmr.msra.gmra.mxu1 %v9039_v22  ;;  %9055 = vst [vmem:[#allocation19_spill] sm:$0xff] %v7305_v44  ;;  %v7312_v22 = vld [vmem:[%s8640_s6 + $0x50] sm:$0xff] }
 0x6e2   :  { %2490 = vmatprep.mubr.f32.mxu0 %v9023_v51  ;;  %2603 = vmatprep.mubr.f32.mxu1 %v9023_v51  ;;  %9056 = vst [vmem:[#allocation11_spill] sm:$0xff] %v7312_v22 }
 0x6e5   :  { %2491 = vmatmul.mubr.f32.gmra.mxu0 %v9040_v47  ;;  %2604 = vmatmul.mubr.f32.gmra.mxu1 %v9040_v47  ;;  %v7318_v47 = vld [vmem:[%s8640_s6 + $0x28] sm:$0xff] }
 0x6e6   :  { %2496 = vmatprep.mubr.f32.mxu0 %v9023_v51  ;;  %2609 = vmatprep.mubr.f32.mxu1 %v9023_v51  ;;  %9057 = vst [vmem:[#allocation20_spill] sm:$0xff] %v7318_v47 }
 0x6e9   :  { %2497 = vmatmul.mubr.f32.gmra.mxu0 %v9041_v25  ;;  %2610 = vmatmul.mubr.f32.gmra.mxu1 %v9041_v25  ;;  %v7324_v25 = vld [vmem:[%s8640_s6 + $0x20] sm:$0xff] }
 0x6ea   :  { %2502 = vmatprep.mubr.f32.mxu0 %v9023_v51  ;;  %2615 = vmatprep.mubr.f32.mxu1 %v9023_v51  ;;  %9058 = vst [vmem:[#allocation12_spill] sm:$0xff] %v7324_v25 }
 0x6ed   :  { %2503 = vmatmul.mubr.f32.gmra.mxu0 %v6358_v50  ;;  %2616 = vmatmul.mubr.f32.gmra.mxu1 %v6358_v50  ;;  %v6983_v50 = vld [vmem:[%s8640_s6 + $0x1e8] sm:$0xff] }
 0x6ee   :  { %2508 = vmatprep.mubr.f32.mxu0 %v9023_v51  ;;  %2621 = vmatprep.mubr.f32.mxu1 %v9023_v51  ;;  %9042 = vst [vmem:[#allocation47_spill] sm:$0xff] %v6983_v50 }
 0x6ef   :  { %2750 = vmatprep.subr.mxu0 %v6983_v50 }
 0x6f1   :  { %2509 = vmatmul.mubr.f32.gmra.mxu0 %v6448_v38  ;;  %2622 = vmatmul.mubr.f32.gmra.mxu1 %v6448_v38  ;;  %v6988_v38 = vld [vmem:[%s8640_s6 + $0x1f8] sm:$0xff] }
 0x6f2   :  { %2514 = vmatprep.mubr.f32.mxu0 %v9023_v51  ;;  %2627 = vmatprep.mubr.f32.mxu1 %v9023_v51  ;;  %9043 = vst [vmem:[#allocation32_spill] sm:$0xff] %v6988_v38 }
 0x6f3   :  { %2821 = vmatprep.subr.mxu1 %v6988_v38 }
 0x6f4   :  { %2822 = vmatpush1.msra.mxu1 %v7000_v5 }
 0x6f5   :  { %2515 = vmatmul.mubr.f32.gmra.mxu0 %v6536_v7  ;;  %2628 = vmatmul.mubr.f32.gmra.mxu1 %v6536_v7  ;;  %v6994_v7 = vld [vmem:[%s8640_s6 + $0x1e0] sm:$0xff] }
 0x6f6   :  { %2520 = vmatprep.mubr.f32.mxu0 %v9023_v51  ;;  %2633 = vmatprep.mubr.f32.mxu1 %v9023_v51 }
 0x6f7   :  { %2751 = vmatpush1.msra.mxu0 %v6994_v7  ;;  %2823 = vmatprep.subr.mxu1 %v7012_v39 }
 0x6f8   :  { %2752 = vmatprep.subr.mxu0 %v7006_v10  ;;  %2824 = vmatpush1.msra.mxu1 %v7024_v42 }
 0x6f9   :  { %2521 = vmatmul.mubr.f32.gmra.mxu0 %v6766_v36  ;;  %2634 = vmatmul.mubr.f32.gmra.mxu1 %v6766_v36 }
 0x6fa   :  { %2526 = vmatprep.mubr.f32.mxu0 %v9023_v51  ;;  %2639 = vmatprep.mubr.f32.mxu1 %v9023_v51 }
 0x6fb   :  { %2753 = vmatpush1.msra.mxu0 %v7018_v2  ;;  %2825 = vmatprep.subr.mxu1 %v7036_v11 }
 0x6fc   :  { %2754 = vmatprep.subr.mxu0 %v7030_v4  ;;  %2826 = vmatpush1.msra.mxu1 %v7053_v52 }
 0x6fd   :  { %2755 = vmatpush1.msra.mxu0 %v7042_v37  ;;  %2827 = vmatprep.subr.mxu1 %v7065_v6 }
 0x6fe   :  { %2756 = vmatprep.subr.mxu0 %v7048_v35  ;;  %2828 = vmatpush1.msra.mxu1 %v7077_v9 }
 0x6ff   :  { %2757 = vmatpush1.msra.mxu0 %v7060_v33  ;;  %2829 = vmatprep.subr.mxu1 %v7087_v12 }
 0x700   :  { %2758 = vmatprep.subr.mxu0 %v7070_v41  ;;  %2830 = vmatpush1.msra.mxu1 %v7099_v15 }
 0x701   :  { %2759 = vmatpush1.msra.mxu0 %v7082_v31  ;;  %2831 = vmatprep.subr.mxu1 %v7111_v17 }
 0x702   :  { %2760 = vmatprep.subr.mxu0 %v7094_v14  ;;  %2832 = vmatpush1.msra.mxu1 %v7116_v19 }
 0x703   :  { %2761 = vmatpush1.msra.mxu0 %v7106_v16  ;;  %2833 = vmatprep.subr.mxu1 %v7128_v23 }
 0x704   :  { %2762 = vmatprep.subr.mxu0 %v7123_v21  ;;  %2834 = vmatpush1.msra.mxu1 %v7144_v27 }
 0x705   :  { %2763 = vmatpush1.msra.mxu0 %v7135_v24  ;;  %2835 = vmatprep.subr.mxu1 %v7161_v46 }
 0x706   :  { %2764 = vmatprep.subr.mxu0 %v7150_v28  ;;  %2836 = vmatpush1.msra.mxu1 %v7168_v48 }
 0x707   :  { %2765 = vmatpush1.msra.mxu0 %v7156_v34  ;;  %2837 = vmatprep.subr.mxu1 %v7185_v54 }
 0x708   :  { %2766 = vmatprep.subr.mxu0 %v7174_v49  ;;  %2838 = vmatpush1.msra.mxu1 %v7192_v55 }
 0x709   :  { %2767 = vmatpush1.msra.mxu0 %v7180_v53  ;;  %2839 = vmatprep.subr.mxu1 %v7209_v58 }
 0x70a   :  { %2768 = vmatprep.subr.mxu0 %v7198_v56  ;;  %2840 = vmatpush1.msra.mxu1 %v7216_v59 }
 0x70b   :  { %2769 = vmatpush1.msra.mxu0 %v7204_v57  ;;  %2841 = vmatprep.subr.mxu1 %v7233_v63 }
 0x70c   :  { %2770 = vmatprep.subr.mxu0 %v7222_v60  ;;  %2842 = vmatpush1.msra.mxu1 %v7240_v1 }
 0x70d   :  { %2771 = vmatpush1.msra.mxu0 %v7228_v61  ;;  %2843 = vmatprep.subr.mxu1 %v7257_v13 }
 0x70e   :  { %2772 = vmatprep.subr.mxu0 %v7246_v3  ;;  %2844 = vmatpush1.msra.mxu1 %v7264_v18 }
 0x70f   :  { %2773 = vmatpush1.msra.mxu0 %v7252_v8  ;;  %2845 = vmatprep.subr.mxu1 %v7281_v30 }
 0x710   :  { %2774 = vmatprep.subr.mxu0 %v7270_v32  ;;  %2846 = vmatpush1.msra.mxu1 %v7288_v26 }
 0x711   :  { %2775 = vmatpush1.msra.mxu0 %v7276_v40  ;;  %2847 = vmatprep.subr.mxu1 %v7305_v44  ;;  %v9066_v44 = vld [vmem:[#allocation6_spill] sm:$0xff] }
 0x712   :  { %2776 = vmatprep.subr.mxu0 %v7294_v45  ;;  %2848 = vmatpush1.msra.mxu1 %v7312_v22  ;;  %v9067_v45 = vld [vmem:[#allocation56_spill] sm:$0xff] }
 0x713   :  { %2777 = vmatpush1.msra.mxu0 %v7300_v29  ;;  %2849 = vmatprep.subr.mxu1 %v7329_v62  ;;  %v7353_v62 = vld [vmem:[%s8640_s6 + $0x18] sm:$0xff] }
 0x714   :  { %2778 = vmatprep.subr.mxu0 %v7318_v47  ;;  %2850 = vmatpush1.msra.mxu1 %v7336_v20  ;;  %v7348_v47 = vld [vmem:[%s8640_s6] sm:$0xff]  ;;  %9063 = vst [vmem:[#allocation23_spill] sm:$0xff] %v7353_v62  ;;  %v9065_v29 = vld [vmem:[#allocation45_spill] sm:$0xff] }
 0x715   :  { %2779 = vmatpush1.msra.mxu0 %v7324_v25  ;;  %9062 = vst [vmem:[#allocation14_spill] sm:$0xff] %v7348_v47  ;;  %2851 = vmatprep.subr.mxu1 %v7353_v62  ;;  %v7360_v25 = vld [vmem:[%s8640_s6 + $0x10] sm:$0xff] }
 0x716   :  { %2780 = vmatprep.subr.mxu0 %v7342_v43  ;;  %9064 = vst [vmem:[#allocation15_spill] sm:$0xff] %v7360_v25  ;;  %2852 = vmatpush1.msra.mxu1 %v7360_v25  ;;  %v227_v43 = vadd.f32 %v9066_v44, %v9065_v29 }
 0x717   :  { %2781 = vmatpush1.msra.mxu0 %v7348_v47  ;;  %3056 = vmatprep.subr.mxu1 %v6988_v38  ;;  %v9068_v47 = vld [vmem:[#allocation43_spill] sm:$0xff] }
 0x718   :  { %2985 = vmatprep.subr.mxu0 %v6983_v50  ;;  %v9069_v50 = vld [vmem:[#allocation42_spill] sm:$0xff] }
 0x780   :  { %v2219_v20 = vpop.f32.mrf.mxu0  ;;  %v2290_v22 = vpop.f32.mrf.mxu1 }
 0x781   :  { %v2295_v62 = vadd.f32 %v2219_v20, %v9067_v45  ;;  %v2297_v25 = vadd.f32 %v2290_v22, %v9069_v50  ;;  %v9070_v50 = vmov 0 }
 0x782   :  { %v2221_v26 = vpop.f32.mrf.mxu0  ;;  %v2292_v40 = vpop.f32.mrf.mxu1 }
 0x783   :  { %v2299_v30 = vmul.f32 0.5, %v2295_v62  ;;  %v2296_v32 = vadd.f32 %v2221_v26, %v227_v43  ;;  %v2298_v8 = vadd.f32 %v2292_v40, %v9068_v47  ;;  %v2301_v38 = vmul.f32 0.5, %v2297_v25 }
 0x784   :  { %v2320_v40 = vstv %s2319_s29 }
 0x785   :  { %4898 = vtanh.f32 %v2299_v30  ;;  %v2300_v18 = vmul.f32 0.5, %v2296_v32  ;;  %vm7375_vm8 = vcmp.eq.s32.totalorder %v2320_v40, 1  ;;  %v9080_v40 = vld [vmem:[#allocation19_spill] sm:$0xff] }
 0x786   :  { %v9071_v50 = vsel %vm7375_vm8, 4294967295, %v9070_v50 }
 0x787   :  { %4900 = vtanh.f32 %v2300_v18  ;;  %9072 = vst [vmem:[#allocation24_spill] sm:$0xff] %v9071_v50  ;;  %v9090_v50 = vld [vmem:[#allocation15_spill] sm:$0xff] }
 0x788   :  { %4902 = vtanh.f32 %v2298_v8 }
 0x789   :  { %4904 = vtanh.f32 %v2301_v38 }
 0x792   :  { %v4899_v29 = vpop.eup %4898 }
 0x793   :  { %v2305_v44 = vadd.f32 1.0, %v4899_v29 }
 0x794   :  { %v4901_v20 = vpop.eup %4900 }
 0x795   :  { %v2308_v45 = vmul.f32 0.5, %v2305_v44  ;;  %v2306_v43 = vadd.f32 1.0, %v4901_v20  ;;  %v4903_v62 = vpop.eup %4902  ;;  %v9074_v20 = vld [vmem:[#allocation33_spill] sm:$0xff] }
 0x796   :  { %v4905_v38 = vpop.eup %4904 }
 0x797   :  { %v2309_v32 = vmul.f32 0.5, %v2306_v43  ;;  %v2313_v30 = vmul.f32 %v4903_v62, %v2308_v45  ;;  %v2307_v22 = vadd.f32 1.0, %v4905_v38  ;;  %v9075_v45 = vld [vmem:[#allocation9_spill] sm:$0xff]  ;;  %v9076_v43 = vld [vmem:[#allocation50_spill] sm:$0xff] }
 0x798   :  { %v9077_v62 = vld [vmem:[#allocation10_spill] sm:$0xff]  ;;  %v9084_v38 = vld [vmem:[#allocation21_spill] sm:$0xff] }
 0x799   :  { %v2312_v8 = vmul.f32 %v2309_v32, %v6755_v0  ;;  %v2310_v47 = vmul.f32 0.5, %v2307_v22  ;;  %v9078_v32 = vld [vmem:[#allocation51_spill] sm:$0xff]  ;;  %v9085_v22 = vld [vmem:[#allocation12_spill] sm:$0xff] }
 0x79b   :  { %v2314_v18 = vadd.f32 %v2313_v30, %v2312_v8  ;;  %v9079_v30 = vld [vmem:[#allocation36_spill] sm:$0xff]  ;;  %v9081_v8 = vld [vmem:[#allocation35_spill] sm:$0xff] }
 0x79d   :  { %4906 = vtanh.f32 %v2314_v18  ;;  %v2323_v26 = vsel %vm7375_vm8, %v2314_v18, %v6755_v0  ;;  %v7396_v0 = vld [vmem:[%s8633_s13 + $0x8] sm:$0xff] }
 0x79e   :  { %4564 = vst [vmem:[%s8636_s14] sm:$0xff] %v2323_v26  ;;  %v9082_v18 = vld [vmem:[#allocation11_spill] sm:$0xff]  ;;  %v9083_v26 = vld [vmem:[#allocation20_spill] sm:$0xff] }
 0x7aa   :  { %v4907_v25 = vpop.eup %4906 }
 0x7ab   :  { %v2316_v29 = vmul.f32 %v4907_v25, %v2310_v47  ;;  %v9086_v47 = vld [vmem:[#allocation13_spill] sm:$0xff]  ;;  %v9087_v25 = vld [vmem:[#allocation22_spill] sm:$0xff] }
 0x7ad   :  { %v2322_v44 = vsel %vm7375_vm8, %v2316_v29, %v6766_v36  ;;  %v9073_v36 = vld [vmem:[#allocation49_spill] sm:$0xff]  ;;  %v9088_v29 = vld [vmem:[#allocation23_spill] sm:$0xff] }
 0x7ae   :  { %2527 = vmatmul.mubr.f32.gmra.mxu0 %v2322_v44  ;;  %4562 = vst [vmem:[%s8633_s13] sm:$0xff] %v2322_v44  ;;  %2640 = vmatmul.mubr.f32.gmra.mxu1 %v2322_v44  ;;  %v9089_v44 = vld [vmem:[#allocation14_spill] sm:$0xff] }
 0x7af   :  { %2814 = vmatprep.mubr.f32.mxu0 %v9023_v51  ;;  %2885 = vmatprep.mubr.f32.mxu1 %v9023_v51 }
 0x7b2   :  { %2815 = vmatmul.mubr.f32.vlgmr.msra.gmra.mxu0 %v7396_v0  ;;  %2886 = vmatmul.mubr.f32.vlgmr.msra.gmra.mxu1 %v7396_v0 }
 0x7b3   :  { %2986 = vmatpush1.msra.mxu0 %v6994_v7  ;;  %3057 = vmatpush1.msra.mxu1 %v7000_v5 }
 0x7b4   :  { %2987 = vmatprep.subr.mxu0 %v7006_v10  ;;  %3058 = vmatprep.subr.mxu1 %v7012_v39 }
 0x7b5   :  { %2988 = vmatpush1.msra.mxu0 %v7018_v2  ;;  %3059 = vmatpush1.msra.mxu1 %v7024_v42 }
 0x7b6   :  { %2989 = vmatprep.subr.mxu0 %v7030_v4  ;;  %3060 = vmatprep.subr.mxu1 %v7036_v11 }
 0x7b7   :  { %2990 = vmatpush1.msra.mxu0 %v7042_v37  ;;  %3061 = vmatpush1.msra.mxu1 %v7053_v52 }
 0x7b8   :  { %2991 = vmatprep.subr.mxu0 %v7048_v35  ;;  %3062 = vmatprep.subr.mxu1 %v7065_v6 }
 0x7b9   :  { %2992 = vmatpush1.msra.mxu0 %v7060_v33  ;;  %3063 = vmatpush1.msra.mxu1 %v7077_v9 }
 0x7ba   :  { %2993 = vmatprep.subr.mxu0 %v7070_v41  ;;  %3064 = vmatprep.subr.mxu1 %v7087_v12 }
 0x7bb   :  { %2994 = vmatpush1.msra.mxu0 %v7082_v31  ;;  %3065 = vmatpush1.msra.mxu1 %v7099_v15 }
 0x7bc   :  { %2995 = vmatprep.subr.mxu0 %v7094_v14  ;;  %3066 = vmatprep.subr.mxu1 %v7111_v17 }
 0x7bd   :  { %2996 = vmatpush1.msra.mxu0 %v7106_v16  ;;  %3067 = vmatpush1.msra.mxu1 %v7116_v19 }
 0x7be   :  { %2997 = vmatprep.subr.mxu0 %v7123_v21  ;;  %3068 = vmatprep.subr.mxu1 %v7128_v23 }
 0x7bf   :  { %2998 = vmatpush1.msra.mxu0 %v7135_v24  ;;  %3069 = vmatpush1.msra.mxu1 %v7144_v27 }
 0x7c0   :  { %2999 = vmatprep.subr.mxu0 %v7150_v28  ;;  %3070 = vmatprep.subr.mxu1 %v7161_v46 }
 0x7c1   :  { %3000 = vmatpush1.msra.mxu0 %v7156_v34  ;;  %3071 = vmatpush1.msra.mxu1 %v7168_v48 }
 0x7c2   :  { %3001 = vmatprep.subr.mxu0 %v7174_v49  ;;  %3072 = vmatprep.subr.mxu1 %v7185_v54 }
 0x7c3   :  { %3002 = vmatpush1.msra.mxu0 %v7180_v53  ;;  %3073 = vmatpush1.msra.mxu1 %v7192_v55 }
 0x7c4   :  { %3003 = vmatprep.subr.mxu0 %v7198_v56  ;;  %3074 = vmatprep.subr.mxu1 %v7209_v58 }
 0x7c5   :  { %3004 = vmatpush1.msra.mxu0 %v7204_v57  ;;  %3075 = vmatpush1.msra.mxu1 %v7216_v59 }
 0x7c6   :  { %3005 = vmatprep.subr.mxu0 %v7222_v60  ;;  %3076 = vmatprep.subr.mxu1 %v7233_v63 }
 0x7c7   :  { %3006 = vmatpush1.msra.mxu0 %v7228_v61  ;;  %3077 = vmatpush1.msra.mxu1 %v7240_v1 }
 0x7c8   :  { %3007 = vmatprep.subr.mxu0 %v7246_v3  ;;  %3078 = vmatprep.subr.mxu1 %v7257_v13 }
 0x7c9   :  { %3008 = vmatpush1.msra.mxu0 %v9073_v36  ;;  %3079 = vmatpush1.msra.mxu1 %v9074_v20 }
 0x7ca   :  { %3009 = vmatprep.subr.mxu0 %v9075_v45  ;;  %3080 = vmatprep.subr.mxu1 %v9076_v43 }
 0x7cb   :  { %3010 = vmatpush1.msra.mxu0 %v9077_v62  ;;  %3081 = vmatpush1.msra.mxu1 %v9078_v32 }
 0x7cc   :  { %3011 = vmatprep.subr.mxu0 %v9079_v30  ;;  %3082 = vmatprep.subr.mxu1 %v9080_v40 }
 0x7cd   :  { %3012 = vmatpush1.msra.mxu0 %v9081_v8  ;;  %3083 = vmatpush1.msra.mxu1 %v9082_v18  ;;  %v9091_v18 = vld [vmem:[#allocation47_spill] sm:$0xff] }
 0x7ce   :  { %3013 = vmatprep.subr.mxu0 %v9083_v26  ;;  %3084 = vmatprep.subr.mxu1 %v9084_v38  ;;  %v9092_v26 = vld [vmem:[#allocation32_spill] sm:$0xff]  ;;  %v2486_v38 = vpop.f32.mrf.mxu0 }
 0x7cf   :  { %3014 = vmatpush1.msra.mxu0 %v9085_v22  ;;  %3085 = vmatpush1.msra.mxu1 %v9086_v47  ;;  %v2599_v22 = vpop.f32.mrf.mxu1 }
 0x7d0   :  { %3015 = vmatprep.subr.mxu0 %v9087_v25  ;;  %3086 = vmatprep.subr.mxu1 %v9088_v29  ;;  %v2488_v8 = vpop.f32.mrf.mxu0 }
 0x7d1   :  { %3016 = vmatpush1.msra.mxu0 %v9089_v44  ;;  %3049 = vmatprep.mubr.f32.mxu0 %v9023_v51  ;;  %v2601_v47 = vpop.f32.mrf.mxu1 }
 0x7d2   :  { %3087 = vmatpush1.msra.mxu1 %v9090_v50  ;;  %3120 = vmatprep.mubr.f32.mxu1 %v9023_v51  ;;  %v7466_v40 = vpop.f32.mrf.mxu0 }
 0x7d3   :  { %3220 = vmatprep.subr.mxu0 %v9091_v18  ;;  %3291 = vmatprep.subr.mxu1 %v9092_v26  ;;  %9093 = vst [vmem:[#allocation16_spill] sm:$0xff] %v7466_v40  ;;  %v7468_v25 = vpop.f32.mrf.mxu1 }
 0x7d4   :  { %9094 = vst [vmem:[#allocation25_spill] sm:$0xff] %v7468_v25  ;;  %v7470_v29 = vpop.f32.mrf.mxu0 }
 0x7d5   :  { %9095 = vst [vmem:[#allocation17_spill] sm:$0xff] %v7470_v29  ;;  %v7472_v44 = vpop.f32.mrf.mxu1 }
 0x7d6   :  { %9096 = vst [vmem:[#allocation26_spill] sm:$0xff] %v7472_v44  ;;  %v7474_v30 = vpop.f32.mrf.mxu0 }
 0x7d7   :  { %9097 = vst [vmem:[#allocation18_spill] sm:$0xff] %v7474_v30  ;;  %v7476_v50 = vpop.f32.mrf.mxu1 }
 0x7d8   :  { %9098 = vst [vmem:[#allocation52_spill] sm:$0xff] %v7476_v50  ;;  %v7478_v51 = vpop.f32.mrf.mxu0 }
 0x7d9   :  { %9099 = vst [vmem:[#allocation53_spill] sm:$0xff] %v7478_v51  ;;  %v7480_v18 = vpop.f32.mrf.mxu1 }
 0x7da   :  { %9100 = vst [vmem:[#allocation38_spill] sm:$0xff] %v7480_v18  ;;  %v7482_v26 = vpop.f32.mrf.mxu0 }
 0x7db   :  { %9101 = vst [vmem:[#allocation37_spill] sm:$0xff] %v7482_v26  ;;  %v7484_v32 = vpop.f32.mrf.mxu1 }
 0x7dc   :  { %9102 = vst [vmem:[#allocation54_spill] sm:$0xff] %v7484_v32  ;;  %v7486_v62 = vpop.f32.mrf.mxu0 }
 0x7dd   :  { %9103 = vst [vmem:[#allocation55_spill] sm:$0xff] %v7486_v62  ;;  %v7488_v40 = vpop.f32.mrf.mxu1 }
 0x7de   :  { %9104 = vst [vmem:[#allocation40_spill] sm:$0xff] %v7488_v40  ;;  %v7490_v25 = vpop.f32.mrf.mxu0 }
 0x7df   :  { %9105 = vst [vmem:[#allocation39_spill] sm:$0xff] %v7490_v25  ;;  %v7492_v29 = vpop.f32.mrf.mxu1 }
 0x7e0   :  { %9106 = vst [vmem:[#allocation58_spill] sm:$0xff] %v7492_v29  ;;  %v7494_v44 = vpop.f32.mrf.mxu0  ;;  %v2398_v29 = vld [vmem:[%s8641_s7] sm:$0xf] }
 0x7e1   :  { %9107 = vst [vmem:[#allocation8_spill] sm:$0xff] %v7494_v44  ;;  %v7496_v30 = vpop.f32.mrf.mxu1 }
 0x7e2   :  { %9108 = vst [vmem:[#allocation41_spill] sm:$0xff] %v7496_v30  ;;  %v7498_v50 = vpop.f32.mrf.mxu0  ;;  %v9117_v30 = vld [vmem:[#allocation28_spill] sm:$0xff] }
 0x7e3   :  { %9109 = vst [vmem:[#allocation45_spill] sm:$0xff] %v7498_v50  ;;  %v7500_v51 = vpop.f32.mrf.mxu1  ;;  %v9118_v50 = vsub.s32 0, %v9117_v30 }
 0x7e4   :  { %9110 = vst [vmem:[#allocation6_spill] sm:$0xff] %v7500_v51  ;;  %v7502_v18 = vpop.f32.mrf.mxu0 }
 0x7e5   :  { %9111 = vst [vmem:[#allocation56_spill] sm:$0xff] %v7502_v18  ;;  %v7504_v26 = vpop.f32.mrf.mxu1  ;;  %v7519_v40 = vrot.slane %v2398_v29, %v9118_v50  ;;  %v9126_v50 = vsub.s32 3, %v9117_v30 }
 0x7e6   :  { %9112 = vst [vmem:[#allocation43_spill] sm:$0xff] %v7504_v26  ;;  %v7506_v32 = vpop.f32.mrf.mxu0 }
 0x7e7   :  { %9113 = vst [vmem:[#allocation42_spill] sm:$0xff] %v7506_v32  ;;  %v7508_v62 = vpop.f32.mrf.mxu1  ;;  %9119 = vst [vmem:[#allocation28_spill] sm:$0xff] %v7519_v40  ;;  %v9122_v32 = vsub.s32 1, %v9117_v30  ;;  %v7537_v36 = vrot.slane %v2398_v29, %v9126_v50 }
 0x7e8   :  { %9114 = vst [vmem:[#allocation47_spill] sm:$0xff] %v7508_v62  ;;  %v7513_v25 = vpop.f32.mrf.mxu0 }
 0x7e9   :  { %9115 = vst [vmem:[#allocation32_spill] sm:$0xff] %v7513_v25  ;;  %v7515_v44 = vpop.f32.mrf.mxu1  ;;  %v7527_v26 = vrot.slane %v2398_v29, %v9122_v32  ;;  %v2487_v25 = vadd.f32 %v2486_v38, %v7519_v40  ;;  %v2602_v1 = vadd.f32 %v2601_v47, %v7537_v36 }
 0x7ea   :  { %9116 = vst [vmem:[#allocation59_spill] sm:$0xff] %v7515_v44 }
 0x7eb   :  { %9123 = vst [vmem:[#allocation62_spill] sm:$0xff] %v7527_v26  ;;  %v2489_v20 = vadd.f32 %v2488_v8, %v7527_v26 }
 0x86e   :  { %v7521_v51 = vpop.f32.mrf.mxu0  ;;  %v7523_v18 = vpop.f32.mrf.mxu1 }
 0x86f   :  { %9120 = vst [vmem:[#allocation60_spill] sm:$0xff] %v7521_v51  ;;  %9121 = vst [vmem:[#allocation61_spill] sm:$0xff] %v7523_v18 }
 0x870   :  { %v7529_v62 = vpop.f32.mrf.mxu0  ;;  %v7531_v43 = vpop.f32.mrf.mxu1 }
 0x871   :  { %9124 = vst [vmem:[#allocation63_spill] sm:$0xff] %v7529_v62  ;;  %9125 = vst [vmem:[#allocation64_spill] sm:$0xff] %v7531_v43  ;;  %v9127_v43 = vsub.s32 2, %v9117_v30 }
 0x872   :  { %v2816_v45 = vpop.f32.mrf.mxu0  ;;  %v2887_v44 = vpop.f32.mrf.mxu1 }
 0x873   :  { %v2892_v51 = vadd.f32 %v2816_v45, %v2487_v25  ;;  %v7542_v38 = vrot.slane %v2398_v29, %v9127_v43 }
 0x874   :  { %v2818_v18 = vpop.f32.mrf.mxu0  ;;  %v2889_v32 = vpop.f32.mrf.mxu1 }
 0x875   :  { %v2896_v13 = vmul.f32 0.5, %v2892_v51  ;;  %v2893_v3 = vadd.f32 %v2818_v18, %v2489_v20  ;;  %v2895_v40 = vadd.f32 %v2889_v32, %v2602_v1  ;;  %v2600_v8 = vadd.f32 %v2599_v22, %v7542_v38 }
 0x877   :  { %4908 = vtanh.f32 %v2896_v13  ;;  %v2897_v62 = vmul.f32 0.5, %v2893_v3  ;;  %v2894_v50 = vadd.f32 %v2887_v44, %v2600_v8  ;;  %v7548_v3 = vld [vmem:[%s8636_s14 + $0x8] sm:$0xff] }
 0x879   :  { %4910 = vtanh.f32 %v2897_v62  ;;  %v2898_v26 = vmul.f32 0.5, %v2894_v50 }
 0x87a   :  { %4912 = vtanh.f32 %v2895_v40 }
 0x87b   :  { %4914 = vtanh.f32 %v2898_v26  ;;  %v7665_v26 = vld [vmem:[%s8640_s6 + $0x1e0] sm:$0xff] }
 0x884   :  { %v4909_v45 = vpop.eup %4908 }
 0x885   :  { %v2902_v25 = vadd.f32 1.0, %v4909_v45 }
 0x886   :  { %v4911_v51 = vpop.eup %4910 }
 0x887   :  { %v2905_v20 = vmul.f32 0.5, %v2902_v25  ;;  %v2903_v18 = vadd.f32 1.0, %v4911_v51  ;;  %v4913_v43 = vpop.eup %4912 }
 0x888   :  { %v4915_v40 = vpop.eup %4914 }
 0x889   :  { %v2906_v13 = vmul.f32 0.5, %v2903_v18  ;;  %v2910_v62 = vmul.f32 %v4913_v43, %v2905_v20  ;;  %v2904_v22 = vadd.f32 1.0, %v4915_v40 }
 0x88b   :  { %v2909_v1 = vmul.f32 %v7548_v3, %v2906_v13  ;;  %v2907_v47 = vmul.f32 0.5, %v2904_v22  ;;  %v7913_v22 = vld [vmem:[%s8640_s6 + $0x88] sm:$0xff] }
 0x88d   :  { %v7551_v30 = vadd.f32 %v2910_v62, %v2909_v1 }
 0x88f   :  { %4916 = vtanh.f32 %v7551_v30  ;;  %v2915_v1 = vsel %vm5753_vm1, %v7551_v30, %v7548_v3  ;;  %v7653_v3 = vld [vmem:[%s8640_s6 + $0x1e8] sm:$0xff]  ;;  %v7658_v30 = vld [vmem:[%s8640_s6 + $0x1f8] sm:$0xff] }
 0x89c   :  { %v4917_v29 = vpop.eup %4916 }
 0x89d   :  { %v2913_v44 = vmul.f32 %v4917_v29, %v2907_v47 }
 0x89f   :  { %v7557_v32 = vsel %vm5753_vm1, %v2913_v44, %v7396_v0 }
 0x8a0   :  { %9129 = vst [vmem:[#allocation57_spill] sm:$0xff] %v7557_v32  ;;  %3050 = vmatmul.mubr.f32.vlgmr.msra.gmra.mxu0 %v7557_v32  ;;  %3121 = vmatmul.mubr.f32.vlgmr.msra.gmra.mxu1 %v7557_v32 }
 0x8a1   :  { %3221 = vmatpush1.msra.mxu0 %v6994_v7  ;;  %3292 = vmatpush1.msra.mxu1 %v7000_v5  ;;  %v9130_v7 = vld [vmem:[#allocation31_spill] sm:$0xff]  ;;  %v9131_v5 = vld [vmem:[#allocation48_spill] sm:$0xff] }
 0x8a2   :  { %3222 = vmatprep.subr.mxu0 %v7006_v10  ;;  %3293 = vmatprep.subr.mxu1 %v7012_v39  ;;  %v9132_v10 = vld [vmem:[#allocation34_spill] sm:$0xff]  ;;  %v9133_v39 = vld [vmem:[#allocation49_spill] sm:$0xff]  ;;  %9160 = vst [vmem:[#allocation48_spill] sm:$0xff] %v7653_v3 }
 0x8a3   :  { %3223 = vmatpush1.msra.mxu0 %v7018_v2  ;;  %3294 = vmatpush1.msra.mxu1 %v7024_v42  ;;  %v9134_v2 = vld [vmem:[#allocation33_spill] sm:$0xff]  ;;  %9161 = vst [vmem:[#allocation34_spill] sm:$0xff] %v7658_v30 }
 0x8a4   :  { %3224 = vmatprep.subr.mxu0 %v7030_v4  ;;  %3295 = vmatprep.subr.mxu1 %v7036_v11  ;;  %v9135_v42 = vld [vmem:[#allocation9_spill] sm:$0xff]  ;;  %v9136_v4 = vld [vmem:[#allocation50_spill] sm:$0xff] }
 0x8a5   :  { %3225 = vmatpush1.msra.mxu0 %v7042_v37  ;;  %3296 = vmatpush1.msra.mxu1 %v7053_v52  ;;  %v9137_v11 = vld [vmem:[#allocation10_spill] sm:$0xff]  ;;  %v9138_v37 = vld [vmem:[#allocation51_spill] sm:$0xff]  ;;  %9165 = vst [vmem:[#allocation50_spill] sm:$0xff] %v7913_v22 }
 0x8a6   :  { %3226 = vmatprep.subr.mxu0 %v7048_v35  ;;  %3297 = vmatprep.subr.mxu1 %v7065_v6  ;;  %v9139_v35 = vld [vmem:[#allocation36_spill] sm:$0xff]  ;;  %v9140_v52 = vld [vmem:[#allocation19_spill] sm:$0xff] }
 0x8a7   :  { %3227 = vmatpush1.msra.mxu0 %v7060_v33  ;;  %3298 = vmatpush1.msra.mxu1 %v7077_v9  ;;  %v9141_v33 = vld [vmem:[#allocation35_spill] sm:$0xff]  ;;  %v9144_v9 = vld [vmem:[#allocation21_spill] sm:$0xff] }
 0x8a8   :  { %3228 = vmatprep.subr.mxu0 %v7070_v41  ;;  %3299 = vmatprep.subr.mxu1 %v7087_v12  ;;  %v9142_v6 = vld [vmem:[#allocation11_spill] sm:$0xff]  ;;  %v9143_v41 = vld [vmem:[#allocation20_spill] sm:$0xff]  ;;  %v9146_v12 = vld [vmem:[#allocation13_spill] sm:$0xff] }
 0x8a9   :  { %3229 = vmatpush1.msra.mxu0 %v7082_v31  ;;  %3300 = vmatpush1.msra.mxu1 %v7099_v15  ;;  %v9145_v31 = vld [vmem:[#allocation12_spill] sm:$0xff]  ;;  %v9148_v15 = vld [vmem:[#allocation23_spill] sm:$0xff] }
 0x8aa   :  { %3230 = vmatprep.subr.mxu0 %v7094_v14  ;;  %3301 = vmatprep.subr.mxu1 %v7111_v17  ;;  %v9147_v14 = vld [vmem:[#allocation22_spill] sm:$0xff]  ;;  %v9150_v17 = vmov 0.0  }
 0x8ab   :  { %3231 = vmatpush1.msra.mxu0 %v7106_v16  ;;  %3302 = vmatpush1.msra.mxu1 %v7116_v19  ;;  %v9149_v16 = vld [vmem:[#allocation14_spill] sm:$0xff]  ;;  %v9151_v19 = vld [vmem:[#allocation15_spill] sm:$0xff] }
 0x8ac   :  { %3232 = vmatprep.subr.mxu0 %v7123_v21  ;;  %3303 = vmatprep.subr.mxu1 %v7128_v23  ;;  %v9152_v21 = vld [vmem:[#allocation28_spill] sm:$0xff] }
 0x8ad   :  { %3233 = vmatpush1.msra.mxu0 %v7135_v24  ;;  %3304 = vmatpush1.msra.mxu1 %v7144_v27  ;;  %v9153_v23 = vld [vmem:[#allocation16_spill] sm:$0xff] }
 0x8ae   :  { %3234 = vmatprep.subr.mxu0 %v7150_v28  ;;  %3305 = vmatprep.subr.mxu1 %v7161_v46  ;;  %v2493_v24 = vadd.f32 %v9153_v23, %v9152_v21  ;;  %v9155_v46 = vld [vmem:[#allocation17_spill] sm:$0xff]  ;;  %v7737_v23 = vld [vmem:[%s8640_s6 + $0x180] sm:$0xff] }
 0x8af   :  { %3235 = vmatpush1.msra.mxu0 %v7156_v34  ;;  %3306 = vmatpush1.msra.mxu1 %v7168_v48  ;;  %v9154_v34 = vld [vmem:[#allocation62_spill] sm:$0xff] }
 0x8b0   :  { %3236 = vmatprep.subr.mxu0 %v7174_v49  ;;  %3307 = vmatprep.subr.mxu1 %v7185_v54  ;;  %v2495_v48 = vadd.f32 %v9155_v46, %v9154_v34  ;;  %v7761_v46 = vld [vmem:[%s8640_s6 + $0x160] sm:$0xff] }
 0x8b1   :  { %3237 = vmatpush1.msra.mxu0 %v7180_v53  ;;  %3308 = vmatpush1.msra.mxu1 %v7192_v55  ;;  %v9156_v55 = vld [vmem:[#allocation26_spill] sm:$0xff] }
 0x8b2   :  { %3238 = vmatprep.subr.mxu0 %v7198_v56  ;;  %3309 = vmatprep.subr.mxu1 %v7209_v58  ;;  %v2608_v56 = vadd.f32 %v9156_v55, %v7537_v36  ;;  %v7790_v55 = vld [vmem:[%s8640_s6 + $0x150] sm:$0xff] }
 0x8b3   :  { %3239 = vmatpush1.msra.mxu0 %v7204_v57  ;;  %3310 = vmatpush1.msra.mxu1 %v7216_v59 }
 0x8b4   :  { %3240 = vmatprep.subr.mxu0 %v7222_v60  ;;  %3311 = vmatprep.subr.mxu1 %v7233_v63 }
 0x8b5   :  { %3241 = vmatpush1.msra.mxu0 %v7228_v61  ;;  %3312 = vmatpush1.msra.mxu1 %v9130_v7  ;;  %v9157_v61 = vld [vmem:[#allocation25_spill] sm:$0xff] }
 0x8b6   :  { %3242 = vmatprep.subr.mxu0 %v9131_v5  ;;  %3313 = vmatprep.subr.mxu1 %v9132_v10  ;;  %v2606_v63 = vadd.f32 %v9157_v61, %v7542_v38  ;;  %v7826_v61 = vld [vmem:[%s8640_s6 + $0x118] sm:$0xff] }
 0x8b7   :  { %3243 = vmatpush1.msra.mxu0 %v9133_v39  ;;  %3314 = vmatpush1.msra.mxu1 %v9134_v2  ;;  %v7670_v2 = vld [vmem:[%s8640_s6 + $0x1f0] sm:$0xff] }
 0x8b8   :  { %3244 = vmatprep.subr.mxu0 %v9135_v42  ;;  %3315 = vmatprep.subr.mxu1 %v9136_v4  ;;  %v7677_v42 = vld [vmem:[%s8640_s6 + $0x1c8] sm:$0xff]  ;;  %v7682_v4 = vld [vmem:[%s8640_s6 + $0x1d8] sm:$0xff] }
 0x8b9   :  { %3245 = vmatpush1.msra.mxu0 %v9137_v11  ;;  %3316 = vmatpush1.msra.mxu1 %v9138_v37  ;;  %v7689_v11 = vld [vmem:[%s8640_s6 + $0x1c0] sm:$0xff]  ;;  %v7694_v37 = vld [vmem:[%s8640_s6 + $0x1d0] sm:$0xff] }
 0x8ba   :  { %3246 = vmatprep.subr.mxu0 %v9139_v35  ;;  %3317 = vmatprep.subr.mxu1 %v9140_v52  ;;  %v7701_v35 = vld [vmem:[%s8640_s6 + $0x1a8] sm:$0xff]  ;;  %v7706_v52 = vld [vmem:[%s8640_s6 + $0x1b8] sm:$0xff] }
 0x8bb   :  { %3247 = vmatpush1.msra.mxu0 %v9141_v33  ;;  %3318 = vmatpush1.msra.mxu1 %v9142_v6  ;;  %v7713_v33 = vld [vmem:[%s8640_s6 + $0x1a0] sm:$0xff]  ;;  %v7718_v6 = vld [vmem:[%s8640_s6 + $0x1b0] sm:$0xff] }
 0x8bc   :  { %3248 = vmatprep.subr.mxu0 %v9143_v41  ;;  %3319 = vmatprep.subr.mxu1 %v9144_v9  ;;  %v7725_v41 = vld [vmem:[%s8640_s6 + $0x188] sm:$0xff] }
 0x8bd   :  { %3249 = vmatpush1.msra.mxu0 %v9145_v31  ;;  %3320 = vmatpush1.msra.mxu1 %v9146_v12  ;;  %v7730_v31 = vld [vmem:[%s8640_s6 + $0x198] sm:$0xff] }
 0x8be   :  { %3250 = vmatprep.subr.mxu0 %v9147_v14  ;;  %3321 = vmatprep.subr.mxu1 %v9148_v15 }
 0x8bf   :  { %3251 = vmatpush1.msra.mxu0 %v9149_v16  ;;  %3284 = vmatprep.mubr.f32.mxu0 %v9150_v17 }
 0x8c0   :  { %3322 = vmatpush1.msra.mxu1 %v9151_v19  ;;  %3355 = vmatprep.mubr.f32.mxu1 %v9150_v17 }
 0x8c1   :  { %3455 = vmatprep.subr.mxu0 %v7653_v3  ;;  %3526 = vmatprep.subr.mxu1 %v7658_v30 }
 0x960   :  { %v3051_v27 = vpop.f32.mrf.mxu0  ;;  %v3122_v28 = vpop.f32.mrf.mxu1 }
 0x961   :  { %v3127_v49 = vadd.f32 %v3051_v27, %v2493_v24  ;;  %v3129_v0 = vadd.f32 %v3122_v28, %v2606_v63  ;;  %v7742_v24 = vld [vmem:[%s8640_s6 + $0x190] sm:$0xff]  ;;  %v7749_v27 = vld [vmem:[%s8640_s6 + $0x168] sm:$0xff]  ;;  %v7754_v28 = vld [vmem:[%s8640_s6 + $0x178] sm:$0xff] }
 0x962   :  { %v3053_v53 = vpop.f32.mrf.mxu0  ;;  %v3124_v54 = vpop.f32.mrf.mxu1  ;;  %v7831_v63 = vld [vmem:[%s8640_s6 + $0x100] sm:$0xff] }
 0x963   :  { %v3131_v57 = vmul.f32 0.5, %v3127_v49  ;;  %v3128_v58 = vadd.f32 %v3053_v53, %v2495_v48  ;;  %v3130_v60 = vadd.f32 %v3124_v54, %v2608_v56  ;;  %v3133_v8 = vmul.f32 0.5, %v3129_v0  ;;  %v7766_v48 = vld [vmem:[%s8640_s6 + $0x170] sm:$0xff]  ;;  %v7773_v49 = vld [vmem:[%s8640_s6 + $0x148] sm:$0xff]  ;;  %v7778_v53 = vld [vmem:[%s8640_s6 + $0x158] sm:$0xff] }
 0x964   :  { %v7785_v54 = vld [vmem:[%s8640_s6 + $0x140] sm:$0xff]  ;;  %v7797_v56 = vld [vmem:[%s8640_s6 + $0x128] sm:$0xff]  ;;  %v7836_v0 = vld [vmem:[%s8640_s6 + $0x110] sm:$0xff] }
 0x965   :  { %4918 = vtanh.f32 %v3131_v57  ;;  %v3132_v59 = vmul.f32 0.5, %v3128_v58  ;;  %v7802_v57 = vld [vmem:[%s8640_s6 + $0x138] sm:$0xff]  ;;  %v7809_v58 = vld [vmem:[%s8640_s6 + $0x120] sm:$0xff] }
 0x967   :  { %4920 = vtanh.f32 %v3132_v59  ;;  %v7814_v59 = vld [vmem:[%s8640_s6 + $0x130] sm:$0xff] }
 0x968   :  { %4922 = vtanh.f32 %v3130_v60  ;;  %v7819_v60 = vld [vmem:[%s8640_s6 + $0x108] sm:$0xff] }
 0x969   :  { %4924 = vtanh.f32 %v3133_v8  ;;  %v7843_v8 = vld [vmem:[%s8640_s6 + $0xe8] sm:$0xff] }
 0x972   :  { %v4919_v50 = vpop.eup %4918 }
 0x973   :  { %v3137_v45 = vadd.f32 1.0, %v4919_v50  ;;  %v7848_v50 = vld [vmem:[%s8640_s6 + $0xf8] sm:$0xff] }
 0x974   :  { %v4921_v25 = vpop.eup %4920 }
 0x975   :  { %v3140_v51 = vmul.f32 0.5, %v3137_v45  ;;  %v3138_v20 = vadd.f32 1.0, %v4921_v25  ;;  %v4923_v18 = vpop.eup %4922  ;;  %v7853_v45 = vld [vmem:[%s8640_s6 + $0xe0] sm:$0xff]  ;;  %v7860_v25 = vld [vmem:[%s8640_s6 + $0xf0] sm:$0xff] }
 0x976   :  { %v4925_v29 = vpop.eup %4924 }
 0x977   :  { %v3141_v13 = vmul.f32 0.5, %v3138_v20  ;;  %v3145_v43 = vmul.f32 %v4923_v18, %v3140_v51  ;;  %v3139_v44 = vadd.f32 1.0, %v4925_v29  ;;  %v7865_v51 = vld [vmem:[%s8640_s6 + $0xc8] sm:$0xff]  ;;  %v7870_v20 = vld [vmem:[%s8640_s6 + $0xd8] sm:$0xff]  ;;  %v7877_v18 = vld [vmem:[%s8640_s6 + $0xc0] sm:$0xff] }
 0x978   :  { %v7918_v29 = vld [vmem:[%s8640_s6 + $0x98] sm:$0xff] }
 0x979   :  { %v3144_v62 = vmul.f32 %v3141_v13, %v2915_v1  ;;  %v3142_v7 = vmul.f32 0.5, %v3139_v44  ;;  %v7882_v13 = vld [vmem:[%s8640_s6 + $0xd0] sm:$0xff]  ;;  %9166 = vst [vmem:[#allocation10_spill] sm:$0xff] %v7918_v29  ;;  %v7925_v44 = vld [vmem:[%s8640_s6 + $0x80] sm:$0xff] }
 0x97a   :  { %9167 = vst [vmem:[#allocation51_spill] sm:$0xff] %v7925_v44 }
 0x97b   :  { %v3146_v40 = vadd.f32 %v3145_v43, %v3144_v62  ;;  %v7889_v43 = vld [vmem:[%s8640_s6 + $0xa8] sm:$0xff]  ;;  %v7901_v62 = vld [vmem:[%s8640_s6 + $0xa0] sm:$0xff] }
 0x97c   :  { %9163 = vst [vmem:[#allocation33_spill] sm:$0xff] %v7901_v62 }
 0x97d   :  { %4926 = vtanh.f32 %v3146_v40  ;;  %v7639_v47 = vsel %vm5844_vm2, %v3146_v40, %v2915_v1  ;;  %v7894_v1 = vld [vmem:[%s8640_s6 + $0xb8] sm:$0xff]  ;;  %v7906_v40 = vld [vmem:[%s8640_s6 + $0xb0] sm:$0xff] }
 0x97e   :  { %9162 = vst [vmem:[#allocation49_spill] sm:$0xff] %v7894_v1  ;;  %9164 = vst [vmem:[#allocation9_spill] sm:$0xff] %v7906_v40 }
 0x98a   :  { %v4927_v5 = vpop.eup %4926 }
 0x98b   :  { %v3148_v10 = vmul.f32 %v4927_v5, %v3142_v7  ;;  %v7930_v7 = vld [vmem:[%s8640_s6 + $0x90] sm:$0xff]  ;;  %v7937_v5 = vld [vmem:[%s8640_s6 + $0x68] sm:$0xff] }
 0x98c   :  { %9168 = vst [vmem:[#allocation36_spill] sm:$0xff] %v7930_v7  ;;  %9169 = vst [vmem:[#allocation19_spill] sm:$0xff] %v7937_v5 }
 0x98d   :  { %v7644_v39 = vsel %vm5844_vm2, %v3148_v10, %v7557_v32  ;;  %v7942_v10 = vld [vmem:[%s8640_s6 + $0x78] sm:$0xff]  ;;  %v7949_v32 = vld [vmem:[%s8640_s6 + $0x60] sm:$0xff] }
 0x98e   :  { %9159 = vst [vmem:[#allocation31_spill] sm:$0xff] %v7644_v39  ;;  %3285 = vmatmul.mubr.f32.vlgmr.msra.gmra.mxu0 %v7644_v39  ;;  %3356 = vmatmul.mubr.f32.vlgmr.msra.gmra.mxu1 %v7644_v39  ;;  %9170 = vst [vmem:[#allocation35_spill] sm:$0xff] %v7942_v10 }
 0x98f   :  { %3519 = vmatprep.mubr.f32.mxu0 %v9150_v17  ;;  %3590 = vmatprep.mubr.f32.mxu1 %v9150_v17  ;;  %9171 = vst [vmem:[#allocation11_spill] sm:$0xff] %v7949_v32  ;;  %v7954_v17 = vld [vmem:[%s8640_s6 + $0x70] sm:$0xff] }
 0x990   :  { %3456 = vmatpush1.msra.mxu0 %v7665_v26  ;;  %3527 = vmatpush1.msra.mxu1 %v7670_v2  ;;  %9172 = vst [vmem:[#allocation20_spill] sm:$0xff] %v7954_v17 }
 0x991   :  { %3457 = vmatprep.subr.mxu0 %v7677_v42  ;;  %3528 = vmatprep.subr.mxu1 %v7682_v4 }
 0x992   :  { %3458 = vmatpush1.msra.mxu0 %v7689_v11  ;;  %3529 = vmatpush1.msra.mxu1 %v7694_v37 }
 0x993   :  { %3459 = vmatprep.subr.mxu0 %v7701_v35  ;;  %3530 = vmatprep.subr.mxu1 %v7706_v52 }
 0x994   :  { %3460 = vmatpush1.msra.mxu0 %v7713_v33  ;;  %3531 = vmatpush1.msra.mxu1 %v7718_v6 }
 0x995   :  { %3461 = vmatprep.subr.mxu0 %v7725_v41  ;;  %3532 = vmatprep.subr.mxu1 %v7730_v31 }
 0x996   :  { %3462 = vmatpush1.msra.mxu0 %v7737_v23  ;;  %3533 = vmatpush1.msra.mxu1 %v7742_v24 }
 0x997   :  { %3463 = vmatprep.subr.mxu0 %v7749_v27  ;;  %3534 = vmatprep.subr.mxu1 %v7754_v28 }
 0x998   :  { %3464 = vmatpush1.msra.mxu0 %v7761_v46  ;;  %3535 = vmatpush1.msra.mxu1 %v7766_v48 }
 0x999   :  { %3465 = vmatprep.subr.mxu0 %v7773_v49  ;;  %3536 = vmatprep.subr.mxu1 %v7778_v53 }
 0x99a   :  { %3466 = vmatpush1.msra.mxu0 %v7785_v54  ;;  %3537 = vmatpush1.msra.mxu1 %v7790_v55 }
 0x99b   :  { %3467 = vmatprep.subr.mxu0 %v7797_v56  ;;  %3538 = vmatprep.subr.mxu1 %v7802_v57 }
 0x99c   :  { %3468 = vmatpush1.msra.mxu0 %v7809_v58  ;;  %3539 = vmatpush1.msra.mxu1 %v7814_v59 }
 0x99d   :  { %3469 = vmatprep.subr.mxu0 %v7819_v60  ;;  %3540 = vmatprep.subr.mxu1 %v7826_v61 }
 0x99e   :  { %3470 = vmatpush1.msra.mxu0 %v7831_v63  ;;  %3541 = vmatpush1.msra.mxu1 %v7836_v0 }
 0x99f   :  { %3471 = vmatprep.subr.mxu0 %v7843_v8  ;;  %3542 = vmatprep.subr.mxu1 %v7848_v50 }
 0x9a0   :  { %3472 = vmatpush1.msra.mxu0 %v7853_v45  ;;  %3543 = vmatpush1.msra.mxu1 %v7860_v25 }
 0x9a1   :  { %3473 = vmatprep.subr.mxu0 %v7865_v51  ;;  %3544 = vmatprep.subr.mxu1 %v7870_v20 }
 0x9a2   :  { %3474 = vmatpush1.msra.mxu0 %v7877_v18  ;;  %3545 = vmatpush1.msra.mxu1 %v7882_v13 }
 0x9a3   :  { %3475 = vmatprep.subr.mxu0 %v7889_v43  ;;  %3546 = vmatprep.subr.mxu1 %v7894_v1 }
 0x9a4   :  { %3476 = vmatpush1.msra.mxu0 %v7901_v62  ;;  %3547 = vmatpush1.msra.mxu1 %v7906_v40 }
 0x9a5   :  { %3477 = vmatprep.subr.mxu0 %v7913_v22  ;;  %3548 = vmatprep.subr.mxu1 %v7918_v29  ;;  %v7961_v22 = vld [vmem:[%s8640_s6 + $0x48] sm:$0xff]  ;;  %v7966_v29 = vld [vmem:[%s8640_s6 + $0x58] sm:$0xff] }
 0x9a6   :  { %3478 = vmatpush1.msra.mxu0 %v7925_v44  ;;  %3549 = vmatpush1.msra.mxu1 %v7930_v7  ;;  %9173 = vst [vmem:[#allocation21_spill] sm:$0xff] %v7961_v22  ;;  %9174 = vst [vmem:[#allocation12_spill] sm:$0xff] %v7966_v29  ;;  %v7973_v44 = vld [vmem:[%s8640_s6 + $0x40] sm:$0xff]  ;;  %v7978_v7 = vld [vmem:[%s8640_s6 + $0x50] sm:$0xff] }
 0x9a7   :  { %3479 = vmatprep.subr.mxu0 %v7937_v5  ;;  %3550 = vmatprep.subr.mxu1 %v7942_v10  ;;  %9175 = vst [vmem:[#allocation13_spill] sm:$0xff] %v7973_v44  ;;  %9176 = vst [vmem:[#allocation22_spill] sm:$0xff] %v7978_v7  ;;  %v7985_v5 = vld [vmem:[%s8640_s6 + $0x28] sm:$0xff]  ;;  %v7992_v10 = vld [vmem:[%s8640_s6 + $0x20] sm:$0xff] }
 0x9a8   :  { %3480 = vmatpush1.msra.mxu0 %v7949_v32  ;;  %3551 = vmatpush1.msra.mxu1 %v7954_v17  ;;  %9177 = vst [vmem:[#allocation23_spill] sm:$0xff] %v7985_v5  ;;  %9178 = vst [vmem:[#allocation14_spill] sm:$0xff] %v7992_v10 }
 0x9a9   :  { %3481 = vmatprep.subr.mxu0 %v7961_v22  ;;  %3552 = vmatprep.subr.mxu1 %v7966_v29 }
 0x9aa   :  { %3482 = vmatpush1.msra.mxu0 %v7973_v44  ;;  %3553 = vmatpush1.msra.mxu1 %v7978_v7 }
 0x9ab   :  { %3483 = vmatprep.subr.mxu0 %v7985_v5  ;;  %3554 = vmatprep.subr.mxu1 %v9144_v9  ;;  %v9179_v5 = vld [vmem:[#allocation18_spill] sm:$0xff] }
 0x9ac   :  { %3484 = vmatpush1.msra.mxu0 %v7992_v10  ;;  %3555 = vmatpush1.msra.mxu1 %v9146_v12  ;;  %v2499_v7 = vadd.f32 %v9179_v5, %v9152_v21  ;;  %v9180_v10 = vld [vmem:[#allocation53_spill] sm:$0xff]  ;;  %v9182_v5 = vld [vmem:[#allocation52_spill] sm:$0xff] }
 0x9ad   :  { %3485 = vmatprep.subr.mxu0 %v9147_v14  ;;  %3556 = vmatprep.subr.mxu1 %v9148_v15  ;;  %v2501_v12 = vadd.f32 %v9180_v10, %v9154_v34  ;;  %v9181_v15 = vld [vmem:[#allocation38_spill] sm:$0xff]  ;;  %v2612_v21 = vadd.f32 %v9182_v5, %v7542_v38  ;;  %v9191_v5 = vld [vmem:[#allocation36_spill] sm:$0xff] }
 0x9ae   :  { %3486 = vmatpush1.msra.mxu0 %v9149_v16  ;;  %3557 = vmatpush1.msra.mxu1 %v9151_v19  ;;  %v2614_v16 = vadd.f32 %v9181_v15, %v7537_v36 }
 0x9af   :  { %3690 = vmatprep.subr.mxu0 %v7653_v3  ;;  %3761 = vmatprep.subr.mxu1 %v7658_v30 }
 0xa4e   :  { %v3286_v9 = vpop.f32.mrf.mxu0  ;;  %v3357_v44 = vpop.f32.mrf.mxu1 }
 0xa4f   :  { %v3362_v29 = vadd.f32 %v3286_v9, %v2499_v7  ;;  %v3364_v30 = vadd.f32 %v3357_v44, %v2612_v21 }
 0xa50   :  { %v3288_v14 = vpop.f32.mrf.mxu0  ;;  %v3359_v22 = vpop.f32.mrf.mxu1 }
 0xa51   :  { %v3366_v17 = vmul.f32 0.5, %v3362_v29  ;;  %v3363_v19 = vadd.f32 %v3288_v14, %v2501_v12  ;;  %v3365_v32 = vadd.f32 %v3359_v22, %v2614_v16  ;;  %v3368_v40 = vmul.f32 0.5, %v3364_v30  ;;  %v9188_v14 = vld [vmem:[#allocation50_spill] sm:$0xff] }
 0xa52   :  { %v9189_v16 = vld [vmem:[#allocation10_spill] sm:$0xff] }
 0xa53   :  { %4928 = vtanh.f32 %v3366_v17  ;;  %v3367_v3 = vmul.f32 0.5, %v3363_v19  ;;  %v9190_v19 = vld [vmem:[#allocation51_spill] sm:$0xff] }
 0xa55   :  { %4930 = vtanh.f32 %v3367_v3 }
 0xa56   :  { %4932 = vtanh.f32 %v3365_v32  ;;  %v9199_v32 = vld [vmem:[#allocation22_spill] sm:$0xff] }
 0xa57   :  { %4934 = vtanh.f32 %v3368_v40 }
 0xa60   :  { %v4929_v62 = vpop.eup %4928 }
 0xa61   :  { %v3372_v10 = vadd.f32 1.0, %v4929_v62 }
 0xa62   :  { %v4931_v7 = vpop.eup %4930 }
 0xa63   :  { %v3375_v9 = vmul.f32 0.5, %v3372_v10  ;;  %v3373_v34 = vadd.f32 1.0, %v4931_v7  ;;  %v4933_v1 = vpop.eup %4932  ;;  %v9192_v10 = vld [vmem:[#allocation19_spill] sm:$0xff] }
 0xa64   :  { %v4935_v21 = vpop.eup %4934  ;;  %v9193_v7 = vld [vmem:[#allocation35_spill] sm:$0xff] }
 0xa65   :  { %v3376_v15 = vmul.f32 0.5, %v3373_v34  ;;  %v3380_v29 = vmul.f32 %v4933_v1, %v3375_v9  ;;  %v3374_v30 = vadd.f32 1.0, %v4935_v21  ;;  %v9185_v34 = vld [vmem:[#allocation49_spill] sm:$0xff]  ;;  %v9194_v9 = vld [vmem:[#allocation11_spill] sm:$0xff] }
 0xa66   :  { %v9187_v1 = vld [vmem:[#allocation9_spill] sm:$0xff]  ;;  %v9200_v21 = vld [vmem:[#allocation23_spill] sm:$0xff] }
 0xa67   :  { %v3379_v17 = vmul.f32 %v3376_v15, %v7639_v47  ;;  %v3377_v22 = vmul.f32 0.5, %v3374_v30  ;;  %v9195_v15 = vld [vmem:[#allocation20_spill] sm:$0xff]  ;;  %v9201_v30 = vmov 0.0  }
 0xa69   :  { %v3381_v12 = vadd.f32 %v3380_v29, %v3379_v17  ;;  %v9196_v29 = vld [vmem:[#allocation21_spill] sm:$0xff]  ;;  %v9197_v17 = vld [vmem:[#allocation12_spill] sm:$0xff] }
 0xa6b   :  { %4936 = vtanh.f32 %v3381_v12  ;;  %v8018_v3 = vsel %vm6256_vm3, %v3381_v12, %v7639_v47  ;;  %v9186_v47 = vld [vmem:[#allocation33_spill] sm:$0xff] }
 0xa6c   :  { %v9198_v12 = vld [vmem:[#allocation13_spill] sm:$0xff] }
 0xa78   :  { %v4937_v62 = vpop.eup %4936 }
 0xa79   :  { %v3383_v44 = vmul.f32 %v4937_v62, %v3377_v22  ;;  %v9202_v22 = vld [vmem:[#allocation14_spill] sm:$0xff]  ;;  %v8088_v62 = vld [vmem:[%s8640_s6 + $0x38] sm:$0xff] }
 0xa7a   :  { %9203 = vst [vmem:[#allocation16_spill] sm:$0xff] %v8088_v62 }
 0xa7b   :  { %v8023_v40 = vsel %vm6256_vm3, %v3383_v44, %v7644_v39  ;;  %v8093_v44 = vld [vmem:[%s8640_s6 + $0x30] sm:$0xff]  ;;  %v8098_v39 = vld [vmem:[%s8640_s6 + $0x8] sm:$0xff] }
 0xa7c   :  { %9184 = vst [vmem:[#allocation15_spill] sm:$0xff] %v8023_v40  ;;  %3520 = vmatmul.mubr.f32.vlgmr.msra.gmra.mxu0 %v8023_v40  ;;  %3591 = vmatmul.mubr.f32.vlgmr.msra.gmra.mxu1 %v8023_v40  ;;  %9204 = vst [vmem:[#allocation17_spill] sm:$0xff] %v8093_v44 }
 0xa7d   :  { %3691 = vmatpush1.msra.mxu0 %v7665_v26  ;;  %3762 = vmatpush1.msra.mxu1 %v7670_v2  ;;  %9205 = vst [vmem:[#allocation26_spill] sm:$0xff] %v8098_v39 }
 0xa7e   :  { %3692 = vmatprep.subr.mxu0 %v7677_v42  ;;  %3763 = vmatprep.subr.mxu1 %v7682_v4 }
 0xa7f   :  { %3693 = vmatpush1.msra.mxu0 %v7689_v11  ;;  %3764 = vmatpush1.msra.mxu1 %v7694_v37 }
 0xa80   :  { %3694 = vmatprep.subr.mxu0 %v7701_v35  ;;  %3765 = vmatprep.subr.mxu1 %v7706_v52 }
 0xa81   :  { %3695 = vmatpush1.msra.mxu0 %v7713_v33  ;;  %3766 = vmatpush1.msra.mxu1 %v7718_v6 }
 0xa82   :  { %3696 = vmatprep.subr.mxu0 %v7725_v41  ;;  %3767 = vmatprep.subr.mxu1 %v7730_v31 }
 0xa83   :  { %3697 = vmatpush1.msra.mxu0 %v7737_v23  ;;  %3768 = vmatpush1.msra.mxu1 %v7742_v24 }
 0xa84   :  { %3698 = vmatprep.subr.mxu0 %v7749_v27  ;;  %3769 = vmatprep.subr.mxu1 %v7754_v28 }
 0xa85   :  { %3699 = vmatpush1.msra.mxu0 %v7761_v46  ;;  %3770 = vmatpush1.msra.mxu1 %v7766_v48 }
 0xa86   :  { %3700 = vmatprep.subr.mxu0 %v7773_v49  ;;  %3771 = vmatprep.subr.mxu1 %v7778_v53 }
 0xa87   :  { %3701 = vmatpush1.msra.mxu0 %v7785_v54  ;;  %3772 = vmatpush1.msra.mxu1 %v7790_v55 }
 0xa88   :  { %3702 = vmatprep.subr.mxu0 %v7797_v56  ;;  %3773 = vmatprep.subr.mxu1 %v7802_v57 }
 0xa89   :  { %3703 = vmatpush1.msra.mxu0 %v7809_v58  ;;  %3774 = vmatpush1.msra.mxu1 %v7814_v59 }
 0xa8a   :  { %3704 = vmatprep.subr.mxu0 %v7819_v60  ;;  %3775 = vmatprep.subr.mxu1 %v7826_v61 }
 0xa8b   :  { %3705 = vmatpush1.msra.mxu0 %v7831_v63  ;;  %3776 = vmatpush1.msra.mxu1 %v7836_v0 }
 0xa8c   :  { %3706 = vmatprep.subr.mxu0 %v7843_v8  ;;  %3777 = vmatprep.subr.mxu1 %v7848_v50 }
 0xa8d   :  { %3707 = vmatpush1.msra.mxu0 %v7853_v45  ;;  %3778 = vmatpush1.msra.mxu1 %v7860_v25 }
 0xa8e   :  { %3708 = vmatprep.subr.mxu0 %v7865_v51  ;;  %3779 = vmatprep.subr.mxu1 %v7870_v20 }
 0xa8f   :  { %3709 = vmatpush1.msra.mxu0 %v7877_v18  ;;  %3780 = vmatpush1.msra.mxu1 %v7882_v13 }
 0xa90   :  { %3710 = vmatprep.subr.mxu0 %v7889_v43  ;;  %3781 = vmatprep.subr.mxu1 %v9185_v34 }
 0xa91   :  { %3711 = vmatpush1.msra.mxu0 %v9186_v47  ;;  %3782 = vmatpush1.msra.mxu1 %v9187_v1 }
 0xa92   :  { %3712 = vmatprep.subr.mxu0 %v9188_v14  ;;  %3783 = vmatprep.subr.mxu1 %v9189_v16 }
 0xa93   :  { %3713 = vmatpush1.msra.mxu0 %v9190_v19  ;;  %3784 = vmatpush1.msra.mxu1 %v9191_v5 }
 0xa94   :  { %3714 = vmatprep.subr.mxu0 %v9192_v10  ;;  %3785 = vmatprep.subr.mxu1 %v9193_v7  ;;  %v9214_v7 = vld [vmem:[#allocation55_spill] sm:$0xff] }
 0xa95   :  { %3715 = vmatpush1.msra.mxu0 %v9194_v9  ;;  %3786 = vmatpush1.msra.mxu1 %v9195_v15  ;;  %v9213_v9 = vld [vmem:[#allocation62_spill] sm:$0xff] }
 0xa96   :  { %3716 = vmatprep.subr.mxu0 %v9196_v29  ;;  %3787 = vmatprep.subr.mxu1 %v9197_v17  ;;  %v2507_v10 = vadd.f32 %v9214_v7, %v9213_v9 }
 0xa97   :  { %3717 = vmatpush1.msra.mxu0 %v9198_v12  ;;  %3788 = vmatpush1.msra.mxu1 %v9199_v32  ;;  %v9211_v32 = vld [vmem:[#allocation28_spill] sm:$0xff]  ;;  %v9212_v12 = vld [vmem:[#allocation37_spill] sm:$0xff] }
 0xa98   :  { %3718 = vmatprep.subr.mxu0 %v9200_v21  ;;  %3754 = vmatprep.mubr.f32.mxu0 %v9201_v30  ;;  %v8115_v21 = vld [vmem:[%s8640_s6 + $0x10] sm:$0xff]  ;;  %v2505_v17 = vadd.f32 %v9212_v12, %v9211_v32  ;;  %v9216_v12 = vld [vmem:[#allocation54_spill] sm:$0xff] }
 0xa99   :  { %3719 = vmatpush1.msra.mxu0 %v9202_v22  ;;  %3825 = vmatprep.mubr.f32.mxu1 %v9201_v30  ;;  %v8105_v30 = vld [vmem:[%s8640_s6 + $0x18] sm:$0xff]  ;;  %v8110_v22 = vld [vmem:[%s8640_s6] sm:$0xff]  ;;  %9208 = vst [vmem:[#allocation18_spill] sm:$0xff] %v8115_v21  ;;  %v2618_v32 = vadd.f32 %v9216_v12, %v7542_v38  ;;  %v9224_v12 = vld [vmem:[#allocation36_spill] sm:$0xff] }
 0xa9a   :  { %3789 = vmatprep.subr.mxu1 %v8088_v62  ;;  %3720 = vmatprep.subr.mxu0 %v8098_v39  ;;  %9206 = vst [vmem:[#allocation25_spill] sm:$0xff] %v8105_v30  ;;  %9207 = vst [vmem:[#allocation7_spill] sm:$0xff] %v8110_v22  ;;  %v9209_v39 = vld [vmem:[#allocation48_spill] sm:$0xff]  ;;  %v9210_v62 = vld [vmem:[#allocation34_spill] sm:$0xff] }
 0xa9b   :  { %3790 = vmatpush1.msra.mxu1 %v8093_v44  ;;  %3721 = vmatpush1.msra.mxu0 %v8110_v22  ;;  %v9215_v22 = vld [vmem:[#allocation40_spill] sm:$0xff] }
 0xa9c   :  { %3791 = vmatprep.subr.mxu1 %v8105_v30  ;;  %3925 = vmatprep.subr.mxu0 %v9209_v39  ;;  %v2620_v30 = vadd.f32 %v9215_v22, %v7537_v36 }
 0xa9d   :  { %3792 = vmatpush1.msra.mxu1 %v8115_v21 }
 0xa9e   :  { %3996 = vmatprep.subr.mxu1 %v9210_v62 }
 0xb3c   :  { %v3521_v29 = vpop.f32.mrf.mxu0  ;;  %v3592_v15 = vpop.f32.mrf.mxu1 }
 0xb3d   :  { %v3597_v5 = vadd.f32 %v3521_v29, %v2505_v17  ;;  %v3599_v62 = vadd.f32 %v3592_v15, %v2618_v32 }
 0xb3e   :  { %v3523_v44 = vpop.f32.mrf.mxu0  ;;  %v3594_v19 = vpop.f32.mrf.mxu1 }
 0xb3f   :  { %v3601_v16 = vmul.f32 0.5, %v3597_v5  ;;  %v3598_v39 = vadd.f32 %v3523_v44, %v2507_v10  ;;  %v3600_v14 = vadd.f32 %v3594_v19, %v2620_v30  ;;  %v3603_v1 = vmul.f32 0.5, %v3599_v62  ;;  %v9221_v30 = vld [vmem:[#allocation50_spill] sm:$0xff]  ;;  %v9223_v44 = vld [vmem:[#allocation51_spill] sm:$0xff] }
 0xb40   :  { %v9222_v62 = vld [vmem:[#allocation10_spill] sm:$0xff] }
 0xb41   :  { %4938 = vtanh.f32 %v3601_v16  ;;  %v3602_v21 = vmul.f32 0.5, %v3598_v39 }
 0xb43   :  { %4940 = vtanh.f32 %v3602_v21 }
 0xb44   :  { %4942 = vtanh.f32 %v3600_v14  ;;  %v9232_v14 = vld [vmem:[#allocation22_spill] sm:$0xff] }
 0xb45   :  { %4944 = vtanh.f32 %v3603_v1 }
 0xb4e   :  { %v4939_v47 = vpop.eup %4938 }
 0xb4f   :  { %v3607_v7 = vadd.f32 1.0, %v4939_v47 }
 0xb50   :  { %v4941_v29 = vpop.eup %4940 }
 0xb51   :  { %v3610_v17 = vmul.f32 0.5, %v3607_v7  ;;  %v3608_v9 = vadd.f32 1.0, %v4941_v29  ;;  %v4943_v34 = vpop.eup %4942  ;;  %v9225_v7 = vld [vmem:[#allocation19_spill] sm:$0xff] }
 0xb52   :  { %v4945_v10 = vpop.eup %4944  ;;  %v9226_v29 = vld [vmem:[#allocation35_spill] sm:$0xff] }
 0xb53   :  { %v3611_v22 = vmul.f32 0.5, %v3608_v9  ;;  %v3615_v5 = vmul.f32 %v4943_v34, %v3610_v17  ;;  %v3609_v15 = vadd.f32 1.0, %v4945_v10  ;;  %v9219_v34 = vld [vmem:[#allocation33_spill] sm:$0xff]  ;;  %v9227_v17 = vld [vmem:[#allocation11_spill] sm:$0xff] }
 0xb54   :  { %v9220_v9 = vld [vmem:[#allocation9_spill] sm:$0xff]  ;;  %v9233_v10 = vld [vmem:[#allocation23_spill] sm:$0xff] }
 0xb55   :  { %v3614_v16 = vmul.f32 %v3611_v22, %v8018_v3  ;;  %v3612_v32 = vmul.f32 0.5, %v3609_v15  ;;  %v9228_v22 = vld [vmem:[#allocation20_spill] sm:$0xff] }
 0xb56   :  { %v9234_v15 = vld [vmem:[#allocation16_spill] sm:$0xff] }
 0xb57   :  { %v3616_v39 = vadd.f32 %v3615_v5, %v3614_v16  ;;  %v9229_v5 = vld [vmem:[#allocation21_spill] sm:$0xff]  ;;  %v9230_v16 = vld [vmem:[#allocation12_spill] sm:$0xff] }
 0xb59   :  { %4946 = vtanh.f32 %v3616_v39  ;;  %v8135_v19 = vsel %vm6346_vm4, %v3616_v39, %v8018_v3  ;;  %v9218_v3 = vld [vmem:[#allocation49_spill] sm:$0xff] }
 0xb5a   :  { %v9231_v39 = vld [vmem:[#allocation13_spill] sm:$0xff] }
 0xb66   :  { %v4947_v47 = vpop.eup %4946 }
 0xb67   :  { %v3618_v21 = vmul.f32 %v4947_v47, %v3612_v32  ;;  %v9235_v32 = vld [vmem:[#allocation14_spill] sm:$0xff]  ;;  %v9236_v47 = vld [vmem:[#allocation17_spill] sm:$0xff] }
 0xb69   :  { %v8140_v1 = vsel %vm6346_vm4, %v3618_v21, %v8023_v40  ;;  %v9237_v21 = vld [vmem:[#allocation26_spill] sm:$0xff]  ;;  %v9238_v40 = vld [vmem:[#allocation25_spill] sm:$0xff] }
 0xb6a   :  { %3755 = vmatmul.mubr.f32.vlgmr.msra.gmra.mxu0 %v8140_v1  ;;  %3826 = vmatmul.mubr.f32.vlgmr.msra.gmra.mxu1 %v8140_v1 }
 0xb6b   :  { %3926 = vmatpush1.msra.mxu0 %v7665_v26  ;;  %3997 = vmatpush1.msra.mxu1 %v7670_v2 }
 0xb6c   :  { %3927 = vmatprep.subr.mxu0 %v7677_v42  ;;  %3998 = vmatprep.subr.mxu1 %v7682_v4 }
 0xb6d   :  { %3928 = vmatpush1.msra.mxu0 %v7689_v11  ;;  %3999 = vmatpush1.msra.mxu1 %v7694_v37 }
 0xb6e   :  { %3929 = vmatprep.subr.mxu0 %v7701_v35  ;;  %4000 = vmatprep.subr.mxu1 %v7706_v52 }
 0xb6f   :  { %3930 = vmatpush1.msra.mxu0 %v7713_v33  ;;  %4001 = vmatpush1.msra.mxu1 %v7718_v6 }
 0xb70   :  { %3931 = vmatprep.subr.mxu0 %v7725_v41  ;;  %4002 = vmatprep.subr.mxu1 %v7730_v31 }
 0xb71   :  { %3932 = vmatpush1.msra.mxu0 %v7737_v23  ;;  %4003 = vmatpush1.msra.mxu1 %v7742_v24 }
 0xb72   :  { %3933 = vmatprep.subr.mxu0 %v7749_v27  ;;  %4004 = vmatprep.subr.mxu1 %v7754_v28 }
 0xb73   :  { %3934 = vmatpush1.msra.mxu0 %v7761_v46  ;;  %4005 = vmatpush1.msra.mxu1 %v7766_v48 }
 0xb74   :  { %3935 = vmatprep.subr.mxu0 %v7773_v49  ;;  %4006 = vmatprep.subr.mxu1 %v7778_v53 }
 0xb75   :  { %3936 = vmatpush1.msra.mxu0 %v7785_v54  ;;  %4007 = vmatpush1.msra.mxu1 %v7790_v55 }
 0xb76   :  { %3937 = vmatprep.subr.mxu0 %v7797_v56  ;;  %4008 = vmatprep.subr.mxu1 %v7802_v57 }
 0xb77   :  { %3938 = vmatpush1.msra.mxu0 %v7809_v58  ;;  %4009 = vmatpush1.msra.mxu1 %v7814_v59 }
 0xb78   :  { %3939 = vmatprep.subr.mxu0 %v7819_v60  ;;  %4010 = vmatprep.subr.mxu1 %v7826_v61 }
 0xb79   :  { %3940 = vmatpush1.msra.mxu0 %v7831_v63  ;;  %4011 = vmatpush1.msra.mxu1 %v7836_v0 }
 0xb7a   :  { %3941 = vmatprep.subr.mxu0 %v7843_v8  ;;  %4012 = vmatprep.subr.mxu1 %v7848_v50 }
 0xb7b   :  { %3942 = vmatpush1.msra.mxu0 %v7853_v45  ;;  %4013 = vmatpush1.msra.mxu1 %v7860_v25 }
 0xb7c   :  { %3943 = vmatprep.subr.mxu0 %v7865_v51  ;;  %4014 = vmatprep.subr.mxu1 %v7870_v20 }
 0xb7d   :  { %3944 = vmatpush1.msra.mxu0 %v7877_v18  ;;  %4015 = vmatpush1.msra.mxu1 %v7882_v13 }
 0xb7e   :  { %3945 = vmatprep.subr.mxu0 %v7889_v43  ;;  %4016 = vmatprep.subr.mxu1 %v9218_v3 }
 0xb7f   :  { %3946 = vmatpush1.msra.mxu0 %v9219_v34  ;;  %4017 = vmatpush1.msra.mxu1 %v9220_v9 }
 0xb80   :  { %3947 = vmatprep.subr.mxu0 %v9221_v30  ;;  %4018 = vmatprep.subr.mxu1 %v9222_v62 }
 0xb81   :  { %3948 = vmatpush1.msra.mxu0 %v9223_v44  ;;  %4019 = vmatpush1.msra.mxu1 %v9224_v12  ;;  %v9248_v44 = vld [vmem:[#allocation41_spill] sm:$0xff] }
 0xb82   :  { %3949 = vmatprep.subr.mxu0 %v9225_v7  ;;  %4020 = vmatprep.subr.mxu1 %v9226_v29  ;;  %v9247_v29 = vld [vmem:[#allocation8_spill] sm:$0xff] }
 0xb83   :  { %3950 = vmatpush1.msra.mxu0 %v9227_v17  ;;  %4021 = vmatpush1.msra.mxu1 %v9228_v22  ;;  %v9239_v22 = vld [vmem:[#allocation7_spill] sm:$0xff] }
 0xb84   :  { %3951 = vmatprep.subr.mxu0 %v9229_v5  ;;  %4022 = vmatprep.subr.mxu1 %v9230_v16  ;;  %v9240_v5 = vmov 0.0   ;;  %v9241_v16 = vld [vmem:[#allocation18_spill] sm:$0xff] }
 0xb85   :  { %3952 = vmatpush1.msra.mxu0 %v9231_v39  ;;  %4023 = vmatpush1.msra.mxu1 %v9232_v14  ;;  %v9242_v14 = vld [vmem:[#allocation48_spill] sm:$0xff] }
 0xb86   :  { %3953 = vmatprep.subr.mxu0 %v9233_v10  ;;  %4024 = vmatprep.subr.mxu1 %v9234_v15  ;;  %v9243_v10 = vld [vmem:[#allocation34_spill] sm:$0xff]  ;;  %v9244_v15 = vld [vmem:[#allocation28_spill] sm:$0xff] }
 0xb87   :  { %3954 = vmatpush1.msra.mxu0 %v9235_v32  ;;  %4025 = vmatpush1.msra.mxu1 %v9236_v47  ;;  %v9245_v32 = vld [vmem:[#allocation39_spill] sm:$0xff] }
 0xb88   :  { %3955 = vmatprep.subr.mxu0 %v9237_v21  ;;  %4026 = vmatprep.subr.mxu1 %v9238_v40  ;;  %v2511_v39 = vadd.f32 %v9245_v32, %v9244_v15  ;;  %v9246_v21 = vld [vmem:[#allocation62_spill] sm:$0xff] }
 0xb89   :  { %3956 = vmatpush1.msra.mxu0 %v9239_v22  ;;  %3989 = vmatprep.mubr.f32.mxu0 %v9240_v5  ;;  %v2513_v40 = vadd.f32 %v9247_v29, %v9246_v21 }
 0xb8a   :  { %4027 = vmatpush1.msra.mxu1 %v9241_v16  ;;  %4060 = vmatprep.mubr.f32.mxu1 %v9240_v5  ;;  %v2626_v16 = vadd.f32 %v9248_v44, %v7537_v36 }
 0xb8b   :  { %4160 = vmatprep.subr.mxu0 %v9242_v14  ;;  %4231 = vmatprep.subr.mxu1 %v9243_v10  ;;  %v9249_v10 = vld [vmem:[#allocation58_spill] sm:$0xff] }
 0xb8c   :  { %v2624_v32 = vadd.f32 %v9249_v10, %v7542_v38 }
 0xc2a   :  { %v3756_v47 = vpop.f32.mrf.mxu0  ;;  %v3827_v17 = vpop.f32.mrf.mxu1 }
 0xc2b   :  { %v3832_v7 = vadd.f32 %v3756_v47, %v2511_v39  ;;  %v3834_v15 = vadd.f32 %v3827_v17, %v2624_v32 }
 0xc2c   :  { %v3758_v22 = vpop.f32.mrf.mxu0  ;;  %v3829_v12 = vpop.f32.mrf.mxu1 }
 0xc2d   :  { %v3836_v62 = vmul.f32 0.5, %v3832_v7  ;;  %v3833_v5 = vadd.f32 %v3758_v22, %v2513_v40  ;;  %v3835_v30 = vadd.f32 %v3829_v12, %v2626_v16  ;;  %v3838_v9 = vmul.f32 0.5, %v3834_v15  ;;  %v9280_v15 = vld [vmem:[#allocation6_spill] sm:$0xff] }
 0xc2f   :  { %4948 = vtanh.f32 %v3836_v62  ;;  %v3837_v14 = vmul.f32 0.5, %v3833_v5 }
 0xc31   :  { %4950 = vtanh.f32 %v3837_v14 }
 0xc32   :  { %4952 = vtanh.f32 %v3835_v30 }
 0xc33   :  { %4954 = vtanh.f32 %v3838_v9 }
 0xc3c   :  { %v4949_v34 = vpop.eup %4948 }
 0xc3d   :  { %v3842_v29 = vadd.f32 1.0, %v4949_v34 }
 0xc3e   :  { %v4951_v39 = vpop.eup %4950 }
 0xc3f   :  { %v3845_v47 = vmul.f32 0.5, %v3842_v29  ;;  %v3843_v21 = vadd.f32 1.0, %v4951_v39  ;;  %v4953_v3 = vpop.eup %4952 }
 0xc40   :  { %v4955_v17 = vpop.eup %4954 }
 0xc41   :  { %v3846_v44 = vmul.f32 0.5, %v3843_v21  ;;  %v3850_v7 = vmul.f32 %v4953_v3, %v3845_v47  ;;  %v3844_v22 = vadd.f32 1.0, %v4955_v17  ;;  %v2630_v21 = vadd.f32 %v9280_v15, %v7542_v38  ;;  %v4366_v15 = vld [vmem:[%s8640_s6 + $0x118] sm:$0xff] }
 0xc43   :  { %v3849_v40 = vmul.f32 %v3846_v44, %v8135_v19  ;;  %v3847_v5 = vmul.f32 0.5, %v3844_v22  ;;  %v4353_v22 = vld [vmem:[%s8640_s6 + $0xb0] sm:$0xff] }
 0xc45   :  { %v3851_v62 = vadd.f32 %v3850_v7, %v3849_v40 }
 0xc47   :  { %4956 = vtanh.f32 %v3851_v62  ;;  %v8222_v12 = vsel %vm6436_vm5, %v3851_v62, %v8135_v19 }
 0xc54   :  { %v4957_v34 = vpop.eup %4956 }
 0xc55   :  { %v3853_v16 = vmul.f32 %v4957_v34, %v3847_v5 }
 0xc57   :  { %v8227_v9 = vsel %vm6436_vm5, %v3853_v16, %v8140_v1 }
 0xc58   :  { %3990 = vmatmul.mubr.f32.vlgmr.msra.gmra.mxu0 %v8227_v9  ;;  %4061 = vmatmul.mubr.f32.vlgmr.msra.gmra.mxu1 %v8227_v9 }
 0xc59   :  { %4161 = vmatpush1.msra.mxu0 %v7665_v26  ;;  %4232 = vmatpush1.msra.mxu1 %v7670_v2  ;;  %v9251_v26 = vld [vmem:[#allocation49_spill] sm:$0xff] }
 0xc5a   :  { %4162 = vmatprep.subr.mxu0 %v7677_v42  ;;  %4233 = vmatprep.subr.mxu1 %v7682_v4  ;;  %v9252_v2 = vld [vmem:[#allocation33_spill] sm:$0xff]  ;;  %v9254_v4 = vld [vmem:[#allocation50_spill] sm:$0xff] }
 0xc5b   :  { %4163 = vmatpush1.msra.mxu0 %v7689_v11  ;;  %4234 = vmatpush1.msra.mxu1 %v7694_v37  ;;  %v9253_v42 = vld [vmem:[#allocation9_spill] sm:$0xff]  ;;  %v9255_v11 = vld [vmem:[#allocation10_spill] sm:$0xff]  ;;  %v9256_v37 = vld [vmem:[#allocation51_spill] sm:$0xff] }
 0xc5c   :  { %4164 = vmatprep.subr.mxu0 %v7701_v35  ;;  %4235 = vmatprep.subr.mxu1 %v7706_v52  ;;  %v9257_v35 = vld [vmem:[#allocation36_spill] sm:$0xff]  ;;  %v9258_v52 = vld [vmem:[#allocation19_spill] sm:$0xff] }
 0xc5d   :  { %4165 = vmatpush1.msra.mxu0 %v7713_v33  ;;  %4236 = vmatpush1.msra.mxu1 %v7718_v6  ;;  %v9259_v33 = vld [vmem:[#allocation35_spill] sm:$0xff] }
 0xc5e   :  { %4166 = vmatprep.subr.mxu0 %v7725_v41  ;;  %4237 = vmatprep.subr.mxu1 %v7730_v31  ;;  %v9260_v6 = vld [vmem:[#allocation11_spill] sm:$0xff]  ;;  %v9261_v41 = vld [vmem:[#allocation20_spill] sm:$0xff]  ;;  %v9262_v31 = vld [vmem:[#allocation21_spill] sm:$0xff] }
 0xc5f   :  { %4167 = vmatpush1.msra.mxu0 %v7737_v23  ;;  %4238 = vmatpush1.msra.mxu1 %v7742_v24  ;;  %v9263_v23 = vld [vmem:[#allocation12_spill] sm:$0xff]  ;;  %v9264_v24 = vld [vmem:[#allocation13_spill] sm:$0xff] }
 0xc60   :  { %4168 = vmatprep.subr.mxu0 %v7749_v27  ;;  %4239 = vmatprep.subr.mxu1 %v7754_v28  ;;  %v9265_v27 = vld [vmem:[#allocation22_spill] sm:$0xff]  ;;  %v9266_v28 = vld [vmem:[#allocation23_spill] sm:$0xff] }
 0xc61   :  { %4169 = vmatpush1.msra.mxu0 %v7761_v46  ;;  %4240 = vmatpush1.msra.mxu1 %v7766_v48  ;;  %v9267_v46 = vld [vmem:[#allocation16_spill] sm:$0xff]  ;;  %v9268_v48 = vld [vmem:[#allocation14_spill] sm:$0xff] }
 0xc62   :  { %4170 = vmatprep.subr.mxu0 %v7773_v49  ;;  %4241 = vmatprep.subr.mxu1 %v7778_v53  ;;  %v9269_v49 = vld [vmem:[#allocation17_spill] sm:$0xff]  ;;  %v9270_v53 = vld [vmem:[#allocation26_spill] sm:$0xff] }
 0xc63   :  { %4171 = vmatpush1.msra.mxu0 %v7785_v54  ;;  %4242 = vmatpush1.msra.mxu1 %v7790_v55  ;;  %v9271_v54 = vld [vmem:[#allocation25_spill] sm:$0xff]  ;;  %v9272_v55 = vld [vmem:[#allocation7_spill] sm:$0xff] }
 0xc64   :  { %4172 = vmatprep.subr.mxu0 %v7797_v56  ;;  %4243 = vmatprep.subr.mxu1 %v7802_v57  ;;  %v9273_v56 = vmov 0.0   ;;  %v9274_v57 = vld [vmem:[#allocation18_spill] sm:$0xff] }
 0xc65   :  { %4173 = vmatpush1.msra.mxu0 %v7809_v58  ;;  %4244 = vmatpush1.msra.mxu1 %v7814_v59  ;;  %v9275_v58 = vld [vmem:[#allocation28_spill] sm:$0xff]  ;;  %v9276_v59 = vld [vmem:[#allocation45_spill] sm:$0xff] }
 0xc66   :  { %4174 = vmatprep.subr.mxu0 %v7819_v60  ;;  %4245 = vmatprep.subr.mxu1 %v7826_v61  ;;  %v2517_v60 = vadd.f32 %v9276_v59, %v9275_v58  ;;  %v4376_v59 = vld [vmem:[%s8640_s6 + $0x168] sm:$0xff] }
 0xc67   :  { %4175 = vmatpush1.msra.mxu0 %v7831_v63  ;;  %4246 = vmatpush1.msra.mxu1 %v7836_v0  ;;  %v9277_v0 = vld [vmem:[#allocation62_spill] sm:$0xff] }
 0xc68   :  { %4176 = vmatprep.subr.mxu0 %v7843_v8  ;;  %4247 = vmatprep.subr.mxu1 %v7848_v50  ;;  %v9278_v8 = vld [vmem:[#allocation56_spill] sm:$0xff] }
 0xc69   :  { %4177 = vmatpush1.msra.mxu0 %v7853_v45  ;;  %4248 = vmatpush1.msra.mxu1 %v7860_v25  ;;  %v2519_v50 = vadd.f32 %v9278_v8, %v9277_v0  ;;  %v4372_v8 = vld [vmem:[%s8640_s6 + $0x148] sm:$0xff] }
 0xc6a   :  { %4178 = vmatprep.subr.mxu0 %v7865_v51  ;;  %4249 = vmatprep.subr.mxu1 %v7870_v20  ;;  %v9279_v20 = vld [vmem:[#allocation43_spill] sm:$0xff] }
 0xc6b   :  { %4179 = vmatpush1.msra.mxu0 %v7877_v18  ;;  %4250 = vmatpush1.msra.mxu1 %v7882_v13  ;;  %v2632_v18 = vadd.f32 %v9279_v20, %v7537_v36  ;;  %v4373_v20 = vld [vmem:[%s8640_s6 + $0x150] sm:$0xff] }
 0xc6c   :  { %4180 = vmatprep.subr.mxu0 %v7889_v43  ;;  %4251 = vmatprep.subr.mxu1 %v9251_v26 }
 0xc6d   :  { %4181 = vmatpush1.msra.mxu0 %v9252_v2  ;;  %4252 = vmatpush1.msra.mxu1 %v9253_v42 }
 0xc6e   :  { %4182 = vmatprep.subr.mxu0 %v9254_v4  ;;  %4253 = vmatprep.subr.mxu1 %v9255_v11  ;;  %v4391_v11 = vld [vmem:[%s8640_s6 + $0x1e0] sm:$0xff] }
 0xc6f   :  { %4183 = vmatpush1.msra.mxu0 %v9256_v37  ;;  %4254 = vmatpush1.msra.mxu1 %v9257_v35  ;;  %v4394_v37 = vld [vmem:[%s8640_s6 + $0x1f8] sm:$0xff]  ;;  %v4388_v35 = vld [vmem:[%s8640_s6 + $0x1c8] sm:$0xff] }
 0xc70   :  { %4184 = vmatprep.subr.mxu0 %v9258_v52  ;;  %4255 = vmatprep.subr.mxu1 %v9259_v33  ;;  %v4393_v52 = vld [vmem:[%s8640_s6 + $0x1f0] sm:$0xff]  ;;  %v4387_v33 = vld [vmem:[%s8640_s6 + $0x1c0] sm:$0xff] }
 0xc71   :  { %4185 = vmatpush1.msra.mxu0 %v9260_v6  ;;  %4256 = vmatpush1.msra.mxu1 %v9261_v41  ;;  %v4390_v6 = vld [vmem:[%s8640_s6 + $0x1d8] sm:$0xff]  ;;  %v4384_v41 = vld [vmem:[%s8640_s6 + $0x1a8] sm:$0xff] }
 0xc72   :  { %4186 = vmatprep.subr.mxu0 %v9262_v31  ;;  %4257 = vmatprep.subr.mxu1 %v9263_v23  ;;  %v4389_v31 = vld [vmem:[%s8640_s6 + $0x1d0] sm:$0xff]  ;;  %v4383_v23 = vld [vmem:[%s8640_s6 + $0x1a0] sm:$0xff] }
 0xc73   :  { %4187 = vmatpush1.msra.mxu0 %v9264_v24  ;;  %4258 = vmatpush1.msra.mxu1 %v9265_v27  ;;  %v4386_v24 = vld [vmem:[%s8640_s6 + $0x1b8] sm:$0xff]  ;;  %v4380_v27 = vld [vmem:[%s8640_s6 + $0x188] sm:$0xff] }
 0xc74   :  { %4188 = vmatprep.subr.mxu0 %v9266_v28  ;;  %4259 = vmatprep.subr.mxu1 %v9267_v46  ;;  %v4385_v28 = vld [vmem:[%s8640_s6 + $0x1b0] sm:$0xff] }
 0xc75   :  { %4189 = vmatpush1.msra.mxu0 %v9268_v48  ;;  %4260 = vmatpush1.msra.mxu1 %v9269_v49  ;;  %v4379_v48 = vld [vmem:[%s8640_s6 + $0x180] sm:$0xff] }
 0xc76   :  { %4190 = vmatprep.subr.mxu0 %v9270_v53  ;;  %4261 = vmatprep.subr.mxu1 %v9271_v54 }
 0xc77   :  { %4191 = vmatpush1.msra.mxu0 %v9272_v55  ;;  %4224 = vmatprep.mubr.f32.mxu0 %v9273_v56 }
 0xc78   :  { %4262 = vmatpush1.msra.mxu1 %v9274_v57  ;;  %4295 = vmatprep.mubr.f32.mxu1 %v9273_v56 }
 0xc79   :  { %4466 = vmatprep.subr.mxu1 %v4394_v37  ;;  %v4345_v37 = vld [vmem:[%s8640_s6 + $0x70] sm:$0xff] }
 0xd18   :  { %v3991_v61 = vpop.f32.mrf.mxu0  ;;  %v4062_v63 = vpop.f32.mrf.mxu1 }
 0xd19   :  { %v4067_v45 = vadd.f32 %v3991_v61, %v2517_v60  ;;  %v4069_v14 = vadd.f32 %v4062_v63, %v2630_v21  ;;  %v4381_v60 = vld [vmem:[%s8640_s6 + $0x190] sm:$0xff]  ;;  %v4375_v61 = vld [vmem:[%s8640_s6 + $0x160] sm:$0xff]  ;;  %v4378_v63 = vld [vmem:[%s8640_s6 + $0x178] sm:$0xff] }
 0xd1a   :  { %v3993_v25 = vpop.f32.mrf.mxu0  ;;  %v4064_v51 = vpop.f32.mrf.mxu1  ;;  %v4360_v21 = vld [vmem:[%s8640_s6 + $0xe8] sm:$0xff] }
 0xd1b   :  { %v4071_v13 = vmul.f32 0.5, %v4067_v45  ;;  %v4068_v43 = vadd.f32 %v3993_v25, %v2519_v50  ;;  %v4070_v3 = vadd.f32 %v4064_v51, %v2632_v18  ;;  %v4073_v10 = vmul.f32 0.5, %v4069_v14  ;;  %v4377_v50 = vld [vmem:[%s8640_s6 + $0x170] sm:$0xff]  ;;  %v4371_v45 = vld [vmem:[%s8640_s6 + $0x140] sm:$0xff]  ;;  %v4374_v25 = vld [vmem:[%s8640_s6 + $0x158] sm:$0xff] }
 0xd1c   :  { %v4368_v51 = vld [vmem:[%s8640_s6 + $0x128] sm:$0xff]  ;;  %v4367_v18 = vld [vmem:[%s8640_s6 + $0x120] sm:$0xff]  ;;  %v4365_v14 = vld [vmem:[%s8640_s6 + $0x110] sm:$0xff] }
 0xd1d   :  { %4958 = vtanh.f32 %v4071_v13  ;;  %v4072_v19 = vmul.f32 0.5, %v4068_v43  ;;  %v4370_v13 = vld [vmem:[%s8640_s6 + $0x138] sm:$0xff]  ;;  %v4364_v43 = vld [vmem:[%s8640_s6 + $0x108] sm:$0xff] }
 0xd1f   :  { %4960 = vtanh.f32 %v4072_v19  ;;  %v4369_v19 = vld [vmem:[%s8640_s6 + $0x130] sm:$0xff] }
 0xd20   :  { %4962 = vtanh.f32 %v4070_v3  ;;  %v4363_v3 = vld [vmem:[%s8640_s6 + $0x100] sm:$0xff] }
 0xd21   :  { %4964 = vtanh.f32 %v4073_v10  ;;  %v4359_v10 = vld [vmem:[%s8640_s6 + $0xe0] sm:$0xff] }
 0xd2a   :  { %v4959_v32 = vpop.eup %4958 }
 0xd2b   :  { %v4077_v29 = vadd.f32 1.0, %v4959_v32  ;;  %v4362_v32 = vld [vmem:[%s8640_s6 + $0xf8] sm:$0xff] }
 0xd2c   :  { %v4961_v39 = vpop.eup %4960 }
 0xd2d   :  { %v4080_v47 = vmul.f32 0.5, %v4077_v29  ;;  %v4078_v44 = vadd.f32 1.0, %v4961_v39  ;;  %v4963_v7 = vpop.eup %4962  ;;  %v4356_v29 = vld [vmem:[%s8640_s6 + $0xc8] sm:$0xff]  ;;  %v4361_v39 = vld [vmem:[%s8640_s6 + $0xf0] sm:$0xff] }
 0xd2e   :  { %v4965_v34 = vpop.eup %4964 }
 0xd2f   :  { %v4081_v40 = vmul.f32 0.5, %v4078_v44  ;;  %v4085_v62 = vmul.f32 %v4963_v7, %v4080_v47  ;;  %v4079_v16 = vadd.f32 1.0, %v4965_v34  ;;  %v4355_v47 = vld [vmem:[%s8640_s6 + $0xc0] sm:$0xff]  ;;  %v4358_v44 = vld [vmem:[%s8640_s6 + $0xd8] sm:$0xff]  ;;  %v4352_v7 = vld [vmem:[%s8640_s6 + $0xa8] sm:$0xff] }
 0xd30   :  { %v4347_v34 = vld [vmem:[%s8640_s6 + $0x80] sm:$0xff] }
 0xd31   :  { %v4084_v30 = vmul.f32 %v4081_v40, %v8222_v12  ;;  %v4082_v26 = vmul.f32 0.5, %v4079_v16  ;;  %v4357_v40 = vld [vmem:[%s8640_s6 + $0xd0] sm:$0xff]  ;;  %v4350_v16 = vld [vmem:[%s8640_s6 + $0x98] sm:$0xff] }
 0xd33   :  { %v4086_v17 = vadd.f32 %v4085_v62, %v4084_v30  ;;  %v4351_v62 = vld [vmem:[%s8640_s6 + $0xa0] sm:$0xff]  ;;  %v4354_v30 = vld [vmem:[%s8640_s6 + $0xb8] sm:$0xff] }
 0xd35   :  { %4966 = vtanh.f32 %v4086_v17  ;;  %v8307_v5 = vsel %vm6524_vm6, %v4086_v17, %v8222_v12  ;;  %v4392_v12 = vld [vmem:[%s8640_s6 + $0x1e8] sm:$0xff] }
 0xd36   :  { %4395 = vmatprep.subr.mxu0 %v4392_v12  ;;  %v4348_v17 = vld [vmem:[%s8640_s6 + $0x88] sm:$0xff]  ;;  %v4346_v12 = vld [vmem:[%s8640_s6 + $0x78] sm:$0xff] }
 0xd42   :  { %v4967_v2 = vpop.eup %4966 }
 0xd43   :  { %v4088_v42 = vmul.f32 %v4967_v2, %v4082_v26  ;;  %v4344_v26 = vld [vmem:[%s8640_s6 + $0x68] sm:$0xff]  ;;  %v4349_v2 = vld [vmem:[%s8640_s6 + $0x90] sm:$0xff] }
 0xd45   :  { %v8312_v4 = vsel %vm6524_vm6, %v4088_v42, %v8227_v9  ;;  %v4343_v42 = vld [vmem:[%s8640_s6 + $0x60] sm:$0xff] }
 0xd46   :  { %4225 = vmatmul.mubr.f32.vlgmr.msra.gmra.mxu0 %v8312_v4  ;;  %4296 = vmatmul.mubr.f32.vlgmr.msra.gmra.mxu1 %v8312_v4 }
 0xd47   :  { %4459 = vmatprep.mubr.f32.mxu0 %v9273_v56  ;;  %4530 = vmatprep.mubr.f32.mxu1 %v9273_v56  ;;  %v4382_v56 = vld [vmem:[%s8640_s6 + $0x198] sm:$0xff] }
 0xd48   :  { %4396 = vmatpush1.msra.mxu0 %v4391_v11  ;;  %4467 = vmatpush1.msra.mxu1 %v4393_v52  ;;  %v4340_v11 = vld [vmem:[%s8640_s6 + $0x48] sm:$0xff]  ;;  %v4342_v52 = vld [vmem:[%s8640_s6 + $0x58] sm:$0xff] }
 0xd49   :  { %4397 = vmatprep.subr.mxu0 %v4388_v35  ;;  %4468 = vmatprep.subr.mxu1 %v4390_v6  ;;  %v4339_v35 = vld [vmem:[%s8640_s6 + $0x40] sm:$0xff]  ;;  %v4341_v6 = vld [vmem:[%s8640_s6 + $0x50] sm:$0xff] }
 0xd4a   :  { %4398 = vmatpush1.msra.mxu0 %v4387_v33  ;;  %4469 = vmatpush1.msra.mxu1 %v4389_v31  ;;  %v4336_v33 = vld [vmem:[%s8640_s6 + $0x28] sm:$0xff]  ;;  %v4589_v31 = vld [vmem:[%s8642_s8 + $0x78] sm:$0xff] }
 0xd4b   :  { %4399 = vmatprep.subr.mxu0 %v4384_v41  ;;  %4470 = vmatprep.subr.mxu1 %v4386_v24  ;;  %v4335_v41 = vld [vmem:[%s8640_s6 + $0x20] sm:$0xff] }
 0xd4c   :  { %4400 = vmatpush1.msra.mxu0 %v4383_v23  ;;  %4471 = vmatpush1.msra.mxu1 %v4385_v28  ;;  %v9282_v23 = vld [vmem:[#allocation42_spill] sm:$0xff]  ;;  %v9283_v28 = vld [vmem:[#allocation32_spill] sm:$0xff] }
 0xd4d   :  { %4401 = vmatprep.subr.mxu0 %v4380_v27  ;;  %4472 = vmatprep.subr.mxu1 %v4382_v56  ;;  %v2523_v24 = vadd.f32 %v9282_v23, %v9275_v58 }
 0xd4e   :  { %4402 = vmatpush1.msra.mxu0 %v4379_v48  ;;  %4473 = vmatpush1.msra.mxu1 %v4381_v60  ;;  %v2525_v48 = vadd.f32 %v9283_v28, %v9277_v0 }
 0xd4f   :  { %4403 = vmatprep.subr.mxu0 %v4376_v59  ;;  %4474 = vmatprep.subr.mxu1 %v4378_v63  ;;  %v9285_v63 = vld [vmem:[#allocation47_spill] sm:$0xff] }
 0xd50   :  { %4404 = vmatpush1.msra.mxu0 %v4375_v61  ;;  %4475 = vmatpush1.msra.mxu1 %v4377_v50 }
 0xd51   :  { %4405 = vmatprep.subr.mxu0 %v4372_v8  ;;  %4476 = vmatprep.subr.mxu1 %v4374_v25  ;;  %v2636_v8 = vadd.f32 %v9285_v63, %v7542_v38 }
 0xd52   :  { %4406 = vmatpush1.msra.mxu0 %v4371_v45  ;;  %4477 = vmatpush1.msra.mxu1 %v4373_v20 }
 0xd53   :  { %4407 = vmatprep.subr.mxu0 %v4368_v51  ;;  %4478 = vmatprep.subr.mxu1 %v4370_v13 }
 0xd54   :  { %4408 = vmatpush1.msra.mxu0 %v4367_v18  ;;  %4479 = vmatpush1.msra.mxu1 %v4369_v19 }
 0xd55   :  { %4409 = vmatprep.subr.mxu0 %v4364_v43  ;;  %4480 = vmatprep.subr.mxu1 %v4366_v15 }
 0xd56   :  { %4410 = vmatpush1.msra.mxu0 %v4363_v3  ;;  %4481 = vmatpush1.msra.mxu1 %v4365_v14 }
 0xd57   :  { %4411 = vmatprep.subr.mxu0 %v4360_v21  ;;  %4482 = vmatprep.subr.mxu1 %v4362_v32 }
 0xd58   :  { %4412 = vmatpush1.msra.mxu0 %v4359_v10  ;;  %4483 = vmatpush1.msra.mxu1 %v4361_v39 }
 0xd59   :  { %4413 = vmatprep.subr.mxu0 %v4356_v29  ;;  %4484 = vmatprep.subr.mxu1 %v4358_v44 }
 0xd5a   :  { %4414 = vmatpush1.msra.mxu0 %v4355_v47  ;;  %4485 = vmatpush1.msra.mxu1 %v4357_v40  ;;  %v4588_v40 = vld [vmem:[%s8642_s8 + $0x70] sm:$0xff] }
 0xd5b   :  { %4415 = vmatprep.subr.mxu0 %v4352_v7  ;;  %4486 = vmatprep.subr.mxu1 %v4354_v30  ;;  %v4586_v30 = vld [vmem:[%s8642_s8 + $0x60] sm:$0xff] }
 0xd5c   :  { %4416 = vmatpush1.msra.mxu0 %v4351_v62  ;;  %4487 = vmatpush1.msra.mxu1 %v4353_v22  ;;  %v4587_v62 = vld [vmem:[%s8642_s8 + $0x68] sm:$0xff]  ;;  %v4584_v22 = vld [vmem:[%s8642_s8 + $0x50] sm:$0xff] }
 0xd5d   :  { %4417 = vmatprep.subr.mxu0 %v4348_v17  ;;  %4488 = vmatprep.subr.mxu1 %v4350_v16  ;;  %v4585_v17 = vld [vmem:[%s8642_s8 + $0x58] sm:$0xff]  ;;  %v4582_v16 = vld [vmem:[%s8642_s8 + $0x40] sm:$0xff] }
 0xd5e   :  { %4418 = vmatpush1.msra.mxu0 %v4347_v34  ;;  %4489 = vmatpush1.msra.mxu1 %v4349_v2  ;;  %v4583_v34 = vld [vmem:[%s8642_s8 + $0x48] sm:$0xff]  ;;  %v4580_v2 = vld [vmem:[%s8642_s8 + $0x30] sm:$0xff] }
 0xd5f   :  { %4419 = vmatprep.subr.mxu0 %v4344_v26  ;;  %4490 = vmatprep.subr.mxu1 %v4346_v12  ;;  %v4581_v26 = vld [vmem:[%s8642_s8 + $0x38] sm:$0xff]  ;;  %v4578_v12 = vld [vmem:[%s8642_s8 + $0x20] sm:$0xff] }
 0xd60   :  { %4420 = vmatpush1.msra.mxu0 %v4343_v42  ;;  %4491 = vmatpush1.msra.mxu1 %v4345_v37  ;;  %v4579_v42 = vld [vmem:[%s8642_s8 + $0x28] sm:$0xff]  ;;  %v4576_v37 = vld [vmem:[%s8642_s8 + $0x10] sm:$0xff] }
 0xd61   :  { %4421 = vmatprep.subr.mxu0 %v4340_v11  ;;  %4492 = vmatprep.subr.mxu1 %v4342_v52  ;;  %v4577_v11 = vld [vmem:[%s8642_s8 + $0x18] sm:$0xff]  ;;  %v4574_v52 = vld [vmem:[%s8642_s8] sm:$0xff] }
 0xd62   :  { %4422 = vmatpush1.msra.mxu0 %v4339_v35  ;;  %4493 = vmatpush1.msra.mxu1 %v4341_v6  ;;  %v4575_v35 = vld [vmem:[%s8642_s8 + $0x8] sm:$0xff] }
 0xd63   :  { %4423 = vmatprep.subr.mxu0 %v4336_v33  ;;  %4494 = vmatprep.subr.mxu1 %v9267_v46  ;;  %v9288_v33 = vld [vmem:[#allocation31_spill] sm:$0xff] }
 0xd64   :  { %4424 = vmatpush1.msra.mxu0 %v4335_v41  ;;  %4495 = vmatpush1.msra.mxu1 %v9269_v49  ;;  %v9289_v6 = vld [vmem:[#allocation15_spill] sm:$0xff]  ;;  %v9290_v41 = vld [vmem:[#allocation60_spill] sm:$0xff] }
 0xd65   :  { %4425 = vmatprep.subr.mxu0 %v9270_v53  ;;  %4496 = vmatprep.subr.mxu1 %v9271_v54 }
 0xd66   :  { %4426 = vmatpush1.msra.mxu0 %v9272_v55  ;;  %4497 = vmatpush1.msra.mxu1 %v9274_v57  ;;  %v9284_v55 = vld [vmem:[#allocation59_spill] sm:$0xff] }
 0xd67   :  { %4783 = vmatprep.subr.mxu0 %v4589_v31  ;;  %v2638_v61 = vadd.f32 %v9284_v55, %v7537_v36 }
 0xe06   :  { %v4226_v27 = vpop.f32.mrf.mxu0  ;;  %v4297_v46 = vpop.f32.mrf.mxu1 }
 0xe07   :  { %v4302_v56 = vadd.f32 %v4226_v27, %v2523_v24  ;;  %v4304_v50 = vadd.f32 %v4297_v46, %v2636_v8  ;;  %v9291_v27 = vld [vmem:[#allocation63_spill] sm:$0xff] }
 0xe08   :  { %v4228_v59 = vpop.f32.mrf.mxu0  ;;  %v4299_v49 = vpop.f32.mrf.mxu1  ;;  %v2531_v46 = vadd.f32 %v9291_v27, %v9277_v0 }
 0xe09   :  { %v4306_v53 = vmul.f32 0.5, %v4302_v56  ;;  %v4303_v60 = vadd.f32 %v4228_v59, %v2525_v48  ;;  %v4305_v57 = vadd.f32 %v4299_v49, %v2638_v61  ;;  %v4308_v45 = vmul.f32 0.5, %v4304_v50  ;;  %v9292_v59 = vld [vmem:[#allocation64_spill] sm:$0xff] }
 0xe0b   :  { %4968 = vtanh.f32 %v4306_v53  ;;  %v4307_v54 = vmul.f32 0.5, %v4303_v60 }
 0xe0d   :  { %4970 = vtanh.f32 %v4307_v54 }
 0xe0e   :  { %4972 = vtanh.f32 %v4305_v57 }
 0xe0f   :  { %4974 = vtanh.f32 %v4308_v45 }
 0xe18   :  { %v4969_v25 = vpop.eup %4968 }
 0xe19   :  { %v4312_v51 = vadd.f32 1.0, %v4969_v25 }
 0xe1a   :  { %v4971_v20 = vpop.eup %4970 }
 0xe1b   :  { %v4315_v18 = vmul.f32 0.5, %v4312_v51  ;;  %v4313_v13 = vadd.f32 1.0, %v4971_v20  ;;  %v4973_v19 = vpop.eup %4972 }
 0xe1c   :  { %v4975_v32 = vpop.eup %4974 }
 0xe1d   :  { %v4316_v43 = vmul.f32 0.5, %v4313_v13  ;;  %v4320_v15 = vmul.f32 %v4973_v19, %v4315_v18  ;;  %v4314_v29 = vadd.f32 1.0, %v4975_v32 }
 0xe1f   :  { %v4319_v3 = vmul.f32 %v4316_v43, %v8307_v5  ;;  %v4317_v39 = vmul.f32 0.5, %v4314_v29 }
 0xe21   :  { %v4321_v21 = vadd.f32 %v4320_v15, %v4319_v3 }
 0xe23   :  { %4976 = vtanh.f32 %v4321_v21  ;;  %v8513_v10 = vsel %vm6748_vm7, %v4321_v21, %v8307_v5  ;;  %v9287_v5 = vld [vmem:[#allocation57_spill] sm:$0xff] }
 0xe30   :  { %v4977_v47 = vpop.eup %4976 }
 0xe31   :  { %v4323_v44 = vmul.f32 %v4977_v47, %v4317_v39 }
 0xe33   :  { %v8518_v7 = vsel %vm6748_vm7, %v4323_v44, %v8312_v4 }
 0xe34   :  { %4460 = vmatmul.mubr.f32.vlgmr.msra.gmra.mxu0 %v8518_v7  ;;  %4531 = vmatmul.mubr.f32.vlgmr.msra.gmra.mxu1 %v8518_v7 }
 0xe35   :  { %4784 = vmatpush3.msra.mxu0 %v4589_v31  ;;  %4815 = vmatprep.mubr.f32.mxu0 %v9287_v5  ;;  %v2529_v31 = vadd.f32 %v9290_v41, %v9275_v58  ;;  %v9293_v58 = vld [vmem:[#allocation61_spill] sm:$0xff] }
 0xe36   :  { %4785 = vmatprep.subr.mxu0 %v4588_v40  ;;  %v2642_v49 = vadd.f32 %v9293_v58, %v7542_v38  ;;  %v4758_v38 = vld [vmem:[%s8643_s9] ss:$0 sm:$0xff] }
 0xe37   :  { %4786 = vmatpush3.msra.mxu0 %v4588_v40 }
 0xe38   :  { %4787 = vmatprep.subr.mxu0 %v4587_v62 }
 0xe39   :  { %4788 = vmatpush3.msra.mxu0 %v4587_v62 }
 0xe3a   :  { %4789 = vmatprep.subr.mxu0 %v4586_v30 }
 0xe3b   :  { %4790 = vmatpush3.msra.mxu0 %v4586_v30 }
 0xe3c   :  { %4791 = vmatprep.subr.mxu0 %v4585_v17 }
 0xe3d   :  { %4792 = vmatpush3.msra.mxu0 %v4585_v17 }
 0xe3e   :  { %4793 = vmatprep.subr.mxu0 %v4584_v22 }
 0xe3f   :  { %4794 = vmatpush3.msra.mxu0 %v4584_v22 }
 0xe40   :  { %4795 = vmatprep.subr.mxu0 %v4583_v34 }
 0xe41   :  { %4796 = vmatpush3.msra.mxu0 %v4583_v34 }
 0xe42   :  { %4797 = vmatprep.subr.mxu0 %v4582_v16 }
 0xe43   :  { %4798 = vmatpush3.msra.mxu0 %v4582_v16 }
 0xe44   :  { %4799 = vmatprep.subr.mxu0 %v4581_v26 }
 0xe45   :  { %4800 = vmatpush3.msra.mxu0 %v4581_v26 }
 0xe46   :  { %4801 = vmatprep.subr.mxu0 %v4580_v2 }
 0xe47   :  { %4802 = vmatpush3.msra.mxu0 %v4580_v2 }
 0xe48   :  { %4803 = vmatprep.subr.mxu0 %v4579_v42 }
 0xe49   :  { %4804 = vmatpush3.msra.mxu0 %v4579_v42 }
 0xe4a   :  { %4805 = vmatprep.subr.mxu0 %v4578_v12 }
 0xe4b   :  { %4806 = vmatpush3.msra.mxu0 %v4578_v12 }
 0xe4c   :  { %4807 = vmatprep.subr.mxu0 %v4577_v11 }
 0xe4d   :  { %4808 = vmatpush3.msra.mxu0 %v4577_v11 }
 0xe4e   :  { %4809 = vmatprep.subr.mxu0 %v4576_v37 }
 0xe4f   :  { %4810 = vmatpush3.msra.mxu0 %v4576_v37 }
 0xe50   :  { %4811 = vmatprep.subr.mxu0 %v4575_v35 }
 0xe51   :  { %4812 = vmatpush3.msra.mxu0 %v4575_v35 }
 0xe52   :  { %4813 = vmatprep.subr.mxu0 %v4574_v52 }
 0xe53   :  { %4814 = vmatpush3.msra.mxu0 %v4574_v52 }
 0xe54   :  { %4816 = vmatmul.mubr.f32.vlgmr.msra.gmra.mxu0 %v9288_v33 }
 0xe55   :  { %4818 = vmatprep.mubr.f32.mxu0 %v9289_v6 }
 0xe58   :  { %4819 = vmatmul.mubr.f32.gmra.mxu0 %v8140_v1  ;;  %v2644_v1 = vadd.f32 %v9292_v59, %v7537_v36 }
 0xe59   :  { %4821 = vmatprep.mubr.f32.mxu0 %v8227_v9 }
 0xe5c   :  { %4822 = vmatmul.mubr.f32.gmra.mxu0 %v8312_v4 }
 0xe5d   :  { %4824 = vmatprep.mubr.f32.mxu0 %v8518_v7 }
 0xef4   :  { %v4461_v23 = vpop.f32.mrf.mxu0  ;;  %v4532_v24 = vpop.f32.mrf.mxu1 }
 0xef5   :  { %v4537_v28 = vadd.f32 %v4461_v23, %v2529_v31  ;;  %v4539_v55 = vadd.f32 %v4532_v24, %v2642_v49 }
 0xef6   :  { %v4463_v48 = vpop.f32.mrf.mxu0  ;;  %v4534_v56 = vpop.f32.mrf.mxu1 }
 0xef7   :  { %v4541_v53 = vmul.f32 0.5, %v4537_v28  ;;  %v4538_v9 = vadd.f32 %v4463_v48, %v2531_v46  ;;  %v4540_v60 = vadd.f32 %v4534_v56, %v2644_v1  ;;  %v4543_v61 = vmul.f32 0.5, %v4539_v55 }
 0xef9   :  { %4978 = vtanh.f32 %v4541_v53  ;;  %v4542_v4 = vmul.f32 0.5, %v4538_v9 }
 0xefb   :  { %4980 = vtanh.f32 %v4542_v4 }
 0xefc   :  { %4982 = vtanh.f32 %v4540_v60 }
 0xefd   :  { %4984 = vtanh.f32 %v4543_v61 }
 0xf06   :  { %v4979_v54 = vpop.eup %4978 }
 0xf07   :  { %v4547_v0 = vadd.f32 1.0, %v4979_v54 }
 0xf08   :  { %v4981_v57 = vpop.eup %4980 }
 0xf09   :  { %v4550_v63 = vmul.f32 0.5, %v4547_v0  ;;  %v4548_v8 = vadd.f32 1.0, %v4981_v57  ;;  %v4983_v50 = vpop.eup %4982 }
 0xf0a   :  { %v4985_v19 = vpop.eup %4984 }
 0xf0b   :  { %v4551_v36 = vmul.f32 0.5, %v4548_v8  ;;  %v4555_v45 = vmul.f32 %v4983_v50, %v4550_v63  ;;  %v4549_v14 = vadd.f32 1.0, %v4985_v19 }
 0xf0d   :  { %v4554_v25 = vmul.f32 %v4551_v36, %v8513_v10  ;;  %v4552_v47 = vmul.f32 0.5, %v4549_v14 }
 0xf0f   :  { %v4556_v51 = vadd.f32 %v4555_v45, %v4554_v25 }
 0xf11   :  { %4986 = vtanh.f32 %v4556_v51  ;;  %v4560_v18 = vsel %vm7375_vm8, %v4556_v51, %v8513_v10 }
 0xf12   :  { %4757 = vst [vmem:[%s8636_s14 + $0x8] sm:$0xff] %v4560_v18 }
 0xf14   :  { %v4817_v13 = vpop.f32.mrf.mxu0 }
 0xf15   :  { %v4669_v43 = vadd.f32 %v4817_v13, %v4758_v38 }
 0xf16   :  { %v4663_v3 = vpop.f32.mrf.mxu0 }
 0xf17   :  { %4704 = vst.msk [vmem:[%s8644_s12 + $0x8] sm:$0xff] %vm4702_vm9, %v4669_v43  ;;  %v4664_v15 = vadd.f32 %v4758_v38, %v4663_v3 }
 0xf18   :  { %v4820_v21 = vpop.f32.mrf.mxu0 }
 0xf19   :  { %4703 = vst.msk [vmem:[%s8644_s12] sm:$0xff] %vm4702_vm9, %v4664_v15  ;;  %v4679_v10 = vadd.f32 %v4820_v21, %v4758_v38 }
 0xf1a   :  { %v4673_v32 = vpop.f32.mrf.mxu0 }
 0xf1b   :  { %4706 = vst.msk [vmem:[%s8644_s12 + $0x18] sm:$0xff] %vm4702_vm9, %v4679_v10  ;;  %v4674_v29 = vadd.f32 %v4758_v38, %v4673_v32 }
 0xf1c   :  { %v4823_v39 = vpop.f32.mrf.mxu0 }
 0xf1d   :  { %4705 = vst.msk [vmem:[%s8644_s12 + $0x10] sm:$0xff] %vm4702_vm9, %v4674_v29  ;;  %v4689_v44 = vadd.f32 %v4823_v39, %v4758_v38 }
 0xf1e   :  { %v4987_v40 = vpop.eup %4986  ;;  %v4683_v5 = vpop.f32.mrf.mxu0 }
 0xf1f   :  { %4708 = vst.msk [vmem:[%s8644_s12 + $0x28] sm:$0xff] %vm4702_vm9, %v4689_v44  ;;  %v4684_v62 = vadd.f32 %v4758_v38, %v4683_v5  ;;  %v4558_v30 = vmul.f32 %v4987_v40, %v4552_v47 }
 0xf21   :  { %4707 = vst.msk [vmem:[%s8644_s12 + $0x20] sm:$0xff] %vm4702_vm9, %v4684_v62  ;;  %v4559_v17 = vsel %vm7375_vm8, %v4558_v30, %v8518_v7 }
 0xf22   :  { %4756 = vst [vmem:[%s8633_s13 + $0x8] sm:$0xff] %v4559_v17  ;;  %4825 = vmatmul.mubr.f32.gmra.mxu0 %v4559_v17 }
 0xfe2   :  { %v4826_v22 = vpop.f32.mrf.mxu0 }
 0xfe3   :  { %v4699_v34 = vadd.f32 %v4826_v22, %v4758_v38 }
 0xfe4   :  { %v4693_v16 = vpop.f32.mrf.mxu0 }
 0xfe5   :  { %4710 = vst.msk [vmem:[%s8644_s12 + $0x38] sm:$0xff] %vm4702_vm9, %v4699_v34  ;;  %v4694_v26 = vadd.f32 %v4758_v38, %v4693_v16 }
 0xfe7   :  { %4709 = vst.msk [vmem:[%s8644_s12 + $0x30] sm:$0xff] %vm4702_vm9, %v4694_v26 }

</bundles_post_ra>
